<compile_context>
chip_gen: v6e
topology: v6e:2x2x1
jax: 0.10.0
libtpu: 0.0.40
codegen_flags: <defaults>
</compile_context>

<pallas_src>
import math
from functools import partial

import jax
import jax.numpy as jnp
from jax import lax
from jax.experimental import pallas as pl
from jax.experimental.pallas import tpu as pltpu

NEG_INF = -1e9  # matches masked_fill(mask == 0, -1e9) in the reference


# ----------------------------- in-kernel helpers -----------------------------

def _add_layernorm(x, r, g, b):
    # LayerNorm(x + r) * gamma + beta  (eps = 1e-5, like nn.LayerNorm)
    y = x + r
    mu = jnp.mean(y, axis=-1, keepdims=True)
    var = jnp.mean((y - mu) ** 2, axis=-1, keepdims=True)
    return (y - mu) * lax.rsqrt(var + 1e-5) * g + b


def _heads_attention(q_all, k_all, v_all, keep, num_head, dk):
    # q_all/k_all/v_all: [Sq|Sk, D] with heads laid out contiguously on the
    # lane axis.  keep: bool mask broadcastable to [Sq, Sk].
    scale = 1.0 / math.sqrt(dk)
    outs = []
    for h in range(num_head):            # static unroll (num_head is small)
        q = q_all[:, h * dk:(h + 1) * dk]
        k = k_all[:, h * dk:(h + 1) * dk]
        v = v_all[:, h * dk:(h + 1) * dk]
        # q @ k^T without materializing a transpose: contract the last dims.
        s = lax.dot_general(q, k, (((1,), (1,)), ((), ())),
                            preferred_element_type=jnp.float32) * scale
        s = jnp.where(keep, s, NEG_INF)
        s = s - jnp.max(s, axis=-1, keepdims=True)
        e = jnp.exp(s)
        p = e * pl.reciprocal(jnp.sum(e, axis=-1, keepdims=True), approx=True)
        outs.append(jnp.dot(p, v, preferred_element_type=jnp.float32))
    return jnp.concatenate(outs, axis=-1)    # [Sq, D], lane-dense


# ----------------------------- fused stack kernels -----------------------------

def _encoder_stack_kernel(x_ref, pad_ref,
                          wqkv_ref, bqkv_ref, wo_ref, bo_ref,
                          g1_ref, b1_ref,
                          w1_ref, bf1_ref, w2_ref, bf2_ref,
                          g2_ref, b2_ref,
                          o_ref, carry_ref, *, num_head):
    l = pl.program_id(1)                 # layer index (innermost grid axis)

    @pl.when(l == 0)
    def _():
        carry_ref[...] = x_ref[0]        # load embeddings for this batch elem

    x = carry_ref[...]                   # [S, D] float32, resident across layers
    S, D = x.shape
    dk = D // num_head

    # fused Q/K/V projection: one MXU pass over x
    qkv = jnp.dot(x, wqkv_ref[0],
                  preferred_element_type=jnp.float32) + bqkv_ref[0]
    keep = pad_ref[0] > 0.5              # [1, S] key padding, broadcast over queries

    attn = _heads_attention(qkv[:, :D], qkv[:, D:2 * D], qkv[:, 2 * D:],
                            keep, num_head, dk)
    attn = jnp.dot(attn, wo_ref[0],
                   preferred_element_type=jnp.float32) + bo_ref[0]
    x = _add_layernorm(x, attn, g1_ref[0], b1_ref[0])

    # feed-forward
    h = jnp.maximum(jnp.dot(x, w1_ref[0],
                            preferred_element_type=jnp.float32) + bf1_ref[0], 0.0)
    ffn = jnp.dot(h, w2_ref[0],
                  preferred_element_type=jnp.float32) + bf2_ref[0]
    x = _add_layernorm(x, ffn, g2_ref[0], b2_ref[0])

    carry_ref[...] = x

    @pl.when(l == pl.num_programs(1) - 1)
    def _():
        o_ref[0] = x                     # single lane-dense writeback per batch


def _decoder_stack_kernel(x_ref, enc_ref, srcpad_ref, tarpad_ref,
                          wqkv_s_ref, bqkv_s_ref, wo_s_ref, bo_s_ref,
                          g1_ref, b1_ref,
                          wq_c_ref, bq_c_ref, wkv_c_ref, bkv_c_ref,
                          wo_c_ref, bo_c_ref,
                          g2_ref, b2_ref,
                          w1_ref, bf1_ref, w2_ref, bf2_ref,
                          g3_ref, b3_ref,
                          fcw_ref, fcb_ref,
                          o_ref, carry_ref, *, num_head):
    l = pl.program_id(1)

    @pl.when(l == 0)
    def _():
        carry_ref[...] = x_ref[0]

    x = carry_ref[...]                   # [St, D]
    enc = enc_ref[0]                     # [Ss, D]
    St, D = x.shape
    dk = D // num_head

    # --- masked self-attention (causal + target padding), fused QKV ---
    qkv = jnp.dot(x, wqkv_s_ref[0],
                  preferred_element_type=jnp.float32) + bqkv_s_ref[0]
    row = lax.broadcasted_iota(jnp.int32, (St, St), 0)
    col = lax.broadcasted_iota(jnp.int32, (St, St), 1)
    keep_self = (row >= col) & (tarpad_ref[0] > 0.5)      # [St, St]

    sa = _heads_attention(qkv[:, :D], qkv[:, D:2 * D], qkv[:, 2 * D:],
                          keep_self, num_head, dk)
    sa = jnp.dot(sa, wo_s_ref[0],
                 preferred_element_type=jnp.float32) + bo_s_ref[0]
    x = _add_layernorm(x, sa, g1_ref[0], b1_ref[0])

    # --- cross-attention over encoder output (source padding mask) ---
    qc = jnp.dot(x, wq_c_ref[0],
                 preferred_element_type=jnp.float32) + bq_c_ref[0]
    kvc = jnp.dot(enc, wkv_c_ref[0],
                  preferred_element_type=jnp.float32) + bkv_c_ref[0]
    keep_cross = srcpad_ref[0] > 0.5                      # [1, Ss]

    ca = _heads_attention(qc, kvc[:, :D], kvc[:, D:],
                          keep_cross, num_head, dk)
    ca = jnp.dot(ca, wo_c_ref[0],
                 preferred_element_type=jnp.float32) + bo_c_ref[0]
    x = _add_layernorm(x, ca, g2_ref[0], b2_ref[0])

    # --- feed-forward ---
    h = jnp.maximum(jnp.dot(x, w1_ref[0],
                            preferred_element_type=jnp.float32) + bf1_ref[0], 0.0)
    ffn = jnp.dot(h, w2_ref[0],
                  preferred_element_type=jnp.float32) + bf2_ref[0]
    x = _add_layernorm(x, ffn, g3_ref[0], b3_ref[0])

    carry_ref[...] = x

    # --- final vocab projection, fused into the last layer's grid step ---
    @pl.when(l == pl.num_programs(1) - 1)
    def _():
        o_ref[0] = (jnp.dot(x, fcw_ref[...],
                            preferred_element_type=jnp.float32) + fcb_ref[...])


# ----------------------------- kernel wrappers -----------------------------

def encoder_stack(x, src_pad, ep, num_head):
    B, S, D = x.shape
    L = ep['wqkv'].shape[0]
    F = ep['w1'].shape[2]

    def wspec(shape):
        return pl.BlockSpec(shape, lambda b, l: (l,) + (0,) * (len(shape) - 1))

    return pl.pallas_call(
        partial(_encoder_stack_kernel, num_head=num_head),
        out_shape=jax.ShapeDtypeStruct((B, S, D), jnp.float32),
        grid=(B, L),
        in_specs=[
            pl.BlockSpec((1, S, D), lambda b, l: (b, 0, 0)),   # embeddings
            pl.BlockSpec((1, 1, S), lambda b, l: (b, 0, 0)),   # src padding mask
            wspec((1, D, 3 * D)), wspec((1, 1, 3 * D)),        # fused wqkv / bqkv
            wspec((1, D, D)), wspec((1, 1, D)),                # wo / bo
            wspec((1, 1, D)), wspec((1, 1, D)),                # ln1 gamma / beta
            wspec((1, D, F)), wspec((1, 1, F)),                # ffn w1 / b1
            wspec((1, F, D)), wspec((1, 1, D)),                # ffn w2 / b2
            wspec((1, 1, D)), wspec((1, 1, D)),                # ln2 gamma / beta
        ],
        out_specs=pl.BlockSpec((1, S, D), lambda b, l: (b, 0, 0)),
        scratch_shapes=[pltpu.VMEM((S, D), jnp.float32)],      # layer carry
        compiler_params=pltpu.CompilerParams(
            dimension_semantics=("parallel", "arbitrary")),
    )(x, src_pad,
      ep['wqkv'], ep['bqkv'], ep['wo'], ep['bo'],
      ep['g1'], ep['b1'],
      ep['w1'], ep['bf1'], ep['w2'], ep['bf2'],
      ep['g2'], ep['b2'])


def decoder_stack(x, enc_out, src_pad, tar_pad, dp, num_head):
    B, St, D = x.shape
    Ss = enc_out.shape[1]
    L = dp['wqkv_s'].shape[0]
    F = dp['w1'].shape[2]
    V = dp['fc_w'].shape[1]

    def wspec(shape):
        return pl.BlockSpec(shape, lambda b, l: (l,) + (0,) * (len(shape) - 1))

    return pl.pallas_call(
        partial(_decoder_stack_kernel, num_head=num_head),
        out_shape=jax.ShapeDtypeStruct((B, St, V), jnp.float32),
        grid=(B, L),
        in_specs=[
            pl.BlockSpec((1, St, D), lambda b, l: (b, 0, 0)),  # embeddings
            pl.BlockSpec((1, Ss, D), lambda b, l: (b, 0, 0)),  # encoder output
            pl.BlockSpec((1, 1, Ss), lambda b, l: (b, 0, 0)),  # src padding mask
            pl.BlockSpec((1, 1, St), lambda b, l: (b, 0, 0)),  # tar padding mask
            wspec((1, D, 3 * D)), wspec((1, 1, 3 * D)),        # self wqkv / bqkv
            wspec((1, D, D)), wspec((1, 1, D)),                # self wo / bo
            wspec((1, 1, D)), wspec((1, 1, D)),                # ln1
            wspec((1, D, D)), wspec((1, 1, D)),                # cross wq / bq
            wspec((1, D, 2 * D)), wspec((1, 1, 2 * D)),        # cross fused wkv / bkv
            wspec((1, D, D)), wspec((1, 1, D)),                # cross wo / bo
            wspec((1, 1, D)), wspec((1, 1, D)),                # ln2
            wspec((1, D, F)), wspec((1, 1, F)),                # ffn w1 / b1
            wspec((1, F, D)), wspec((1, 1, D)),                # ffn w2 / b2
            wspec((1, 1, D)), wspec((1, 1, D)),                # ln3
            pl.BlockSpec((D, V), lambda b, l: (0, 0)),         # final fc weight
            pl.BlockSpec((1, V), lambda b, l: (0, 0)),         # final fc bias
        ],
        out_specs=pl.BlockSpec((1, St, V), lambda b, l: (b, 0, 0)),
        scratch_shapes=[pltpu.VMEM((St, D), jnp.float32)],     # layer carry
        compiler_params=pltpu.CompilerParams(
            dimension_semantics=("parallel", "arbitrary")),
    )(x, enc_out, src_pad, tar_pad,
      dp['wqkv_s'], dp['bqkv_s'], dp['wo_s'], dp['bo_s'],
      dp['g1'], dp['b1'],
      dp['wq_c'], dp['bq_c'], dp['wkv_c'], dp['bkv_c'],
      dp['wo_c'], dp['bo_c'],
      dp['g2'], dp['b2'],
      dp['w1'], dp['bf1'], dp['w2'], dp['bf2'],
      dp['g3'], dp['b3'],
      dp['fc_w'], dp['fc_b'])


# ----------------------------- model glue (plain JAX) -----------------------------

def make_positional_encoding(max_len, d_model):
    pos = jnp.arange(max_len, dtype=jnp.float32)[:, None]
    i = jnp.arange(0, d_model, 2, dtype=jnp.float32)
    div = jnp.exp(-jnp.log(10000.0) * i / d_model)
    pe = jnp.zeros((max_len, d_model), jnp.float32)
    pe = pe.at[:, 0::2].set(jnp.sin(pos * div))
    pe = pe.at[:, 1::2].set(jnp.cos(pos * div))
    return pe


def transformer_forward(params, src, tar, cfg):
    # Compact (B,1,S) 0/1 padding vectors; the causal part of the decoder mask
    # is built in-kernel (no full (B*H, Sq, Sk) mask is ever materialized).
    src_pad = (src != 0).astype(jnp.float32)[:, None, :]
    tar_pad = (tar != 0).astype(jnp.float32)[:, None, :]
    Ss, St = src.shape[1], tar.shape[1]

    # TODO(synk): embedding gather + positional-encoding add stay in plain JAX
    # (data-dependent row gather; negligible cost at these sizes).
    enc_x = jnp.take(params['enc']['emb'], src, axis=0) + params['enc']['pe'][:Ss][None]
    enc_out = encoder_stack(enc_x, src_pad, params['enc'], cfg['num_head'])

    dec_x = jnp.take(params['dec']['emb'], tar, axis=0) + params['dec']['pe'][:St][None]
    logits = decoder_stack(dec_x, enc_out, src_pad, tar_pad,
                           params['dec'], cfg['num_head'])
    return logits


# ----------------------------- deterministic parameter init -----------------------------

def init_params(key, cfg):
    d, f, v = cfg['d_model'], cfg['d_ff'], cfg['vocab_size']
    L, ml = cfg['num_layers'], cfg['max_seq_length']
    keys = list(jax.random.split(key, 32))
    ctr = [0]

    def nk():
        k = keys[ctr[0]]
        ctr[0] += 1
        return k

    def w(shape):
        return (0.02 * jax.random.normal(nk(), shape)).astype(jnp.float32)

    def zeros(*shape):
        return jnp.zeros(shape, jnp.float32)

    def ones(*shape):
        return jnp.ones(shape, jnp.float32)

    pe = make_positional_encoding(ml, d)

    enc = {'emb': w((v, d)), 'pe': pe,
           'wqkv': w((L, d, 3 * d)), 'bqkv': zeros(L, 1, 3 * d),
           'wo': w((L, d, d)), 'bo': zeros(L, 1, d),
           'g1': ones(L, 1, d), 'b1': zeros(L, 1, d),
           'w1': w((L, d, f)), 'bf1': zeros(L, 1, f),
           'w2': w((L, f, d)), 'bf2': zeros(L, 1, d),
           'g2': ones(L, 1, d), 'b2': zeros(L, 1, d)}

    dec = {'emb': w((v, d)), 'pe': pe,
           'wqkv_s': w((L, d, 3 * d)), 'bqkv_s': zeros(L, 1, 3 * d),
           'wo_s': w((L, d, d)), 'bo_s': zeros(L, 1, d),
           'g1': ones(L, 1, d), 'b1': zeros(L, 1, d),
           'wq_c': w((L, d, d)), 'bq_c': zeros(L, 1, d),
           'wkv_c': w((L, d, 2 * d)), 'bkv_c': zeros(L, 1, 2 * d),
           'wo_c': w((L, d, d)), 'bo_c': zeros(L, 1, d),
           'g2': ones(L, 1, d), 'b2': zeros(L, 1, d),
           'w1': w((L, d, f)), 'bf1': zeros(L, 1, f),
           'w2': w((L, f, d)), 'bf2': zeros(L, 1, d),
           'g3': ones(L, 1, d), 'b3': zeros(L, 1, d),
           'fc_w': w((d, v)), 'fc_b': zeros(1, v)}

    return {'enc': enc, 'dec': dec}


# ----------------------------- main -----------------------------

if __name__ == "__main__":
    cfg = dict(d_model=32, num_head=4, d_ff=64, dropout=0.1,
               vocab_size=64, max_seq_length=16, num_layers=2)

    key = jax.random.PRNGKey(0)
    pkey, skey, tkey = jax.random.split(key, 3)
    params = init_params(pkey, cfg)

    B, S = 2, 8
    src = jax.random.randint(skey, (B, S), 1, cfg['vocab_size'], dtype=jnp.int32)
    tar = jax.random.randint(tkey, (B, S), 1, cfg['vocab_size'], dtype=jnp.int32)
    src = src.at[:, -2:].set(0)   # padding tokens exercise the src mask
    tar = tar.at[:, -1:].set(0)   # padding token exercises the tar padding mask

    fwd = jax.jit(partial(transformer_forward, cfg=cfg))
    out = fwd(params, src, tar)
    out = jax.block_until_ready(out)

    assert out.shape == (B, S, cfg['vocab_size']), out.shape
    assert bool(jnp.all(jnp.isfinite(out)))
    print("KERNEL_OK")
</pallas_src>

<mosaic_0001>
module attributes {stable_mosaic.version = 11 : i64} {
  func.func @_encoder_stack_kernel(%arg0: i32, %arg1: i32, %arg2: memref<1x8x32xf32, #tpu.memory_space<vmem>>, %arg3: memref<1x1x8xf32, #tpu.memory_space<vmem>>, %arg4: memref<1x32x96xf32, #tpu.memory_space<vmem>>, %arg5: memref<1x1x96xf32, #tpu.memory_space<vmem>>, %arg6: memref<1x32x32xf32, #tpu.memory_space<vmem>>, %arg7: memref<1x1x32xf32, #tpu.memory_space<vmem>>, %arg8: memref<1x1x32xf32, #tpu.memory_space<vmem>>, %arg9: memref<1x1x32xf32, #tpu.memory_space<vmem>>, %arg10: memref<1x32x64xf32, #tpu.memory_space<vmem>>, %arg11: memref<1x1x64xf32, #tpu.memory_space<vmem>>, %arg12: memref<1x64x32xf32, #tpu.memory_space<vmem>>, %arg13: memref<1x1x32xf32, #tpu.memory_space<vmem>>, %arg14: memref<1x1x32xf32, #tpu.memory_space<vmem>>, %arg15: memref<1x1x32xf32, #tpu.memory_space<vmem>>, %arg16: memref<1x8x32xf32, #tpu.memory_space<vmem>>, %arg17: memref<8x32xf32, #tpu.memory_space<vmem>>) attributes {dimension_semantics = [#tpu.dimension_semantics<parallel>, #tpu.dimension_semantics<arbitrary>], iteration_bounds = array<i64: 2, 2>, scalar_prefetch = 0 : i64, scratch_operands = 1 : i64, tpu.core_type = #tpu.core_type<tc>, window_params = [{transform_indices = @transform_0, window_bounds = array<i64: 1, 8, 32>}, {transform_indices = @transform_1, window_bounds = array<i64: 1, 1, 8>}, {transform_indices = @transform_2, window_bounds = array<i64: 1, 32, 96>}, {transform_indices = @transform_3, window_bounds = array<i64: 1, 1, 96>}, {transform_indices = @transform_4, window_bounds = array<i64: 1, 32, 32>}, {transform_indices = @transform_5, window_bounds = array<i64: 1, 1, 32>}, {transform_indices = @transform_6, window_bounds = array<i64: 1, 1, 32>}, {transform_indices = @transform_7, window_bounds = array<i64: 1, 1, 32>}, {transform_indices = @transform_8, window_bounds = array<i64: 1, 32, 64>}, {transform_indices = @transform_9, window_bounds = array<i64: 1, 1, 64>}, {transform_indices = @transform_10, window_bounds = array<i64: 1, 64, 32>}, {transform_indices = @transform_11, window_bounds = array<i64: 1, 1, 32>}, {transform_indices = @transform_12, window_bounds = array<i64: 1, 1, 32>}, {transform_indices = @transform_13, window_bounds = array<i64: 1, 1, 32>}, {transform_indices = @transform_14, window_bounds = array<i64: 1, 8, 32>}]} {
    %c0_i32 = arith.constant 0 : i32
    %0 = arith.cmpi eq, %arg1, %c0_i32 : i32
    %1 = arith.extui %0 : i1 to i32
    %c0_i32_0 = arith.constant 0 : i32
    %2 = arith.cmpi ne, %1, %c0_i32_0 : i32
    scf.if %2 {
      %c0_83 = arith.constant 0 : index
      %c0_84 = arith.constant 0 : index
      %c0_85 = arith.constant 0 : index
      %184 = vector.load %arg2[%c0_83, %c0_84, %c0_85] : memref<1x8x32xf32, #tpu.memory_space<vmem>>, vector<1x8x32xf32>
      %185 = vector.shape_cast %184 : vector<1x8x32xf32> to vector<8x32xf32>
      %c0_86 = arith.constant 0 : index
      %c0_87 = arith.constant 0 : index
      %186 = vector.load %arg17[%c0_86, %c0_87] : memref<8x32xf32, #tpu.memory_space<vmem>>, vector<8x32xf32>
      tpu.vector_store %arg17[%c0_86, %c0_87], %185 {strides = array<i32>} : memref<8x32xf32, #tpu.memory_space<vmem>>, vector<8x32xf32>,
    } else {
    }
    %c0 = arith.constant 0 : index
    %c0_1 = arith.constant 0 : index
    %3 = vector.load %arg17[%c0, %c0_1] : memref<8x32xf32, #tpu.memory_space<vmem>>, vector<8x32xf32>
    %c0_2 = arith.constant 0 : index
    %c0_3 = arith.constant 0 : index
    %c0_4 = arith.constant 0 : index
    %4 = vector.load %arg4[%c0_2, %c0_3, %c0_4] : memref<1x32x96xf32, #tpu.memory_space<vmem>>, vector<1x32x96xf32>
    %5 = vector.shape_cast %4 : vector<1x32x96xf32> to vector<32x96xf32>
    %cst = arith.constant dense<0.000000e+00> : vector<8x96xf32>
    %6 = tpu.matmul %3, %5, %cst {dimension_numbers = #tpu.dot_dimension_numbers<[1], [0], [0], [1], [0, 0, 1, 1], [], []>} : vector<8x32xf32>, vector<32x96xf32>, vector<8x96xf32> -> vector<8x96xf32>
    %c0_5 = arith.constant 0 : index
    %c0_6 = arith.constant 0 : index
    %c0_7 = arith.constant 0 : index
    %7 = vector.load %arg5[%c0_5, %c0_6, %c0_7] : memref<1x1x96xf32, #tpu.memory_space<vmem>>, vector<1x1x96xf32>
    %8 = vector.shape_cast %7 : vector<1x1x96xf32> to vector<1x96xf32>
    %9 = vector.broadcast %8 : vector<1x96xf32> to vector<8x96xf32>
    %10 = arith.addf %6, %9 : vector<8x96xf32>
    %c0_8 = arith.constant 0 : index
    %c0_9 = arith.constant 0 : index
    %c0_10 = arith.constant 0 : index
    %11 = vector.load %arg3[%c0_8, %c0_9, %c0_10] : memref<1x1x8xf32, #tpu.memory_space<vmem>>, vector<1x1x8xf32>
    %12 = vector.shape_cast %11 : vector<1x1x8xf32> to vector<1x8xf32>
    %cst_11 = arith.constant 5.000000e-01 : f32
    %13 = vector.broadcast %cst_11 : f32 to vector<1x8xf32>
    %14 = arith.cmpf ogt, %12, %13 : vector<1x8xf32>
    %15 = vector.extract_strided_slice %10 {offsets = [0, 0], sizes = [8, 32], strides = [1, 1]} : vector<8x96xf32> to vector<8x32xf32>
    %16 = vector.extract_strided_slice %10 {offsets = [0, 32], sizes = [8, 32], strides = [1, 1]} : vector<8x96xf32> to vector<8x32xf32>
    %17 = vector.extract_strided_slice %10 {offsets = [0, 64], sizes = [8, 32], strides = [1, 1]} : vector<8x96xf32> to vector<8x32xf32>
    %18 = vector.extract_strided_slice %15 {offsets = [0, 0], sizes = [8, 8], strides = [1, 1]} : vector<8x32xf32> to vector<8x8xf32>
    %19 = vector.extract_strided_slice %16 {offsets = [0, 0], sizes = [8, 8], strides = [1, 1]} : vector<8x32xf32> to vector<8x8xf32>
    %20 = vector.extract_strided_slice %17 {offsets = [0, 0], sizes = [8, 8], strides = [1, 1]} : vector<8x32xf32> to vector<8x8xf32>
    %cst_12 = arith.constant dense<0.000000e+00> : vector<8x8xf32>
    %21 = tpu.matmul %18, %19, %cst_12 {dimension_numbers = #tpu.dot_dimension_numbers<[1], [1], [0], [0], [0, 0, 1, 0], [], []>} : vector<8x8xf32>, vector<8x8xf32>, vector<8x8xf32> -> vector<8x8xf32>
    %cst_13 = arith.constant 0.353553385 : f32
    %22 = vector.broadcast %cst_13 : f32 to vector<8x8xf32>
    %23 = arith.mulf %21, %22 : vector<8x8xf32>
    %cst_14 = arith.constant -1.000000e+09 : f32
    %24 = vector.shape_cast %14 : vector<1x8xi1> to vector<1x8xi1>
    %25 = vector.broadcast %24 : vector<1x8xi1> to vector<8x8xi1>
    %26 = vector.broadcast %cst_14 : f32 to vector<8x8xf32>
    %27 = arith.select %25, %23, %26 : vector<8x8xi1>, vector<8x8xf32>
    %cst_15 = arith.constant dense<0xFF800000> : vector<8xf32>
    %28 = vector.multi_reduction <maximumf>, %27, %cst_15 [1] : vector<8x8xf32> to vector<8xf32>
    %29 = vector.shape_cast %28 : vector<8xf32> to vector<8x1xf32>
    %30 = vector.broadcast %29 : vector<8x1xf32> to vector<8x8xf32>
    %31 = arith.subf %27, %30 : vector<8x8xf32>
    %32 = math.exp %31 : vector<8x8xf32>
    %cst_16 = arith.constant dense<0.000000e+00> : vector<8xf32>
    %33 = vector.multi_reduction <add>, %32, %cst_16 [1] : vector<8x8xf32> to vector<8xf32>
    %34 = vector.shape_cast %33 : vector<8xf32> to vector<8x1xf32>
    %35 = tpu.reciprocal %34 {approx = true} : vector<8x1xf32> -> vector<8x1xf32>
    %36 = vector.broadcast %35 : vector<8x1xf32> to vector<8x8xf32>
    %37 = arith.mulf %32, %36 : vector<8x8xf32>
    %cst_17 = arith.constant dense<0.000000e+00> : vector<8x8xf32>
    %38 = tpu.matmul %37, %20, %cst_17 {dimension_numbers = #tpu.dot_dimension_numbers<[1], [0], [0], [1], [0, 0, 1, 1], [], []>} : vector<8x8xf32>, vector<8x8xf32>, vector<8x8xf32> -> vector<8x8xf32>
    %39 = vector.extract_strided_slice %15 {offsets = [0, 8], sizes = [8, 8], strides = [1, 1]} : vector<8x32xf32> to vector<8x8xf32>
    %40 = vector.extract_strided_slice %16 {offsets = [0, 8], sizes = [8, 8], strides = [1, 1]} : vector<8x32xf32> to vector<8x8xf32>
    %41 = vector.extract_strided_slice %17 {offsets = [0, 8], sizes = [8, 8], strides = [1, 1]} : vector<8x32xf32> to vector<8x8xf32>
    %cst_18 = arith.constant dense<0.000000e+00> : vector<8x8xf32>
    %42 = tpu.matmul %39, %40, %cst_18 {dimension_numbers = #tpu.dot_dimension_numbers<[1], [1], [0], [0], [0, 0, 1, 0], [], []>} : vector<8x8xf32>, vector<8x8xf32>, vector<8x8xf32> -> vector<8x8xf32>
    %cst_19 = arith.constant 0.353553385 : f32
    %43 = vector.broadcast %cst_19 : f32 to vector<8x8xf32>
    %44 = arith.mulf %42, %43 : vector<8x8xf32>
    %cst_20 = arith.constant -1.000000e+09 : f32
    %45 = vector.shape_cast %14 : vector<1x8xi1> to vector<1x8xi1>
    %46 = vector.broadcast %45 : vector<1x8xi1> to vector<8x8xi1>
    %47 = vector.broadcast %cst_20 : f32 to vector<8x8xf32>
    %48 = arith.select %46, %44, %47 : vector<8x8xi1>, vector<8x8xf32>
    %cst_21 = arith.constant dense<0xFF800000> : vector<8xf32>
    %49 = vector.multi_reduction <maximumf>, %48, %cst_21 [1] : vector<8x8xf32> to vector<8xf32>
    %50 = vector.shape_cast %49 : vector<8xf32> to vector<8x1xf32>
    %51 = vector.broadcast %50 : vector<8x1xf32> to vector<8x8xf32>
    %52 = arith.subf %48, %51 : vector<8x8xf32>
    %53 = math.exp %52 : vector<8x8xf32>
    %cst_22 = arith.constant dense<0.000000e+00> : vector<8xf32>
    %54 = vector.multi_reduction <add>, %53, %cst_22 [1] : vector<8x8xf32> to vector<8xf32>
    %55 = vector.shape_cast %54 : vector<8xf32> to vector<8x1xf32>
    %56 = tpu.reciprocal %55 {approx = true} : vector<8x1xf32> -> vector<8x1xf32>
    %57 = vector.broadcast %56 : vector<8x1xf32> to vector<8x8xf32>
    %58 = arith.mulf %53, %57 : vector<8x8xf32>
    %cst_23 = arith.constant dense<0.000000e+00> : vector<8x8xf32>
    %59 = tpu.matmul %58, %41, %cst_23 {dimension_numbers = #tpu.dot_dimension_numbers<[1], [0], [0], [1], [0, 0, 1, 1], [], []>} : vector<8x8xf32>, vector<8x8xf32>, vector<8x8xf32> -> vector<8x8xf32>
    %60 = vector.extract_strided_slice %15 {offsets = [0, 16], sizes = [8, 8], strides = [1, 1]} : vector<8x32xf32> to vector<8x8xf32>
    %61 = vector.extract_strided_slice %16 {offsets = [0, 16], sizes = [8, 8], strides = [1, 1]} : vector<8x32xf32> to vector<8x8xf32>
    %62 = vector.extract_strided_slice %17 {offsets = [0, 16], sizes = [8, 8], strides = [1, 1]} : vector<8x32xf32> to vector<8x8xf32>
    %cst_24 = arith.constant dense<0.000000e+00> : vector<8x8xf32>
    %63 = tpu.matmul %60, %61, %cst_24 {dimension_numbers = #tpu.dot_dimension_numbers<[1], [1], [0], [0], [0, 0, 1, 0], [], []>} : vector<8x8xf32>, vector<8x8xf32>, vector<8x8xf32> -> vector<8x8xf32>
    %cst_25 = arith.constant 0.353553385 : f32
    %64 = vector.broadcast %cst_25 : f32 to vector<8x8xf32>
    %65 = arith.mulf %63, %64 : vector<8x8xf32>
    %cst_26 = arith.constant -1.000000e+09 : f32
    %66 = vector.shape_cast %14 : vector<1x8xi1> to vector<1x8xi1>
    %67 = vector.broadcast %66 : vector<1x8xi1> to vector<8x8xi1>
    %68 = vector.broadcast %cst_26 : f32 to vector<8x8xf32>
    %69 = arith.select %67, %65, %68 : vector<8x8xi1>, vector<8x8xf32>
    %cst_27 = arith.constant dense<0xFF800000> : vector<8xf32>
    %70 = vector.multi_reduction <maximumf>, %69, %cst_27 [1] : vector<8x8xf32> to vector<8xf32>
    %71 = vector.shape_cast %70 : vector<8xf32> to vector<8x1xf32>
    %72 = vector.broadcast %71 : vector<8x1xf32> to vector<8x8xf32>
    %73 = arith.subf %69, %72 : vector<8x8xf32>
    %74 = math.exp %73 : vector<8x8xf32>
    %cst_28 = arith.constant dense<0.000000e+00> : vector<8xf32>
    %75 = vector.multi_reduction <add>, %74, %cst_28 [1] : vector<8x8xf32> to vector<8xf32>
    %76 = vector.shape_cast %75 : vector<8xf32> to vector<8x1xf32>
    %77 = tpu.reciprocal %76 {approx = true} : vector<8x1xf32> -> vector<8x1xf32>
    %78 = vector.broadcast %77 : vector<8x1xf32> to vector<8x8xf32>
    %79 = arith.mulf %74, %78 : vector<8x8xf32>
    %cst_29 = arith.constant dense<0.000000e+00> : vector<8x8xf32>
    %80 = tpu.matmul %79, %62, %cst_29 {dimension_numbers = #tpu.dot_dimension_numbers<[1], [0], [0], [1], [0, 0, 1, 1], [], []>} : vector<8x8xf32>, vector<8x8xf32>, vector<8x8xf32> -> vector<8x8xf32>
    %81 = vector.extract_strided_slice %15 {offsets = [0, 24], sizes = [8, 8], strides = [1, 1]} : vector<8x32xf32> to vector<8x8xf32>
    %82 = vector.extract_strided_slice %16 {offsets = [0, 24], sizes = [8, 8], strides = [1, 1]} : vector<8x32xf32> to vector<8x8xf32>
    %83 = vector.extract_strided_slice %17 {offsets = [0, 24], sizes = [8, 8], strides = [1, 1]} : vector<8x32xf32> to vector<8x8xf32>
    %cst_30 = arith.constant dense<0.000000e+00> : vector<8x8xf32>
    %84 = tpu.matmul %81, %82, %cst_30 {dimension_numbers = #tpu.dot_dimension_numbers<[1], [1], [0], [0], [0, 0, 1, 0], [], []>} : vector<8x8xf32>, vector<8x8xf32>, vector<8x8xf32> -> vector<8x8xf32>
    %cst_31 = arith.constant 0.353553385 : f32
    %85 = vector.broadcast %cst_31 : f32 to vector<8x8xf32>
    %86 = arith.mulf %84, %85 : vector<8x8xf32>
    %cst_32 = arith.constant -1.000000e+09 : f32
    %87 = vector.shape_cast %14 : vector<1x8xi1> to vector<1x8xi1>
    %88 = vector.broadcast %87 : vector<1x8xi1> to vector<8x8xi1>
    %89 = vector.broadcast %cst_32 : f32 to vector<8x8xf32>
    %90 = arith.select %88, %86, %89 : vector<8x8xi1>, vector<8x8xf32>
    %cst_33 = arith.constant dense<0xFF800000> : vector<8xf32>
    %91 = vector.multi_reduction <maximumf>, %90, %cst_33 [1] : vector<8x8xf32> to vector<8xf32>
    %92 = vector.shape_cast %91 : vector<8xf32> to vector<8x1xf32>
    %93 = vector.broadcast %92 : vector<8x1xf32> to vector<8x8xf32>
    %94 = arith.subf %90, %93 : vector<8x8xf32>
    %95 = math.exp %94 : vector<8x8xf32>
    %cst_34 = arith.constant dense<0.000000e+00> : vector<8xf32>
    %96 = vector.multi_reduction <add>, %95, %cst_34 [1] : vector<8x8xf32> to vector<8xf32>
    %97 = vector.shape_cast %96 : vector<8xf32> to vector<8x1xf32>
    %98 = tpu.reciprocal %97 {approx = true} : vector<8x1xf32> -> vector<8x1xf32>
    %99 = vector.broadcast %98 : vector<8x1xf32> to vector<8x8xf32>
    %100 = arith.mulf %95, %99 : vector<8x8xf32>
    %cst_35 = arith.constant dense<0.000000e+00> : vector<8x8xf32>
    %101 = tpu.matmul %100, %83, %cst_35 {dimension_numbers = #tpu.dot_dimension_numbers<[1], [0], [0], [1], [0, 0, 1, 1], [], []>} : vector<8x8xf32>, vector<8x8xf32>, vector<8x8xf32> -> vector<8x8xf32>
    %102 = tpu.concatenate %38, %59, %80, %101 in 1 : vector<8x8xf32>, vector<8x8xf32>, vector<8x8xf32>, vector<8x8xf32> -> vector<8x32xf32>
    %c0_36 = arith.constant 0 : index
    %c0_37 = arith.constant 0 : index
    %c0_38 = arith.constant 0 : index
    %103 = vector.load %arg6[%c0_36, %c0_37, %c0_38] : memref<1x32x32xf32, #tpu.memory_space<vmem>>, vector<1x32x32xf32>
    %104 = vector.shape_cast %103 : vector<1x32x32xf32> to vector<32x32xf32>
    %cst_39 = arith.constant dense<0.000000e+00> : vector<8x32xf32>
    %105 = tpu.matmul %102, %104, %cst_39 {dimension_numbers = #tpu.dot_dimension_numbers<[1], [0], [0], [1], [0, 0, 1, 1], [], []>} : vector<8x32xf32>, vector<32x32xf32>, vector<8x32xf32> -> vector<8x32xf32>
    %c0_40 = arith.constant 0 : index
    %c0_41 = arith.constant 0 : index
    %c0_42 = arith.constant 0 : index
    %106 = vector.load %arg7[%c0_40, %c0_41, %c0_42] : memref<1x1x32xf32, #tpu.memory_space<vmem>>, vector<1x1x32xf32>
    %107 = vector.shape_cast %106 : vector<1x1x32xf32> to vector<1x32xf32>
    %108 = vector.broadcast %107 : vector<1x32xf32> to vector<8x32xf32>
    %109 = arith.addf %105, %108 : vector<8x32xf32>
    %c0_43 = arith.constant 0 : index
    %c0_44 = arith.constant 0 : index
    %c0_45 = arith.constant 0 : index
    %110 = vector.load %arg8[%c0_43, %c0_44, %c0_45] : memref<1x1x32xf32, #tpu.memory_space<vmem>>, vector<1x1x32xf32>
    %111 = vector.shape_cast %110 : vector<1x1x32xf32> to vector<1x32xf32>
    %c0_46 = arith.constant 0 : index
    %c0_47 = arith.constant 0 : index
    %c0_48 = arith.constant 0 : index
    %112 = vector.load %arg9[%c0_46, %c0_47, %c0_48] : memref<1x1x32xf32, #tpu.memory_space<vmem>>, vector<1x1x32xf32>
    %113 = vector.shape_cast %112 : vector<1x1x32xf32> to vector<1x32xf32>
    %114 = arith.addf %3, %109 : vector<8x32xf32>
    %cst_49 = arith.constant dense<0.000000e+00> : vector<8xf32>
    %115 = vector.multi_reduction <add>, %114, %cst_49 [1] : vector<8x32xf32> to vector<8xf32>
    %116 = vector.shape_cast %115 : vector<8xf32> to vector<8x1xf32>
    %cst_50 = arith.constant 3.200000e+01 : f32
    %117 = vector.broadcast %cst_50 : f32 to vector<8x1xf32>
    %118 = arith.divf %116, %117 : vector<8x1xf32>
    %119 = vector.broadcast %118 : vector<8x1xf32> to vector<8x32xf32>
    %120 = arith.subf %114, %119 : vector<8x32xf32>
    %121 = arith.mulf %120, %120 : vector<8x32xf32>
    %cst_51 = arith.constant dense<0.000000e+00> : vector<8xf32>
    %122 = vector.multi_reduction <add>, %121, %cst_51 [1] : vector<8x32xf32> to vector<8xf32>
    %123 = vector.shape_cast %122 : vector<8xf32> to vector<8x1xf32>
    %cst_52 = arith.constant 3.200000e+01 : f32
    %124 = vector.broadcast %cst_52 : f32 to vector<8x1xf32>
    %125 = arith.divf %123, %124 : vector<8x1xf32>
    %126 = vector.broadcast %118 : vector<8x1xf32> to vector<8x32xf32>
    %127 = arith.subf %114, %126 : vector<8x32xf32>
    %cst_53 = arith.constant 9.99999974E-6 : f32
    %128 = vector.broadcast %cst_53 : f32 to vector<8x1xf32>
    %129 = arith.addf %125, %128 : vector<8x1xf32>
    %130 = math.rsqrt %129 : vector<8x1xf32>
    %131 = vector.broadcast %130 : vector<8x1xf32> to vector<8x32xf32>
    %132 = arith.mulf %127, %131 : vector<8x32xf32>
    %133 = vector.broadcast %111 : vector<1x32xf32> to vector<8x32xf32>
    %134 = arith.mulf %132, %133 : vector<8x32xf32>
    %135 = vector.broadcast %113 : vector<1x32xf32> to vector<8x32xf32>
    %136 = arith.addf %134, %135 : vector<8x32xf32>
    %c0_54 = arith.constant 0 : index
    %c0_55 = arith.constant 0 : index
    %c0_56 = arith.constant 0 : index
    %137 = vector.load %arg10[%c0_54, %c0_55, %c0_56] : memref<1x32x64xf32, #tpu.memory_space<vmem>>, vector<1x32x64xf32>
    %138 = vector.shape_cast %137 : vector<1x32x64xf32> to vector<32x64xf32>
    %cst_57 = arith.constant dense<0.000000e+00> : vector<8x64xf32>
    %139 = tpu.matmul %136, %138, %cst_57 {dimension_numbers = #tpu.dot_dimension_numbers<[1], [0], [0], [1], [0, 0, 1, 1], [], []>} : vector<8x32xf32>, vector<32x64xf32>, vector<8x64xf32> -> vector<8x64xf32>
    %c0_58 = arith.constant 0 : index
    %c0_59 = arith.constant 0 : index
    %c0_60 = arith.constant 0 : index
    %140 = vector.load %arg11[%c0_58, %c0_59, %c0_60] : memref<1x1x64xf32, #tpu.memory_space<vmem>>, vector<1x1x64xf32>
    %141 = vector.shape_cast %140 : vector<1x1x64xf32> to vector<1x64xf32>
    %142 = vector.broadcast %141 : vector<1x64xf32> to vector<8x64xf32>
    %143 = arith.addf %139, %142 : vector<8x64xf32>
    %cst_61 = arith.constant 0.000000e+00 : f32
    %144 = vector.broadcast %cst_61 : f32 to vector<8x64xf32>
    %145 = arith.maximumf %143, %144 : vector<8x64xf32>
    %c0_62 = arith.constant 0 : index
    %c0_63 = arith.constant 0 : index
    %c0_64 = arith.constant 0 : index
    %146 = vector.load %arg12[%c0_62, %c0_63, %c0_64] : memref<1x64x32xf32, #tpu.memory_space<vmem>>, vector<1x64x32xf32>
    %147 = vector.shape_cast %146 : vector<1x64x32xf32> to vector<64x32xf32>
    %cst_65 = arith.constant dense<0.000000e+00> : vector<8x32xf32>
    %148 = tpu.matmul %145, %147, %cst_65 {dimension_numbers = #tpu.dot_dimension_numbers<[1], [0], [0], [1], [0, 0, 1, 1], [], []>} : vector<8x64xf32>, vector<64x32xf32>, vector<8x32xf32> -> vector<8x32xf32>
    %c0_66 = arith.constant 0 : index
    %c0_67 = arith.constant 0 : index
    %c0_68 = arith.constant 0 : index
    %149 = vector.load %arg13[%c0_66, %c0_67, %c0_68] : memref<1x1x32xf32, #tpu.memory_space<vmem>>, vector<1x1x32xf32>
    %150 = vector.shape_cast %149 : vector<1x1x32xf32> to vector<1x32xf32>
    %151 = vector.broadcast %150 : vector<1x32xf32> to vector<8x32xf32>
    %152 = arith.addf %148, %151 : vector<8x32xf32>
    %c0_69 = arith.constant 0 : index
    %c0_70 = arith.constant 0 : index
    %c0_71 = arith.constant 0 : index
    %153 = vector.load %arg14[%c0_69, %c0_70, %c0_71] : memref<1x1x32xf32, #tpu.memory_space<vmem>>, vector<1x1x32xf32>
    %154 = vector.shape_cast %153 : vector<1x1x32xf32> to vector<1x32xf32>
    %c0_72 = arith.constant 0 : index
    %c0_73 = arith.constant 0 : index
    %c0_74 = arith.constant 0 : index
    %155 = vector.load %arg15[%c0_72, %c0_73, %c0_74] : memref<1x1x32xf32, #tpu.memory_space<vmem>>, vector<1x1x32xf32>
    %156 = vector.shape_cast %155 : vector<1x1x32xf32> to vector<1x32xf32>
    %157 = arith.addf %136, %152 : vector<8x32xf32>
    %cst_75 = arith.constant dense<0.000000e+00> : vector<8xf32>
    %158 = vector.multi_reduction <add>, %157, %cst_75 [1] : vector<8x32xf32> to vector<8xf32>
    %159 = vector.shape_cast %158 : vector<8xf32> to vector<8x1xf32>
    %cst_76 = arith.constant 3.200000e+01 : f32
    %160 = vector.broadcast %cst_76 : f32 to vector<8x1xf32>
    %161 = arith.divf %159, %160 : vector<8x1xf32>
    %162 = vector.broadcast %161 : vector<8x1xf32> to vector<8x32xf32>
    %163 = arith.subf %157, %162 : vector<8x32xf32>
    %164 = arith.mulf %163, %163 : vector<8x32xf32>
    %cst_77 = arith.constant dense<0.000000e+00> : vector<8xf32>
    %165 = vector.multi_reduction <add>, %164, %cst_77 [1] : vector<8x32xf32> to vector<8xf32>
    %166 = vector.shape_cast %165 : vector<8xf32> to vector<8x1xf32>
    %cst_78 = arith.constant 3.200000e+01 : f32
    %167 = vector.broadcast %cst_78 : f32 to vector<8x1xf32>
    %168 = arith.divf %166, %167 : vector<8x1xf32>
    %169 = vector.broadcast %161 : vector<8x1xf32> to vector<8x32xf32>
    %170 = arith.subf %157, %169 : vector<8x32xf32>
    %cst_79 = arith.constant 9.99999974E-6 : f32
    %171 = vector.broadcast %cst_79 : f32 to vector<8x1xf32>
    %172 = arith.addf %168, %171 : vector<8x1xf32>
    %173 = math.rsqrt %172 : vector<8x1xf32>
    %174 = vector.broadcast %173 : vector<8x1xf32> to vector<8x32xf32>
    %175 = arith.mulf %170, %174 : vector<8x32xf32>
    %176 = vector.broadcast %154 : vector<1x32xf32> to vector<8x32xf32>
    %177 = arith.mulf %175, %176 : vector<8x32xf32>
    %178 = vector.broadcast %156 : vector<1x32xf32> to vector<8x32xf32>
    %179 = arith.addf %177, %178 : vector<8x32xf32>
    %c0_80 = arith.constant 0 : index
    %c0_81 = arith.constant 0 : index
    %180 = vector.load %arg17[%c0_80, %c0_81] : memref<8x32xf32, #tpu.memory_space<vmem>>, vector<8x32xf32>
    tpu.vector_store %arg17[%c0_80, %c0_81], %179 {strides = array<i32>} : memref<8x32xf32, #tpu.memory_space<vmem>>, vector<8x32xf32>,
    %c1_i32 = arith.constant 1 : i32
    %181 = arith.cmpi eq, %arg1, %c1_i32 : i32
    %182 = arith.extui %181 : i1 to i32
    %c0_i32_82 = arith.constant 0 : i32
    %183 = arith.cmpi ne, %182, %c0_i32_82 : i32
    scf.if %183 {
      %c0_83 = arith.constant 0 : index
      %c0_84 = arith.constant 0 : index
      %c0_85 = arith.constant 0 : index
      %184 = vector.load %arg16[%c0_83, %c0_84, %c0_85] : memref<1x8x32xf32, #tpu.memory_space<vmem>>, vector<1x8x32xf32>
      %185 = vector.shape_cast %184 : vector<1x8x32xf32> to vector<8x32xf32>
      %186 = vector.shape_cast %179 : vector<8x32xf32> to vector<1x8x32xf32>
      tpu.vector_store %arg16[%c0_83, %c0_84, %c0_85], %186 {strides = array<i32>} : memref<1x8x32xf32, #tpu.memory_space<vmem>>, vector<1x8x32xf32>,
    } else {
    }
    return
  }
  func.func @transform_0(%arg0: i32, %arg1: i32) -> (i32, i32, i32) {
    %c0_i32 = arith.constant 0 : i32
    %c0_i32_0 = arith.constant 0 : i32
    %c0_i32_1 = arith.constant 0 : i32
    return %arg0, %c0_i32, %c0_i32_0 : i32, i32, i32
  }
  func.func @transform_1(%arg0: i32, %arg1: i32) -> (i32, i32, i32) {
    %c0_i32 = arith.constant 0 : i32
    %c0_i32_0 = arith.constant 0 : i32
    %c0_i32_1 = arith.constant 0 : i32
    return %arg0, %c0_i32, %c0_i32_0 : i32, i32, i32
  }
  func.func @transform_2(%arg0: i32, %arg1: i32) -> (i32, i32, i32) {
    %c0_i32 = arith.constant 0 : i32
    %c0_i32_0 = arith.constant 0 : i32
    %c0_i32_1 = arith.constant 0 : i32
    return %arg1, %c0_i32, %c0_i32_0 : i32, i32, i32
  }
  func.func @transform_3(%arg0: i32, %arg1: i32) -> (i32, i32, i32) {
    %c0_i32 = arith.constant 0 : i32
    %c0_i32_0 = arith.constant 0 : i32
    %c0_i32_1 = arith.constant 0 : i32
    return %arg1, %c0_i32, %c0_i32_0 : i32, i32, i32
  }
  func.func @transform_4(%arg0: i32, %arg1: i32) -> (i32, i32, i32) {
    %c0_i32 = arith.constant 0 : i32
    %c0_i32_0 = arith.constant 0 : i32
    %c0_i32_1 = arith.constant 0 : i32
    return %arg1, %c0_i32, %c0_i32_0 : i32, i32, i32
  }
  func.func @transform_5(%arg0: i32, %arg1: i32) -> (i32, i32, i32) {
    %c0_i32 = arith.constant 0 : i32
    %c0_i32_0 = arith.constant 0 : i32
    %c0_i32_1 = arith.constant 0 : i32
    return %arg1, %c0_i32, %c0_i32_0 : i32, i32, i32
  }
  func.func @transform_6(%arg0: i32, %arg1: i32) -> (i32, i32, i32) {
    %c0_i32 = arith.constant 0 : i32
    %c0_i32_0 = arith.constant 0 : i32
    %c0_i32_1 = arith.constant 0 : i32
    return %arg1, %c0_i32, %c0_i32_0 : i32, i32, i32
  }
  func.func @transform_7(%arg0: i32, %arg1: i32) -> (i32, i32, i32) {
    %c0_i32 = arith.constant 0 : i32
    %c0_i32_0 = arith.constant 0 : i32
    %c0_i32_1 = arith.constant 0 : i32
    return %arg1, %c0_i32, %c0_i32_0 : i32, i32, i32
  }
  func.func @transform_8(%arg0: i32, %arg1: i32) -> (i32, i32, i32) {
    %c0_i32 = arith.constant 0 : i32
    %c0_i32_0 = arith.constant 0 : i32
    %c0_i32_1 = arith.constant 0 : i32
    return %arg1, %c0_i32, %c0_i32_0 : i32, i32, i32
  }
  func.func @transform_9(%arg0: i32, %arg1: i32) -> (i32, i32, i32) {
    %c0_i32 = arith.constant 0 : i32
    %c0_i32_0 = arith.constant 0 : i32
    %c0_i32_1 = arith.constant 0 : i32
    return %arg1, %c0_i32, %c0_i32_0 : i32, i32, i32
  }
  func.func @transform_10(%arg0: i32, %arg1: i32) -> (i32, i32, i32) {
    %c0_i32 = arith.constant 0 : i32
    %c0_i32_0 = arith.constant 0 : i32
    %c0_i32_1 = arith.constant 0 : i32
    return %arg1, %c0_i32, %c0_i32_0 : i32, i32, i32
  }
  func.func @transform_11(%arg0: i32, %arg1: i32) -> (i32, i32, i32) {
    %c0_i32 = arith.constant 0 : i32
    %c0_i32_0 = arith.constant 0 : i32
    %c0_i32_1 = arith.constant 0 : i32
    return %arg1, %c0_i32, %c0_i32_0 : i32, i32, i32
  }
  func.func @transform_12(%arg0: i32, %arg1: i32) -> (i32, i32, i32) {
    %c0_i32 = arith.constant 0 : i32
    %c0_i32_0 = arith.constant 0 : i32
    %c0_i32_1 = arith.constant 0 : i32
    return %arg1, %c0_i32, %c0_i32_0 : i32, i32, i32
  }
  func.func @transform_13(%arg0: i32, %arg1: i32) -> (i32, i32, i32) {
    %c0_i32 = arith.constant 0 : i32
    %c0_i32_0 = arith.constant 0 : i32
    %c0_i32_1 = arith.constant 0 : i32
    return %arg1, %c0_i32, %c0_i32_0 : i32, i32, i32
  }
  func.func @transform_14(%arg0: i32, %arg1: i32) -> (i32, i32, i32) {
    %c0_i32 = arith.constant 0 : i32
    %c0_i32_0 = arith.constant 0 : i32
    %c0_i32_1 = arith.constant 0 : i32
    return %arg0, %c0_i32, %c0_i32_0 : i32, i32, i32
  }
}

module attributes {stable_mosaic.version = 11 : i64} {
  func.func @_decoder_stack_kernel(%arg0: i32, %arg1: i32, %arg2: memref<1x8x32xf32, #tpu.memory_space<vmem>>, %arg3: memref<1x8x32xf32, #tpu.memory_space<vmem>>, %arg4: memref<1x1x8xf32, #tpu.memory_space<vmem>>, %arg5: memref<1x1x8xf32, #tpu.memory_space<vmem>>, %arg6: memref<1x32x96xf32, #tpu.memory_space<vmem>>, %arg7: memref<1x1x96xf32, #tpu.memory_space<vmem>>, %arg8: memref<1x32x32xf32, #tpu.memory_space<vmem>>, %arg9: memref<1x1x32xf32, #tpu.memory_space<vmem>>, %arg10: memref<1x1x32xf32, #tpu.memory_space<vmem>>, %arg11: memref<1x1x32xf32, #tpu.memory_space<vmem>>, %arg12: memref<1x32x32xf32, #tpu.memory_space<vmem>>, %arg13: memref<1x1x32xf32, #tpu.memory_space<vmem>>, %arg14: memref<1x32x64xf32, #tpu.memory_space<vmem>>, %arg15: memref<1x1x64xf32, #tpu.memory_space<vmem>>, %arg16: memref<1x32x32xf32, #tpu.memory_space<vmem>>, %arg17: memref<1x1x32xf32, #tpu.memory_space<vmem>>, %arg18: memref<1x1x32xf32, #tpu.memory_space<vmem>>, %arg19: memref<1x1x32xf32, #tpu.memory_space<vmem>>, %arg20: memref<1x32x64xf32, #tpu.memory_space<vmem>>, %arg21: memref<1x1x64xf32, #tpu.memory_space<vmem>>, %arg22: memref<1x64x32xf32, #tpu.memory_space<vmem>>, %arg23: memref<1x1x32xf32, #tpu.memory_space<vmem>>, %arg24: memref<1x1x32xf32, #tpu.memory_space<vmem>>, %arg25: memref<1x1x32xf32, #tpu.memory_space<vmem>>, %arg26: memref<32x64xf32, #tpu.memory_space<vmem>>, %arg27: memref<1x64xf32, #tpu.memory_space<vmem>>, %arg28: memref<1x8x64xf32, #tpu.memory_space<vmem>>, %arg29: memref<8x32xf32, #tpu.memory_space<vmem>>) attributes {dimension_semantics = [#tpu.dimension_semantics<parallel>, #tpu.dimension_semantics<arbitrary>], iteration_bounds = array<i64: 2, 2>, scalar_prefetch = 0 : i64, scratch_operands = 1 : i64, tpu.core_type = #tpu.core_type<tc>, window_params = [{transform_indices = @transform_0, window_bounds = array<i64: 1, 8, 32>}, {transform_indices = @transform_1, window_bounds = array<i64: 1, 8, 32>}, {transform_indices = @transform_2, window_bounds = array<i64: 1, 1, 8>}, {transform_indices = @transform_3, window_bounds = array<i64: 1, 1, 8>}, {transform_indices = @transform_4, window_bounds = array<i64: 1, 32, 96>}, {transform_indices = @transform_5, window_bounds = array<i64: 1, 1, 96>}, {transform_indices = @transform_6, window_bounds = array<i64: 1, 32, 32>}, {transform_indices = @transform_7, window_bounds = array<i64: 1, 1, 32>}, {transform_indices = @transform_8, window_bounds = array<i64: 1, 1, 32>}, {transform_indices = @transform_9, window_bounds = array<i64: 1, 1, 32>}, {transform_indices = @transform_10, window_bounds = array<i64: 1, 32, 32>}, {transform_indices = @transform_11, window_bounds = array<i64: 1, 1, 32>}, {transform_indices = @transform_12, window_bounds = array<i64: 1, 32, 64>}, {transform_indices = @transform_13, window_bounds = array<i64: 1, 1, 64>}, {transform_indices = @transform_14, window_bounds = array<i64: 1, 32, 32>}, {transform_indices = @transform_15, window_bounds = array<i64: 1, 1, 32>}, {transform_indices = @transform_16, window_bounds = array<i64: 1, 1, 32>}, {transform_indices = @transform_17, window_bounds = array<i64: 1, 1, 32>}, {transform_indices = @transform_18, window_bounds = array<i64: 1, 32, 64>}, {transform_indices = @transform_19, window_bounds = array<i64: 1, 1, 64>}, {transform_indices = @transform_20, window_bounds = array<i64: 1, 64, 32>}, {transform_indices = @transform_21, window_bounds = array<i64: 1, 1, 32>}, {transform_indices = @transform_22, window_bounds = array<i64: 1, 1, 32>}, {transform_indices = @transform_23, window_bounds = array<i64: 1, 1, 32>}, {pipeline_mode = #tpu.pipeline_mode<synchronous>, transform_indices = @transform_24, window_bounds = array<i64: 32, 64>}, {pipeline_mode = #tpu.pipeline_mode<synchronous>, transform_indices = @transform_25, window_bounds = array<i64: 1, 64>}, {transform_indices = @transform_26, window_bounds = array<i64: 1, 8, 64>}]} {
    %c0_i32 = arith.constant 0 : i32
    %0 = arith.cmpi eq, %arg1, %c0_i32 : i32
    %1 = arith.extui %0 : i1 to i32
    %c0_i32_0 = arith.constant 0 : i32
    %2 = arith.cmpi ne, %1, %c0_i32_0 : i32
    scf.if %2 {
      %c0_146 = arith.constant 0 : index
      %c0_147 = arith.constant 0 : index
      %c0_148 = arith.constant 0 : index
      %322 = vector.load %arg2[%c0_146, %c0_147, %c0_148] : memref<1x8x32xf32, #tpu.memory_space<vmem>>, vector<1x8x32xf32>
      %323 = vector.shape_cast %322 : vector<1x8x32xf32> to vector<8x32xf32>
      %c0_149 = arith.constant 0 : index
      %c0_150 = arith.constant 0 : index
      %324 = vector.load %arg29[%c0_149, %c0_150] : memref<8x32xf32, #tpu.memory_space<vmem>>, vector<8x32xf32>
      tpu.vector_store %arg29[%c0_149, %c0_150], %323 {strides = array<i32>} : memref<8x32xf32, #tpu.memory_space<vmem>>, vector<8x32xf32>,
    } else {
    }
    %c0 = arith.constant 0 : index
    %c0_1 = arith.constant 0 : index
    %3 = vector.load %arg29[%c0, %c0_1] : memref<8x32xf32, #tpu.memory_space<vmem>>, vector<8x32xf32>
    %c0_2 = arith.constant 0 : index
    %c0_3 = arith.constant 0 : index
    %c0_4 = arith.constant 0 : index
    %4 = vector.load %arg3[%c0_2, %c0_3, %c0_4] : memref<1x8x32xf32, #tpu.memory_space<vmem>>, vector<1x8x32xf32>
    %5 = vector.shape_cast %4 : vector<1x8x32xf32> to vector<8x32xf32>
    %c0_5 = arith.constant 0 : index
    %c0_6 = arith.constant 0 : index
    %c0_7 = arith.constant 0 : index
    %6 = vector.load %arg6[%c0_5, %c0_6, %c0_7] : memref<1x32x96xf32, #tpu.memory_space<vmem>>, vector<1x32x96xf32>
    %7 = vector.shape_cast %6 : vector<1x32x96xf32> to vector<32x96xf32>
    %cst = arith.constant dense<0.000000e+00> : vector<8x96xf32>
    %8 = tpu.matmul %3, %7, %cst {dimension_numbers = #tpu.dot_dimension_numbers<[1], [0], [0], [1], [0, 0, 1, 1], [], []>} : vector<8x32xf32>, vector<32x96xf32>, vector<8x96xf32> -> vector<8x96xf32>
    %c0_8 = arith.constant 0 : index
    %c0_9 = arith.constant 0 : index
    %c0_10 = arith.constant 0 : index
    %9 = vector.load %arg7[%c0_8, %c0_9, %c0_10] : memref<1x1x96xf32, #tpu.memory_space<vmem>>, vector<1x1x96xf32>
    %10 = vector.shape_cast %9 : vector<1x1x96xf32> to vector<1x96xf32>
    %11 = vector.broadcast %10 : vector<1x96xf32> to vector<8x96xf32>
    %12 = arith.addf %8, %11 : vector<8x96xf32>
    %13 = tpu.iota {dimensions = array<i32: 0>} : vector<8x8xi32>
    %14 = tpu.iota {dimensions = array<i32: 1>} : vector<8x8xi32>
    %15 = arith.cmpi sge, %13, %14 : vector<8x8xi32>
    %c0_11 = arith.constant 0 : index
    %c0_12 = arith.constant 0 : index
    %c0_13 = arith.constant 0 : index
    %16 = vector.load %arg5[%c0_11, %c0_12, %c0_13] : memref<1x1x8xf32, #tpu.memory_space<vmem>>, vector<1x1x8xf32>
    %17 = vector.shape_cast %16 : vector<1x1x8xf32> to vector<1x8xf32>
    %cst_14 = arith.constant 5.000000e-01 : f32
    %18 = vector.broadcast %cst_14 : f32 to vector<1x8xf32>
    %19 = arith.cmpf ogt, %17, %18 : vector<1x8xf32>
    %20 = vector.broadcast %19 : vector<1x8xi1> to vector<8x8xi1>
    %21 = arith.andi %15, %20 : vector<8x8xi1>
    %22 = vector.extract_strided_slice %12 {offsets = [0, 0], sizes = [8, 32], strides = [1, 1]} : vector<8x96xf32> to vector<8x32xf32>
    %23 = vector.extract_strided_slice %12 {offsets = [0, 32], sizes = [8, 32], strides = [1, 1]} : vector<8x96xf32> to vector<8x32xf32>
    %24 = vector.extract_strided_slice %12 {offsets = [0, 64], sizes = [8, 32], strides = [1, 1]} : vector<8x96xf32> to vector<8x32xf32>
    %25 = vector.extract_strided_slice %22 {offsets = [0, 0], sizes = [8, 8], strides = [1, 1]} : vector<8x32xf32> to vector<8x8xf32>
    %26 = vector.extract_strided_slice %23 {offsets = [0, 0], sizes = [8, 8], strides = [1, 1]} : vector<8x32xf32> to vector<8x8xf32>
    %27 = vector.extract_strided_slice %24 {offsets = [0, 0], sizes = [8, 8], strides = [1, 1]} : vector<8x32xf32> to vector<8x8xf32>
    %cst_15 = arith.constant dense<0.000000e+00> : vector<8x8xf32>
    %28 = tpu.matmul %25, %26, %cst_15 {dimension_numbers = #tpu.dot_dimension_numbers<[1], [1], [0], [0], [0, 0, 1, 0], [], []>} : vector<8x8xf32>, vector<8x8xf32>, vector<8x8xf32> -> vector<8x8xf32>
    %cst_16 = arith.constant 0.353553385 : f32
    %29 = vector.broadcast %cst_16 : f32 to vector<8x8xf32>
    %30 = arith.mulf %28, %29 : vector<8x8xf32>
    %cst_17 = arith.constant -1.000000e+09 : f32
    %31 = vector.broadcast %cst_17 : f32 to vector<8x8xf32>
    %32 = arith.select %21, %30, %31 : vector<8x8xi1>, vector<8x8xf32>
    %cst_18 = arith.constant dense<0xFF800000> : vector<8xf32>
    %33 = vector.multi_reduction <maximumf>, %32, %cst_18 [1] : vector<8x8xf32> to vector<8xf32>
    %34 = vector.shape_cast %33 : vector<8xf32> to vector<8x1xf32>
    %35 = vector.broadcast %34 : vector<8x1xf32> to vector<8x8xf32>
    %36 = arith.subf %32, %35 : vector<8x8xf32>
    %37 = math.exp %36 : vector<8x8xf32>
    %cst_19 = arith.constant dense<0.000000e+00> : vector<8xf32>
    %38 = vector.multi_reduction <add>, %37, %cst_19 [1] : vector<8x8xf32> to vector<8xf32>
    %39 = vector.shape_cast %38 : vector<8xf32> to vector<8x1xf32>
    %40 = tpu.reciprocal %39 {approx = true} : vector<8x1xf32> -> vector<8x1xf32>
    %41 = vector.broadcast %40 : vector<8x1xf32> to vector<8x8xf32>
    %42 = arith.mulf %37, %41 : vector<8x8xf32>
    %cst_20 = arith.constant dense<0.000000e+00> : vector<8x8xf32>
    %43 = tpu.matmul %42, %27, %cst_20 {dimension_numbers = #tpu.dot_dimension_numbers<[1], [0], [0], [1], [0, 0, 1, 1], [], []>} : vector<8x8xf32>, vector<8x8xf32>, vector<8x8xf32> -> vector<8x8xf32>
    %44 = vector.extract_strided_slice %22 {offsets = [0, 8], sizes = [8, 8], strides = [1, 1]} : vector<8x32xf32> to vector<8x8xf32>
    %45 = vector.extract_strided_slice %23 {offsets = [0, 8], sizes = [8, 8], strides = [1, 1]} : vector<8x32xf32> to vector<8x8xf32>
    %46 = vector.extract_strided_slice %24 {offsets = [0, 8], sizes = [8, 8], strides = [1, 1]} : vector<8x32xf32> to vector<8x8xf32>
    %cst_21 = arith.constant dense<0.000000e+00> : vector<8x8xf32>
    %47 = tpu.matmul %44, %45, %cst_21 {dimension_numbers = #tpu.dot_dimension_numbers<[1], [1], [0], [0], [0, 0, 1, 0], [], []>} : vector<8x8xf32>, vector<8x8xf32>, vector<8x8xf32> -> vector<8x8xf32>
    %cst_22 = arith.constant 0.353553385 : f32
    %48 = vector.broadcast %cst_22 : f32 to vector<8x8xf32>
    %49 = arith.mulf %47, %48 : vector<8x8xf32>
    %cst_23 = arith.constant -1.000000e+09 : f32
    %50 = vector.broadcast %cst_23 : f32 to vector<8x8xf32>
    %51 = arith.select %21, %49, %50 : vector<8x8xi1>, vector<8x8xf32>
    %cst_24 = arith.constant dense<0xFF800000> : vector<8xf32>
    %52 = vector.multi_reduction <maximumf>, %51, %cst_24 [1] : vector<8x8xf32> to vector<8xf32>
    %53 = vector.shape_cast %52 : vector<8xf32> to vector<8x1xf32>
    %54 = vector.broadcast %53 : vector<8x1xf32> to vector<8x8xf32>
    %55 = arith.subf %51, %54 : vector<8x8xf32>
    %56 = math.exp %55 : vector<8x8xf32>
    %cst_25 = arith.constant dense<0.000000e+00> : vector<8xf32>
    %57 = vector.multi_reduction <add>, %56, %cst_25 [1] : vector<8x8xf32> to vector<8xf32>
    %58 = vector.shape_cast %57 : vector<8xf32> to vector<8x1xf32>
    %59 = tpu.reciprocal %58 {approx = true} : vector<8x1xf32> -> vector<8x1xf32>
    %60 = vector.broadcast %59 : vector<8x1xf32> to vector<8x8xf32>
    %61 = arith.mulf %56, %60 : vector<8x8xf32>
    %cst_26 = arith.constant dense<0.000000e+00> : vector<8x8xf32>
    %62 = tpu.matmul %61, %46, %cst_26 {dimension_numbers = #tpu.dot_dimension_numbers<[1], [0], [0], [1], [0, 0, 1, 1], [], []>} : vector<8x8xf32>, vector<8x8xf32>, vector<8x8xf32> -> vector<8x8xf32>
    %63 = vector.extract_strided_slice %22 {offsets = [0, 16], sizes = [8, 8], strides = [1, 1]} : vector<8x32xf32> to vector<8x8xf32>
    %64 = vector.extract_strided_slice %23 {offsets = [0, 16], sizes = [8, 8], strides = [1, 1]} : vector<8x32xf32> to vector<8x8xf32>
    %65 = vector.extract_strided_slice %24 {offsets = [0, 16], sizes = [8, 8], strides = [1, 1]} : vector<8x32xf32> to vector<8x8xf32>
    %cst_27 = arith.constant dense<0.000000e+00> : vector<8x8xf32>
    %66 = tpu.matmul %63, %64, %cst_27 {dimension_numbers = #tpu.dot_dimension_numbers<[1], [1], [0], [0], [0, 0, 1, 0], [], []>} : vector<8x8xf32>, vector<8x8xf32>, vector<8x8xf32> -> vector<8x8xf32>
    %cst_28 = arith.constant 0.353553385 : f32
    %67 = vector.broadcast %cst_28 : f32 to vector<8x8xf32>
    %68 = arith.mulf %66, %67 : vector<8x8xf32>
    %cst_29 = arith.constant -1.000000e+09 : f32
    %69 = vector.broadcast %cst_29 : f32 to vector<8x8xf32>
    %70 = arith.select %21, %68, %69 : vector<8x8xi1>, vector<8x8xf32>
    %cst_30 = arith.constant dense<0xFF800000> : vector<8xf32>
    %71 = vector.multi_reduction <maximumf>, %70, %cst_30 [1] : vector<8x8xf32> to vector<8xf32>
    %72 = vector.shape_cast %71 : vector<8xf32> to vector<8x1xf32>
    %73 = vector.broadcast %72 : vector<8x1xf32> to vector<8x8xf32>
    %74 = arith.subf %70, %73 : vector<8x8xf32>
    %75 = math.exp %74 : vector<8x8xf32>
    %cst_31 = arith.constant dense<0.000000e+00> : vector<8xf32>
    %76 = vector.multi_reduction <add>, %75, %cst_31 [1] : vector<8x8xf32> to vector<8xf32>
    %77 = vector.shape_cast %76 : vector<8xf32> to vector<8x1xf32>
    %78 = tpu.reciprocal %77 {approx = true} : vector<8x1xf32> -> vector<8x1xf32>
    %79 = vector.broadcast %78 : vector<8x1xf32> to vector<8x8xf32>
    %80 = arith.mulf %75, %79 : vector<8x8xf32>
    %cst_32 = arith.constant dense<0.000000e+00> : vector<8x8xf32>
    %81 = tpu.matmul %80, %65, %cst_32 {dimension_numbers = #tpu.dot_dimension_numbers<[1], [0], [0], [1], [0, 0, 1, 1], [], []>} : vector<8x8xf32>, vector<8x8xf32>, vector<8x8xf32> -> vector<8x8xf32>
    %82 = vector.extract_strided_slice %22 {offsets = [0, 24], sizes = [8, 8], strides = [1, 1]} : vector<8x32xf32> to vector<8x8xf32>
    %83 = vector.extract_strided_slice %23 {offsets = [0, 24], sizes = [8, 8], strides = [1, 1]} : vector<8x32xf32> to vector<8x8xf32>
    %84 = vector.extract_strided_slice %24 {offsets = [0, 24], sizes = [8, 8], strides = [1, 1]} : vector<8x32xf32> to vector<8x8xf32>
    %cst_33 = arith.constant dense<0.000000e+00> : vector<8x8xf32>
    %85 = tpu.matmul %82, %83, %cst_33 {dimension_numbers = #tpu.dot_dimension_numbers<[1], [1], [0], [0], [0, 0, 1, 0], [], []>} : vector<8x8xf32>, vector<8x8xf32>, vector<8x8xf32> -> vector<8x8xf32>
    %cst_34 = arith.constant 0.353553385 : f32
    %86 = vector.broadcast %cst_34 : f32 to vector<8x8xf32>
    %87 = arith.mulf %85, %86 : vector<8x8xf32>
    %cst_35 = arith.constant -1.000000e+09 : f32
    %88 = vector.broadcast %cst_35 : f32 to vector<8x8xf32>
    %89 = arith.select %21, %87, %88 : vector<8x8xi1>, vector<8x8xf32>
    %cst_36 = arith.constant dense<0xFF800000> : vector<8xf32>
    %90 = vector.multi_reduction <maximumf>, %89, %cst_36 [1] : vector<8x8xf32> to vector<8xf32>
    %91 = vector.shape_cast %90 : vector<8xf32> to vector<8x1xf32>
    %92 = vector.broadcast %91 : vector<8x1xf32> to vector<8x8xf32>
    %93 = arith.subf %89, %92 : vector<8x8xf32>
    %94 = math.exp %93 : vector<8x8xf32>
    %cst_37 = arith.constant dense<0.000000e+00> : vector<8xf32>
    %95 = vector.multi_reduction <add>, %94, %cst_37 [1] : vector<8x8xf32> to vector<8xf32>
    %96 = vector.shape_cast %95 : vector<8xf32> to vector<8x1xf32>
    %97 = tpu.reciprocal %96 {approx = true} : vector<8x1xf32> -> vector<8x1xf32>
    %98 = vector.broadcast %97 : vector<8x1xf32> to vector<8x8xf32>
    %99 = arith.mulf %94, %98 : vector<8x8xf32>
    %cst_38 = arith.constant dense<0.000000e+00> : vector<8x8xf32>
    %100 = tpu.matmul %99, %84, %cst_38 {dimension_numbers = #tpu.dot_dimension_numbers<[1], [0], [0], [1], [0, 0, 1, 1], [], []>} : vector<8x8xf32>, vector<8x8xf32>, vector<8x8xf32> -> vector<8x8xf32>
    %101 = tpu.concatenate %43, %62, %81, %100 in 1 : vector<8x8xf32>, vector<8x8xf32>, vector<8x8xf32>, vector<8x8xf32> -> vector<8x32xf32>
    %c0_39 = arith.constant 0 : index
    %c0_40 = arith.constant 0 : index
    %c0_41 = arith.constant 0 : index
    %102 = vector.load %arg8[%c0_39, %c0_40, %c0_41] : memref<1x32x32xf32, #tpu.memory_space<vmem>>, vector<1x32x32xf32>
    %103 = vector.shape_cast %102 : vector<1x32x32xf32> to vector<32x32xf32>
    %cst_42 = arith.constant dense<0.000000e+00> : vector<8x32xf32>
    %104 = tpu.matmul %101, %103, %cst_42 {dimension_numbers = #tpu.dot_dimension_numbers<[1], [0], [0], [1], [0, 0, 1, 1], [], []>} : vector<8x32xf32>, vector<32x32xf32>, vector<8x32xf32> -> vector<8x32xf32>
    %c0_43 = arith.constant 0 : index
    %c0_44 = arith.constant 0 : index
    %c0_45 = arith.constant 0 : index
    %105 = vector.load %arg9[%c0_43, %c0_44, %c0_45] : memref<1x1x32xf32, #tpu.memory_space<vmem>>, vector<1x1x32xf32>
    %106 = vector.shape_cast %105 : vector<1x1x32xf32> to vector<1x32xf32>
    %107 = vector.broadcast %106 : vector<1x32xf32> to vector<8x32xf32>
    %108 = arith.addf %104, %107 : vector<8x32xf32>
    %c0_46 = arith.constant 0 : index
    %c0_47 = arith.constant 0 : index
    %c0_48 = arith.constant 0 : index
    %109 = vector.load %arg10[%c0_46, %c0_47, %c0_48] : memref<1x1x32xf32, #tpu.memory_space<vmem>>, vector<1x1x32xf32>
    %110 = vector.shape_cast %109 : vector<1x1x32xf32> to vector<1x32xf32>
    %c0_49 = arith.constant 0 : index
    %c0_50 = arith.constant 0 : index
    %c0_51 = arith.constant 0 : index
    %111 = vector.load %arg11[%c0_49, %c0_50, %c0_51] : memref<1x1x32xf32, #tpu.memory_space<vmem>>, vector<1x1x32xf32>
    %112 = vector.shape_cast %111 : vector<1x1x32xf32> to vector<1x32xf32>
    %113 = arith.addf %3, %108 : vector<8x32xf32>
    %cst_52 = arith.constant dense<0.000000e+00> : vector<8xf32>
    %114 = vector.multi_reduction <add>, %113, %cst_52 [1] : vector<8x32xf32> to vector<8xf32>
    %115 = vector.shape_cast %114 : vector<8xf32> to vector<8x1xf32>
    %cst_53 = arith.constant 3.200000e+01 : f32
    %116 = vector.broadcast %cst_53 : f32 to vector<8x1xf32>
    %117 = arith.divf %115, %116 : vector<8x1xf32>
    %118 = vector.broadcast %117 : vector<8x1xf32> to vector<8x32xf32>
    %119 = arith.subf %113, %118 : vector<8x32xf32>
    %120 = arith.mulf %119, %119 : vector<8x32xf32>
    %cst_54 = arith.constant dense<0.000000e+00> : vector<8xf32>
    %121 = vector.multi_reduction <add>, %120, %cst_54 [1] : vector<8x32xf32> to vector<8xf32>
    %122 = vector.shape_cast %121 : vector<8xf32> to vector<8x1xf32>
    %cst_55 = arith.constant 3.200000e+01 : f32
    %123 = vector.broadcast %cst_55 : f32 to vector<8x1xf32>
    %124 = arith.divf %122, %123 : vector<8x1xf32>
    %125 = vector.broadcast %117 : vector<8x1xf32> to vector<8x32xf32>
    %126 = arith.subf %113, %125 : vector<8x32xf32>
    %cst_56 = arith.constant 9.99999974E-6 : f32
    %127 = vector.broadcast %cst_56 : f32 to vector<8x1xf32>
    %128 = arith.addf %124, %127 : vector<8x1xf32>
    %129 = math.rsqrt %128 : vector<8x1xf32>
    %130 = vector.broadcast %129 : vector<8x1xf32> to vector<8x32xf32>
    %131 = arith.mulf %126, %130 : vector<8x32xf32>
    %132 = vector.broadcast %110 : vector<1x32xf32> to vector<8x32xf32>
    %133 = arith.mulf %131, %132 : vector<8x32xf32>
    %134 = vector.broadcast %112 : vector<1x32xf32> to vector<8x32xf32>
    %135 = arith.addf %133, %134 : vector<8x32xf32>
    %c0_57 = arith.constant 0 : index
    %c0_58 = arith.constant 0 : index
    %c0_59 = arith.constant 0 : index
    %136 = vector.load %arg12[%c0_57, %c0_58, %c0_59] : memref<1x32x32xf32, #tpu.memory_space<vmem>>, vector<1x32x32xf32>
    %137 = vector.shape_cast %136 : vector<1x32x32xf32> to vector<32x32xf32>
    %cst_60 = arith.constant dense<0.000000e+00> : vector<8x32xf32>
    %138 = tpu.matmul %135, %137, %cst_60 {dimension_numbers = #tpu.dot_dimension_numbers<[1], [0], [0], [1], [0, 0, 1, 1], [], []>} : vector<8x32xf32>, vector<32x32xf32>, vector<8x32xf32> -> vector<8x32xf32>
    %c0_61 = arith.constant 0 : index
    %c0_62 = arith.constant 0 : index
    %c0_63 = arith.constant 0 : index
    %139 = vector.load %arg13[%c0_61, %c0_62, %c0_63] : memref<1x1x32xf32, #tpu.memory_space<vmem>>, vector<1x1x32xf32>
    %140 = vector.shape_cast %139 : vector<1x1x32xf32> to vector<1x32xf32>
    %141 = vector.broadcast %140 : vector<1x32xf32> to vector<8x32xf32>
    %142 = arith.addf %138, %141 : vector<8x32xf32>
    %c0_64 = arith.constant 0 : index
    %c0_65 = arith.constant 0 : index
    %c0_66 = arith.constant 0 : index
    %143 = vector.load %arg14[%c0_64, %c0_65, %c0_66] : memref<1x32x64xf32, #tpu.memory_space<vmem>>, vector<1x32x64xf32>
    %144 = vector.shape_cast %143 : vector<1x32x64xf32> to vector<32x64xf32>
    %cst_67 = arith.constant dense<0.000000e+00> : vector<8x64xf32>
    %145 = tpu.matmul %5, %144, %cst_67 {dimension_numbers = #tpu.dot_dimension_numbers<[1], [0], [0], [1], [0, 0, 1, 1], [], []>} : vector<8x32xf32>, vector<32x64xf32>, vector<8x64xf32> -> vector<8x64xf32>
    %c0_68 = arith.constant 0 : index
    %c0_69 = arith.constant 0 : index
    %c0_70 = arith.constant 0 : index
    %146 = vector.load %arg15[%c0_68, %c0_69, %c0_70] : memref<1x1x64xf32, #tpu.memory_space<vmem>>, vector<1x1x64xf32>
    %147 = vector.shape_cast %146 : vector<1x1x64xf32> to vector<1x64xf32>
    %148 = vector.broadcast %147 : vector<1x64xf32> to vector<8x64xf32>
    %149 = arith.addf %145, %148 : vector<8x64xf32>
    %c0_71 = arith.constant 0 : index
    %c0_72 = arith.constant 0 : index
    %c0_73 = arith.constant 0 : index
    %150 = vector.load %arg4[%c0_71, %c0_72, %c0_73] : memref<1x1x8xf32, #tpu.memory_space<vmem>>, vector<1x1x8xf32>
    %151 = vector.shape_cast %150 : vector<1x1x8xf32> to vector<1x8xf32>
    %cst_74 = arith.constant 5.000000e-01 : f32
    %152 = vector.broadcast %cst_74 : f32 to vector<1x8xf32>
    %153 = arith.cmpf ogt, %151, %152 : vector<1x8xf32>
    %154 = vector.extract_strided_slice %149 {offsets = [0, 0], sizes = [8, 32], strides = [1, 1]} : vector<8x64xf32> to vector<8x32xf32>
    %155 = vector.extract_strided_slice %149 {offsets = [0, 32], sizes = [8, 32], strides = [1, 1]} : vector<8x64xf32> to vector<8x32xf32>
    %156 = vector.extract_strided_slice %142 {offsets = [0, 0], sizes = [8, 8], strides = [1, 1]} : vector<8x32xf32> to vector<8x8xf32>
    %157 = vector.extract_strided_slice %154 {offsets = [0, 0], sizes = [8, 8], strides = [1, 1]} : vector<8x32xf32> to vector<8x8xf32>
    %158 = vector.extract_strided_slice %155 {offsets = [0, 0], sizes = [8, 8], strides = [1, 1]} : vector<8x32xf32> to vector<8x8xf32>
    %cst_75 = arith.constant dense<0.000000e+00> : vector<8x8xf32>
    %159 = tpu.matmul %156, %157, %cst_75 {dimension_numbers = #tpu.dot_dimension_numbers<[1], [1], [0], [0], [0, 0, 1, 0], [], []>} : vector<8x8xf32>, vector<8x8xf32>, vector<8x8xf32> -> vector<8x8xf32>
    %cst_76 = arith.constant 0.353553385 : f32
    %160 = vector.broadcast %cst_76 : f32 to vector<8x8xf32>
    %161 = arith.mulf %159, %160 : vector<8x8xf32>
    %cst_77 = arith.constant -1.000000e+09 : f32
    %162 = vector.shape_cast %153 : vector<1x8xi1> to vector<1x8xi1>
    %163 = vector.broadcast %162 : vector<1x8xi1> to vector<8x8xi1>
    %164 = vector.broadcast %cst_77 : f32 to vector<8x8xf32>
    %165 = arith.select %163, %161, %164 : vector<8x8xi1>, vector<8x8xf32>
    %cst_78 = arith.constant dense<0xFF800000> : vector<8xf32>
    %166 = vector.multi_reduction <maximumf>, %165, %cst_78 [1] : vector<8x8xf32> to vector<8xf32>
    %167 = vector.shape_cast %166 : vector<8xf32> to vector<8x1xf32>
    %168 = vector.broadcast %167 : vector<8x1xf32> to vector<8x8xf32>
    %169 = arith.subf %165, %168 : vector<8x8xf32>
    %170 = math.exp %169 : vector<8x8xf32>
    %cst_79 = arith.constant dense<0.000000e+00> : vector<8xf32>
    %171 = vector.multi_reduction <add>, %170, %cst_79 [1] : vector<8x8xf32> to vector<8xf32>
    %172 = vector.shape_cast %171 : vector<8xf32> to vector<8x1xf32>
    %173 = tpu.reciprocal %172 {approx = true} : vector<8x1xf32> -> vector<8x1xf32>
    %174 = vector.broadcast %173 : vector<8x1xf32> to vector<8x8xf32>
    %175 = arith.mulf %170, %174 : vector<8x8xf32>
    %cst_80 = arith.constant dense<0.000000e+00> : vector<8x8xf32>
    %176 = tpu.matmul %175, %158, %cst_80 {dimension_numbers = #tpu.dot_dimension_numbers<[1], [0], [0], [1], [0, 0, 1, 1], [], []>} : vector<8x8xf32>, vector<8x8xf32>, vector<8x8xf32> -> vector<8x8xf32>
    %177 = vector.extract_strided_slice %142 {offsets = [0, 8], sizes = [8, 8], strides = [1, 1]} : vector<8x32xf32> to vector<8x8xf32>
    %178 = vector.extract_strided_slice %154 {offsets = [0, 8], sizes = [8, 8], strides = [1, 1]} : vector<8x32xf32> to vector<8x8xf32>
    %179 = vector.extract_strided_slice %155 {offsets = [0, 8], sizes = [8, 8], strides = [1, 1]} : vector<8x32xf32> to vector<8x8xf32>
    %cst_81 = arith.constant dense<0.000000e+00> : vector<8x8xf32>
    %180 = tpu.matmul %177, %178, %cst_81 {dimension_numbers = #tpu.dot_dimension_numbers<[1], [1], [0], [0], [0, 0, 1, 0], [], []>} : vector<8x8xf32>, vector<8x8xf32>, vector<8x8xf32> -> vector<8x8xf32>
    %cst_82 = arith.constant 0.353553385 : f32
    %181 = vector.broadcast %cst_82 : f32 to vector<8x8xf32>
    %182 = arith.mulf %180, %181 : vector<8x8xf32>
    %cst_83 = arith.constant -1.000000e+09 : f32
    %183 = vector.shape_cast %153 : vector<1x8xi1> to vector<1x8xi1>
    %184 = vector.broadcast %183 : vector<1x8xi1> to vector<8x8xi1>
    %185 = vector.broadcast %cst_83 : f32 to vector<8x8xf32>
    %186 = arith.select %184, %182, %185 : vector<8x8xi1>, vector<8x8xf32>
    %cst_84 = arith.constant dense<0xFF800000> : vector<8xf32>
    %187 = vector.multi_reduction <maximumf>, %186, %cst_84 [1] : vector<8x8xf32> to vector<8xf32>
    %188 = vector.shape_cast %187 : vector<8xf32> to vector<8x1xf32>
    %189 = vector.broadcast %188 : vector<8x1xf32> to vector<8x8xf32>
    %190 = arith.subf %186, %189 : vector<8x8xf32>
    %191 = math.exp %190 : vector<8x8xf32>
    %cst_85 = arith.constant dense<0.000000e+00> : vector<8xf32>
    %192 = vector.multi_reduction <add>, %191, %cst_85 [1] : vector<8x8xf32> to vector<8xf32>
    %193 = vector.shape_cast %192 : vector<8xf32> to vector<8x1xf32>
    %194 = tpu.reciprocal %193 {approx = true} : vector<8x1xf32> -> vector<8x1xf32>
    %195 = vector.broadcast %194 : vector<8x1xf32> to vector<8x8xf32>
    %196 = arith.mulf %191, %195 : vector<8x8xf32>
    %cst_86 = arith.constant dense<0.000000e+00> : vector<8x8xf32>
    %197 = tpu.matmul %196, %179, %cst_86 {dimension_numbers = #tpu.dot_dimension_numbers<[1], [0], [0], [1], [0, 0, 1, 1], [], []>} : vector<8x8xf32>, vector<8x8xf32>, vector<8x8xf32> -> vector<8x8xf32>
    %198 = vector.extract_strided_slice %142 {offsets = [0, 16], sizes = [8, 8], strides = [1, 1]} : vector<8x32xf32> to vector<8x8xf32>
    %199 = vector.extract_strided_slice %154 {offsets = [0, 16], sizes = [8, 8], strides = [1, 1]} : vector<8x32xf32> to vector<8x8xf32>
    %200 = vector.extract_strided_slice %155 {offsets = [0, 16], sizes = [8, 8], strides = [1, 1]} : vector<8x32xf32> to vector<8x8xf32>
    %cst_87 = arith.constant dense<0.000000e+00> : vector<8x8xf32>
    %201 = tpu.matmul %198, %199, %cst_87 {dimension_numbers = #tpu.dot_dimension_numbers<[1], [1], [0], [0], [0, 0, 1, 0], [], []>} : vector<8x8xf32>, vector<8x8xf32>, vector<8x8xf32> -> vector<8x8xf32>
    %cst_88 = arith.constant 0.353553385 : f32
    %202 = vector.broadcast %cst_88 : f32 to vector<8x8xf32>
    %203 = arith.mulf %201, %202 : vector<8x8xf32>
    %cst_89 = arith.constant -1.000000e+09 : f32
    %204 = vector.shape_cast %153 : vector<1x8xi1> to vector<1x8xi1>
    %205 = vector.broadcast %204 : vector<1x8xi1> to vector<8x8xi1>
    %206 = vector.broadcast %cst_89 : f32 to vector<8x8xf32>
    %207 = arith.select %205, %203, %206 : vector<8x8xi1>, vector<8x8xf32>
    %cst_90 = arith.constant dense<0xFF800000> : vector<8xf32>
    %208 = vector.multi_reduction <maximumf>, %207, %cst_90 [1] : vector<8x8xf32> to vector<8xf32>
    %209 = vector.shape_cast %208 : vector<8xf32> to vector<8x1xf32>
    %210 = vector.broadcast %209 : vector<8x1xf32> to vector<8x8xf32>
    %211 = arith.subf %207, %210 : vector<8x8xf32>
    %212 = math.exp %211 : vector<8x8xf32>
    %cst_91 = arith.constant dense<0.000000e+00> : vector<8xf32>
    %213 = vector.multi_reduction <add>, %212, %cst_91 [1] : vector<8x8xf32> to vector<8xf32>
    %214 = vector.shape_cast %213 : vector<8xf32> to vector<8x1xf32>
    %215 = tpu.reciprocal %214 {approx = true} : vector<8x1xf32> -> vector<8x1xf32>
    %216 = vector.broadcast %215 : vector<8x1xf32> to vector<8x8xf32>
    %217 = arith.mulf %212, %216 : vector<8x8xf32>
    %cst_92 = arith.constant dense<0.000000e+00> : vector<8x8xf32>
    %218 = tpu.matmul %217, %200, %cst_92 {dimension_numbers = #tpu.dot_dimension_numbers<[1], [0], [0], [1], [0, 0, 1, 1], [], []>} : vector<8x8xf32>, vector<8x8xf32>, vector<8x8xf32> -> vector<8x8xf32>
    %219 = vector.extract_strided_slice %142 {offsets = [0, 24], sizes = [8, 8], strides = [1, 1]} : vector<8x32xf32> to vector<8x8xf32>
    %220 = vector.extract_strided_slice %154 {offsets = [0, 24], sizes = [8, 8], strides = [1, 1]} : vector<8x32xf32> to vector<8x8xf32>
    %221 = vector.extract_strided_slice %155 {offsets = [0, 24], sizes = [8, 8], strides = [1, 1]} : vector<8x32xf32> to vector<8x8xf32>
    %cst_93 = arith.constant dense<0.000000e+00> : vector<8x8xf32>
    %222 = tpu.matmul %219, %220, %cst_93 {dimension_numbers = #tpu.dot_dimension_numbers<[1], [1], [0], [0], [0, 0, 1, 0], [], []>} : vector<8x8xf32>, vector<8x8xf32>, vector<8x8xf32> -> vector<8x8xf32>
    %cst_94 = arith.constant 0.353553385 : f32
    %223 = vector.broadcast %cst_94 : f32 to vector<8x8xf32>
    %224 = arith.mulf %222, %223 : vector<8x8xf32>
    %cst_95 = arith.constant -1.000000e+09 : f32
    %225 = vector.shape_cast %153 : vector<1x8xi1> to vector<1x8xi1>
    %226 = vector.broadcast %225 : vector<1x8xi1> to vector<8x8xi1>
    %227 = vector.broadcast %cst_95 : f32 to vector<8x8xf32>
    %228 = arith.select %226, %224, %227 : vector<8x8xi1>, vector<8x8xf32>
    %cst_96 = arith.constant dense<0xFF800000> : vector<8xf32>
    %229 = vector.multi_reduction <maximumf>, %228, %cst_96 [1] : vector<8x8xf32> to vector<8xf32>
    %230 = vector.shape_cast %229 : vector<8xf32> to vector<8x1xf32>
    %231 = vector.broadcast %230 : vector<8x1xf32> to vector<8x8xf32>
    %232 = arith.subf %228, %231 : vector<8x8xf32>
    %233 = math.exp %232 : vector<8x8xf32>
    %cst_97 = arith.constant dense<0.000000e+00> : vector<8xf32>
    %234 = vector.multi_reduction <add>, %233, %cst_97 [1] : vector<8x8xf32> to vector<8xf32>
    %235 = vector.shape_cast %234 : vector<8xf32> to vector<8x1xf32>
    %236 = tpu.reciprocal %235 {approx = true} : vector<8x1xf32> -> vector<8x1xf32>
    %237 = vector.broadcast %236 : vector<8x1xf32> to vector<8x8xf32>
    %238 = arith.mulf %233, %237 : vector<8x8xf32>
    %cst_98 = arith.constant dense<0.000000e+00> : vector<8x8xf32>
    %239 = tpu.matmul %238, %221, %cst_98 {dimension_numbers = #tpu.dot_dimension_numbers<[1], [0], [0], [1], [0, 0, 1, 1], [], []>} : vector<8x8xf32>, vector<8x8xf32>, vector<8x8xf32> -> vector<8x8xf32>
    %240 = tpu.concatenate %176, %197, %218, %239 in 1 : vector<8x8xf32>, vector<8x8xf32>, vector<8x8xf32>, vector<8x8xf32> -> vector<8x32xf32>
    %c0_99 = arith.constant 0 : index
    %c0_100 = arith.constant 0 : index
    %c0_101 = arith.constant 0 : index
    %241 = vector.load %arg16[%c0_99, %c0_100, %c0_101] : memref<1x32x32xf32, #tpu.memory_space<vmem>>, vector<1x32x32xf32>
    %242 = vector.shape_cast %241 : vector<1x32x32xf32> to vector<32x32xf32>
    %cst_102 = arith.constant dense<0.000000e+00> : vector<8x32xf32>
    %243 = tpu.matmul %240, %242, %cst_102 {dimension_numbers = #tpu.dot_dimension_numbers<[1], [0], [0], [1], [0, 0, 1, 1], [], []>} : vector<8x32xf32>, vector<32x32xf32>, vector<8x32xf32> -> vector<8x32xf32>
    %c0_103 = arith.constant 0 : index
    %c0_104 = arith.constant 0 : index
    %c0_105 = arith.constant 0 : index
    %244 = vector.load %arg17[%c0_103, %c0_104, %c0_105] : memref<1x1x32xf32, #tpu.memory_space<vmem>>, vector<1x1x32xf32>
    %245 = vector.shape_cast %244 : vector<1x1x32xf32> to vector<1x32xf32>
    %246 = vector.broadcast %245 : vector<1x32xf32> to vector<8x32xf32>
    %247 = arith.addf %243, %246 : vector<8x32xf32>
    %c0_106 = arith.constant 0 : index
    %c0_107 = arith.constant 0 : index
    %c0_108 = arith.constant 0 : index
    %248 = vector.load %arg18[%c0_106, %c0_107, %c0_108] : memref<1x1x32xf32, #tpu.memory_space<vmem>>, vector<1x1x32xf32>
    %249 = vector.shape_cast %248 : vector<1x1x32xf32> to vector<1x32xf32>
    %c0_109 = arith.constant 0 : index
    %c0_110 = arith.constant 0 : index
    %c0_111 = arith.constant 0 : index
    %250 = vector.load %arg19[%c0_109, %c0_110, %c0_111] : memref<1x1x32xf32, #tpu.memory_space<vmem>>, vector<1x1x32xf32>
    %251 = vector.shape_cast %250 : vector<1x1x32xf32> to vector<1x32xf32>
    %252 = arith.addf %135, %247 : vector<8x32xf32>
    %cst_112 = arith.constant dense<0.000000e+00> : vector<8xf32>
    %253 = vector.multi_reduction <add>, %252, %cst_112 [1] : vector<8x32xf32> to vector<8xf32>
    %254 = vector.shape_cast %253 : vector<8xf32> to vector<8x1xf32>
    %cst_113 = arith.constant 3.200000e+01 : f32
    %255 = vector.broadcast %cst_113 : f32 to vector<8x1xf32>
    %256 = arith.divf %254, %255 : vector<8x1xf32>
    %257 = vector.broadcast %256 : vector<8x1xf32> to vector<8x32xf32>
    %258 = arith.subf %252, %257 : vector<8x32xf32>
    %259 = arith.mulf %258, %258 : vector<8x32xf32>
    %cst_114 = arith.constant dense<0.000000e+00> : vector<8xf32>
    %260 = vector.multi_reduction <add>, %259, %cst_114 [1] : vector<8x32xf32> to vector<8xf32>
    %261 = vector.shape_cast %260 : vector<8xf32> to vector<8x1xf32>
    %cst_115 = arith.constant 3.200000e+01 : f32
    %262 = vector.broadcast %cst_115 : f32 to vector<8x1xf32>
    %263 = arith.divf %261, %262 : vector<8x1xf32>
    %264 = vector.broadcast %256 : vector<8x1xf32> to vector<8x32xf32>
    %265 = arith.subf %252, %264 : vector<8x32xf32>
    %cst_116 = arith.constant 9.99999974E-6 : f32
    %266 = vector.broadcast %cst_116 : f32 to vector<8x1xf32>
    %267 = arith.addf %263, %266 : vector<8x1xf32>
    %268 = math.rsqrt %267 : vector<8x1xf32>
    %269 = vector.broadcast %268 : vector<8x1xf32> to vector<8x32xf32>
    %270 = arith.mulf %265, %269 : vector<8x32xf32>
    %271 = vector.broadcast %249 : vector<1x32xf32> to vector<8x32xf32>
    %272 = arith.mulf %270, %271 : vector<8x32xf32>
    %273 = vector.broadcast %251 : vector<1x32xf32> to vector<8x32xf32>
    %274 = arith.addf %272, %273 : vector<8x32xf32>
    %c0_117 = arith.constant 0 : index
    %c0_118 = arith.constant 0 : index
    %c0_119 = arith.constant 0 : index
    %275 = vector.load %arg20[%c0_117, %c0_118, %c0_119] : memref<1x32x64xf32, #tpu.memory_space<vmem>>, vector<1x32x64xf32>
    %276 = vector.shape_cast %275 : vector<1x32x64xf32> to vector<32x64xf32>
    %cst_120 = arith.constant dense<0.000000e+00> : vector<8x64xf32>
    %277 = tpu.matmul %274, %276, %cst_120 {dimension_numbers = #tpu.dot_dimension_numbers<[1], [0], [0], [1], [0, 0, 1, 1], [], []>} : vector<8x32xf32>, vector<32x64xf32>, vector<8x64xf32> -> vector<8x64xf32>
    %c0_121 = arith.constant 0 : index
    %c0_122 = arith.constant 0 : index
    %c0_123 = arith.constant 0 : index
    %278 = vector.load %arg21[%c0_121, %c0_122, %c0_123] : memref<1x1x64xf32, #tpu.memory_space<vmem>>, vector<1x1x64xf32>
    %279 = vector.shape_cast %278 : vector<1x1x64xf32> to vector<1x64xf32>
    %280 = vector.broadcast %279 : vector<1x64xf32> to vector<8x64xf32>
    %281 = arith.addf %277, %280 : vector<8x64xf32>
    %cst_124 = arith.constant 0.000000e+00 : f32
    %282 = vector.broadcast %cst_124 : f32 to vector<8x64xf32>
    %283 = arith.maximumf %281, %282 : vector<8x64xf32>
    %c0_125 = arith.constant 0 : index
    %c0_126 = arith.constant 0 : index
    %c0_127 = arith.constant 0 : index
    %284 = vector.load %arg22[%c0_125, %c0_126, %c0_127] : memref<1x64x32xf32, #tpu.memory_space<vmem>>, vector<1x64x32xf32>
    %285 = vector.shape_cast %284 : vector<1x64x32xf32> to vector<64x32xf32>
    %cst_128 = arith.constant dense<0.000000e+00> : vector<8x32xf32>
    %286 = tpu.matmul %283, %285, %cst_128 {dimension_numbers = #tpu.dot_dimension_numbers<[1], [0], [0], [1], [0, 0, 1, 1], [], []>} : vector<8x64xf32>, vector<64x32xf32>, vector<8x32xf32> -> vector<8x32xf32>
    %c0_129 = arith.constant 0 : index
    %c0_130 = arith.constant 0 : index
    %c0_131 = arith.constant 0 : index
    %287 = vector.load %arg23[%c0_129, %c0_130, %c0_131] : memref<1x1x32xf32, #tpu.memory_space<vmem>>, vector<1x1x32xf32>
    %288 = vector.shape_cast %287 : vector<1x1x32xf32> to vector<1x32xf32>
    %289 = vector.broadcast %288 : vector<1x32xf32> to vector<8x32xf32>
    %290 = arith.addf %286, %289 : vector<8x32xf32>
    %c0_132 = arith.constant 0 : index
    %c0_133 = arith.constant 0 : index
    %c0_134 = arith.constant 0 : index
    %291 = vector.load %arg24[%c0_132, %c0_133, %c0_134] : memref<1x1x32xf32, #tpu.memory_space<vmem>>, vector<1x1x32xf32>
    %292 = vector.shape_cast %291 : vector<1x1x32xf32> to vector<1x32xf32>
    %c0_135 = arith.constant 0 : index
    %c0_136 = arith.constant 0 : index
    %c0_137 = arith.constant 0 : index
    %293 = vector.load %arg25[%c0_135, %c0_136, %c0_137] : memref<1x1x32xf32, #tpu.memory_space<vmem>>, vector<1x1x32xf32>
    %294 = vector.shape_cast %293 : vector<1x1x32xf32> to vector<1x32xf32>
    %295 = arith.addf %274, %290 : vector<8x32xf32>
    %cst_138 = arith.constant dense<0.000000e+00> : vector<8xf32>
    %296 = vector.multi_reduction <add>, %295, %cst_138 [1] : vector<8x32xf32> to vector<8xf32>
    %297 = vector.shape_cast %296 : vector<8xf32> to vector<8x1xf32>
    %cst_139 = arith.constant 3.200000e+01 : f32
    %298 = vector.broadcast %cst_139 : f32 to vector<8x1xf32>
    %299 = arith.divf %297, %298 : vector<8x1xf32>
    %300 = vector.broadcast %299 : vector<8x1xf32> to vector<8x32xf32>
    %301 = arith.subf %295, %300 : vector<8x32xf32>
    %302 = arith.mulf %301, %301 : vector<8x32xf32>
    %cst_140 = arith.constant dense<0.000000e+00> : vector<8xf32>
    %303 = vector.multi_reduction <add>, %302, %cst_140 [1] : vector<8x32xf32> to vector<8xf32>
    %304 = vector.shape_cast %303 : vector<8xf32> to vector<8x1xf32>
    %cst_141 = arith.constant 3.200000e+01 : f32
    %305 = vector.broadcast %cst_141 : f32 to vector<8x1xf32>
    %306 = arith.divf %304, %305 : vector<8x1xf32>
    %307 = vector.broadcast %299 : vector<8x1xf32> to vector<8x32xf32>
    %308 = arith.subf %295, %307 : vector<8x32xf32>
    %cst_142 = arith.constant 9.99999974E-6 : f32
    %309 = vector.broadcast %cst_142 : f32 to vector<8x1xf32>
    %310 = arith.addf %306, %309 : vector<8x1xf32>
    %311 = math.rsqrt %310 : vector<8x1xf32>
    %312 = vector.broadcast %311 : vector<8x1xf32> to vector<8x32xf32>
    %313 = arith.mulf %308, %312 : vector<8x32xf32>
    %314 = vector.broadcast %292 : vector<1x32xf32> to vector<8x32xf32>
    %315 = arith.mulf %313, %314 : vector<8x32xf32>
    %316 = vector.broadcast %294 : vector<1x32xf32> to vector<8x32xf32>
    %317 = arith.addf %315, %316 : vector<8x32xf32>
    %c0_143 = arith.constant 0 : index
    %c0_144 = arith.constant 0 : index
    %318 = vector.load %arg29[%c0_143, %c0_144] : memref<8x32xf32, #tpu.memory_space<vmem>>, vector<8x32xf32>
    tpu.vector_store %arg29[%c0_143, %c0_144], %317 {strides = array<i32>} : memref<8x32xf32, #tpu.memory_space<vmem>>, vector<8x32xf32>,
    %c1_i32 = arith.constant 1 : i32
    %319 = arith.cmpi eq, %arg1, %c1_i32 : i32
    %320 = arith.extui %319 : i1 to i32
    %c0_i32_145 = arith.constant 0 : i32
    %321 = arith.cmpi ne, %320, %c0_i32_145 : i32
    scf.if %321 {
      %c0_146 = arith.constant 0 : index
      %c0_147 = arith.constant 0 : index
      %322 = vector.load %arg26[%c0_146, %c0_147] : memref<32x64xf32, #tpu.memory_space<vmem>>, vector<32x64xf32>
      %cst_148 = arith.constant dense<0.000000e+00> : vector<8x64xf32>
      %323 = tpu.matmul %317, %322, %cst_148 {dimension_numbers = #tpu.dot_dimension_numbers<[1], [0], [0], [1], [0, 0, 1, 1], [], []>} : vector<8x32xf32>, vector<32x64xf32>, vector<8x64xf32> -> vector<8x64xf32>
      %c0_149 = arith.constant 0 : index
      %c0_150 = arith.constant 0 : index
      %324 = vector.load %arg27[%c0_149, %c0_150] : memref<1x64xf32, #tpu.memory_space<vmem>>, vector<1x64xf32>
      %325 = vector.broadcast %324 : vector<1x64xf32> to vector<8x64xf32>
      %326 = arith.addf %323, %325 : vector<8x64xf32>
      %c0_151 = arith.constant 0 : index
      %c0_152 = arith.constant 0 : index
      %c0_153 = arith.constant 0 : index
      %327 = vector.load %arg28[%c0_151, %c0_152, %c0_153] : memref<1x8x64xf32, #tpu.memory_space<vmem>>, vector<1x8x64xf32>
      %328 = vector.shape_cast %327 : vector<1x8x64xf32> to vector<8x64xf32>
      %329 = vector.shape_cast %326 : vector<8x64xf32> to vector<1x8x64xf32>
      tpu.vector_store %arg28[%c0_151, %c0_152, %c0_153], %329 {strides = array<i32>} : memref<1x8x64xf32, #tpu.memory_space<vmem>>, vector<1x8x64xf32>,
    } else {
    }
    return
  }
  func.func @transform_0(%arg0: i32, %arg1: i32) -> (i32, i32, i32) {
    %c0_i32 = arith.constant 0 : i32
    %c0_i32_0 = arith.constant 0 : i32
    %c0_i32_1 = arith.constant 0 : i32
    return %arg0, %c0_i32, %c0_i32_0 : i32, i32, i32
  }
  func.func @transform_1(%arg0: i32, %arg1: i32) -> (i32, i32, i32) {
    %c0_i32 = arith.constant 0 : i32
    %c0_i32_0 = arith.constant 0 : i32
    %c0_i32_1 = arith.constant 0 : i32
    return %arg0, %c0_i32, %c0_i32_0 : i32, i32, i32
  }
  func.func @transform_2(%arg0: i32, %arg1: i32) -> (i32, i32, i32) {
    %c0_i32 = arith.constant 0 : i32
    %c0_i32_0 = arith.constant 0 : i32
    %c0_i32_1 = arith.constant 0 : i32
    return %arg0, %c0_i32, %c0_i32_0 : i32, i32, i32
  }
  func.func @transform_3(%arg0: i32, %arg1: i32) -> (i32, i32, i32) {
    %c0_i32 = arith.constant 0 : i32
    %c0_i32_0 = arith.constant 0 : i32
    %c0_i32_1 = arith.constant 0 : i32
    return %arg0, %c0_i32, %c0_i32_0 : i32, i32, i32
  }
  func.func @transform_4(%arg0: i32, %arg1: i32) -> (i32, i32, i32) {
    %c0_i32 = arith.constant 0 : i32
    %c0_i32_0 = arith.constant 0 : i32
    %c0_i32_1 = arith.constant 0 : i32
    return %arg1, %c0_i32, %c0_i32_0 : i32, i32, i32
  }
  func.func @transform_5(%arg0: i32, %arg1: i32) -> (i32, i32, i32) {
    %c0_i32 = arith.constant 0 : i32
    %c0_i32_0 = arith.constant 0 : i32
    %c0_i32_1 = arith.constant 0 : i32
    return %arg1, %c0_i32, %c0_i32_0 : i32, i32, i32
  }
  func.func @transform_6(%arg0: i32, %arg1: i32) -> (i32, i32, i32) {
    %c0_i32 = arith.constant 0 : i32
    %c0_i32_0 = arith.constant 0 : i32
    %c0_i32_1 = arith.constant 0 : i32
    return %arg1, %c0_i32, %c0_i32_0 : i32, i32, i32
  }
  func.func @transform_7(%arg0: i32, %arg1: i32) -> (i32, i32, i32) {
    %c0_i32 = arith.constant 0 : i32
    %c0_i32_0 = arith.constant 0 : i32
    %c0_i32_1 = arith.constant 0 : i32
    return %arg1, %c0_i32, %c0_i32_0 : i32, i32, i32
  }
  func.func @transform_8(%arg0: i32, %arg1: i32) -> (i32, i32, i32) {
    %c0_i32 = arith.constant 0 : i32
    %c0_i32_0 = arith.constant 0 : i32
    %c0_i32_1 = arith.constant 0 : i32
    return %arg1, %c0_i32, %c0_i32_0 : i32, i32, i32
  }
  func.func @transform_9(%arg0: i32, %arg1: i32) -> (i32, i32, i32) {
    %c0_i32 = arith.constant 0 : i32
    %c0_i32_0 = arith.constant 0 : i32
    %c0_i32_1 = arith.constant 0 : i32
    return %arg1, %c0_i32, %c0_i32_0 : i32, i32, i32
  }
  func.func @transform_10(%arg0: i32, %arg1: i32) -> (i32, i32, i32) {
    %c0_i32 = arith.constant 0 : i32
    %c0_i32_0 = arith.constant 0 : i32
    %c0_i32_1 = arith.constant 0 : i32
    return %arg1, %c0_i32, %c0_i32_0 : i32, i32, i32
  }
  func.func @transform_11(%arg0: i32, %arg1: i32) -> (i32, i32, i32) {
    %c0_i32 = arith.constant 0 : i32
    %c0_i32_0 = arith.constant 0 : i32
    %c0_i32_1 = arith.constant 0 : i32
    return %arg1, %c0_i32, %c0_i32_0 : i32, i32, i32
  }
  func.func @transform_12(%arg0: i32, %arg1: i32) -> (i32, i32, i32) {
    %c0_i32 = arith.constant 0 : i32
    %c0_i32_0 = arith.constant 0 : i32
    %c0_i32_1 = arith.constant 0 : i32
    return %arg1, %c0_i32, %c0_i32_0 : i32, i32, i32
  }
  func.func @transform_13(%arg0: i32, %arg1: i32) -> (i32, i32, i32) {
    %c0_i32 = arith.constant 0 : i32
    %c0_i32_0 = arith.constant 0 : i32
    %c0_i32_1 = arith.constant 0 : i32
    return %arg1, %c0_i32, %c0_i32_0 : i32, i32, i32
  }
  func.func @transform_14(%arg0: i32, %arg1: i32) -> (i32, i32, i32) {
    %c0_i32 = arith.constant 0 : i32
    %c0_i32_0 = arith.constant 0 : i32
    %c0_i32_1 = arith.constant 0 : i32
    return %arg1, %c0_i32, %c0_i32_0 : i32, i32, i32
  }
  func.func @transform_15(%arg0: i32, %arg1: i32) -> (i32, i32, i32) {
    %c0_i32 = arith.constant 0 : i32
    %c0_i32_0 = arith.constant 0 : i32
    %c0_i32_1 = arith.constant 0 : i32
    return %arg1, %c0_i32, %c0_i32_0 : i32, i32, i32
  }
  func.func @transform_16(%arg0: i32, %arg1: i32) -> (i32, i32, i32) {
    %c0_i32 = arith.constant 0 : i32
    %c0_i32_0 = arith.constant 0 : i32
    %c0_i32_1 = arith.constant 0 : i32
    return %arg1, %c0_i32, %c0_i32_0 : i32, i32, i32
  }
  func.func @transform_17(%arg0: i32, %arg1: i32) -> (i32, i32, i32) {
    %c0_i32 = arith.constant 0 : i32
    %c0_i32_0 = arith.constant 0 : i32
    %c0_i32_1 = arith.constant 0 : i32
    return %arg1, %c0_i32, %c0_i32_0 : i32, i32, i32
  }
  func.func @transform_18(%arg0: i32, %arg1: i32) -> (i32, i32, i32) {
    %c0_i32 = arith.constant 0 : i32
    %c0_i32_0 = arith.constant 0 : i32
    %c0_i32_1 = arith.constant 0 : i32
    return %arg1, %c0_i32, %c0_i32_0 : i32, i32, i32
  }
  func.func @transform_19(%arg0: i32, %arg1: i32) -> (i32, i32, i32) {
    %c0_i32 = arith.constant 0 : i32
    %c0_i32_0 = arith.constant 0 : i32
    %c0_i32_1 = arith.constant 0 : i32
    return %arg1, %c0_i32, %c0_i32_0 : i32, i32, i32
  }
  func.func @transform_20(%arg0: i32, %arg1: i32) -> (i32, i32, i32) {
    %c0_i32 = arith.constant 0 : i32
    %c0_i32_0 = arith.constant 0 : i32
    %c0_i32_1 = arith.constant 0 : i32
    return %arg1, %c0_i32, %c0_i32_0 : i32, i32, i32
  }
  func.func @transform_21(%arg0: i32, %arg1: i32) -> (i32, i32, i32) {
    %c0_i32 = arith.constant 0 : i32
    %c0_i32_0 = arith.constant 0 : i32
    %c0_i32_1 = arith.constant 0 : i32
    return %arg1, %c0_i32, %c0_i32_0 : i32, i32, i32
  }
  func.func @transform_22(%arg0: i32, %arg1: i32) -> (i32, i32, i32) {
    %c0_i32 = arith.constant 0 : i32
    %c0_i32_0 = arith.constant 0 : i32
    %c0_i32_1 = arith.constant 0 : i32
    return %arg1, %c0_i32, %c0_i32_0 : i32, i32, i32
  }
  func.func @transform_23(%arg0: i32, %arg1: i32) -> (i32, i32, i32) {
    %c0_i32 = arith.constant 0 : i32
    %c0_i32_0 = arith.constant 0 : i32
    %c0_i32_1 = arith.constant 0 : i32
    return %arg1, %c0_i32, %c0_i32_0 : i32, i32, i32
  }
  func.func @transform_24(%arg0: i32, %arg1: i32) -> (i32, i32) {
    %c0_i32 = arith.constant 0 : i32
    %c0_i32_0 = arith.constant 0 : i32
    %c0_i32_1 = arith.constant 0 : i32
    return %c0_i32, %c0_i32_0 : i32, i32
  }
  func.func @transform_25(%arg0: i32, %arg1: i32) -> (i32, i32) {
    %c0_i32 = arith.constant 0 : i32
    %c0_i32_0 = arith.constant 0 : i32
    %c0_i32_1 = arith.constant 0 : i32
    return %c0_i32, %c0_i32_0 : i32, i32
  }
  func.func @transform_26(%arg0: i32, %arg1: i32) -> (i32, i32, i32) {
    %c0_i32 = arith.constant 0 : i32
    %c0_i32_0 = arith.constant 0 : i32
    %c0_i32_1 = arith.constant 0 : i32
    return %arg0, %c0_i32, %c0_i32_0 : i32, i32, i32
  }
}

</mosaic_0001>

<bundles_post_ra>
// kernel: transformer_forward.2
= control target key start
LH: loop header
LB: loop body
LE: loop exit
PB: predicated region body
PF: predicated region fallthrough
CT: control target
= control target key end

     0   :  { %s2373_s29 = smov 0   ;;  %s2375_s30 = smov 0   ;;  %s2665_s0 = inlined_call_operand.vmem [shape: f32[2,8,32], index: 0, kind: input, shape index: {}]   ;;  %s2666_s1 = inlined_call_operand.vmem [shape: f32[2,1,8], index: 1, kind: input, shape index: {}]   ;;  %s2667_s2 = inlined_call_operand.vmem [shape: f32[2,32,96], index: 2, kind: input, shape index: {}]   ;;  %s2668_s3 = inlined_call_operand.vmem [shape: f32[2,1,96], index: 3, kind: input, shape index: {}]   ;;  %s2669_s4 = inlined_call_operand.vmem [shape: f32[2,32,32], index: 4, kind: input, shape index: {}]   ;;  %s2670_s5 = inlined_call_operand.vmem [shape: f32[2,1,32], index: 5, kind: input, shape index: {}]   ;;  %s2671_s6 = inlined_call_operand.vmem [shape: f32[2,1,32], index: 6, kind: input, shape index: {}]   ;;  %s2672_s7 = inlined_call_operand.vmem [shape: f32[2,1,32], index: 7, kind: input, shape index: {}]   ;;  %s2673_s8 = inlined_call_operand.vmem [shape: f32[2,32,64], index: 8, kind: input, shape index: {}]   ;;  %s2674_s9 = inlined_call_operand.vmem [shape: f32[2,1,64], index: 9, kind: input, shape index: {}]   ;;  %s2675_s10 = inlined_call_operand.vmem [shape: f32[2,64,32], index: 10, kind: input, shape index: {}]   ;;  %s2676_s11 = inlined_call_operand.vmem [shape: f32[2,1,32], index: 11, kind: input, shape index: {}]   ;;  %s2677_s12 = inlined_call_operand.vmem [shape: f32[2,1,32], index: 12, kind: input, shape index: {}]   ;;  %s2678_s13 = inlined_call_operand.vmem [shape: f32[2,1,32], index: 13, kind: input, shape index: {}]   ;;  %s2679_s14 = inlined_call_operand.vmem [shape: f32[2,8,32], index: 14, kind: output, shape index: {}]  }
   0x1   :  { %2685 = sst [smem:[#allocation10_spill]] %s2665_s0  ;;  %s2377_s15 = smov 0  }
   0x2   :  { %2686 = sst [smem:[#allocation11_spill]] %s2666_s1  ;;  %s2379_s16 = smov 0  }
   0x3   :  { %2687 = sst [smem:[#allocation12_spill]] %s2667_s2  ;;  %s2381_s17 = smov 0  }
   0x4   :  { %2688 = sst [smem:[#allocation13_spill]] %s2669_s4 }
   0x5   :  { %2689 = sst [smem:[#allocation14_spill]] %s2673_s8 }
   0x6   :  { %2690 = sst [smem:[#allocation15_spill]] %s2674_s9 }
   0x7   :  { %2691 = sst [smem:[#allocation16_spill]] %s2678_s13 }
   0x8   :  { %2692 = sst [smem:[#allocation17_spill]] %s2679_s14 }
   0x9 LB: > { %2693 = sst [smem:[#allocation3_spill]] %s2263_s29  ;;  %s33_s18 = sadd.s32 1, %s2271_s15  ;;  %s2279_s17 = sphi %s2381_s17, %s24_s17   ;;  %s2275_s16 = sphi %s2379_s16, %s2724_s16   ;;  %s2271_s15 = sphi %s2377_s15, %s2723_s15   ;;  %s2267_s30 = sphi %s2375_s30, %s2722_s30   ;;  %s2263_s29 = sphi %s2373_s29, %s2721_s29  }
   0xa   : > { %2694 = sst [smem:[#allocation4_spill]] %s2271_s15  ;;  %s36_s19 = sadd.s32 1, %s2275_s16 }
   0xb   : > { %2695 = sst [smem:[#allocation5_spill]] %s2275_s16  ;;  %p34_p0 = scmp.ge.s32.totalorder %s33_s18, 2 }
   0xc   : > { %2696 = sst [smem:[#allocation6_spill]] %s2279_s17  ;;  %p1989_p1 = scmp.ge.s32.totalorder %s2279_s17, 1 }
   0xd   : > { %p535_p2 = scmp.lt.s32.totalorder %s2279_s17, 5  ;;  %s2726_s18 = smov (%p34_p0, %s33_s18), 0 }
   0xe   : > { %2697 = sst [smem:[#allocation7_spill]] %s2726_s18  ;;  %s2728_s19 = smov (!%p34_p0, %s36_s19), %s2275_s16 }
   0xf   : > { %p536_p3 = pnand %p1989_p1, %p535_p2  ;;  %p38_p4 = scmp.ge.s32.totalorder %s2728_s19, 2 }
  0x11   : > { %s2730_s19 = smov (%p38_p4, %s2728_s19), 0  ;;  %539 = sbr.rel (%p536_p3) target bundleno = 2455 (0x997), region = 76 }
  0x12   : > { %2698 = sst [smem:[#allocation8_spill]] %s2730_s19 }
  0x16   : > { %p626_p5 = scmp.lt.s32.totalorder %s2267_s30, 1  ;;  %p633_p6 = scmp.lt.s32.totalorder %s2263_s29, 1 }
  0x17   : > { %s2701_s0 = sld [smem:[#allocation10_spill]] }
  0x18   : > { %s2732_s30 = smov (!%p626_p5, %s2267_s30), 1  ;;  %s2702_s2 = sld [smem:[#allocation12_spill]] }
  0x19   : > { %2699 = sst [smem:[#allocation9_spill]] %s2732_s30  ;;  %s1990_s21 = sshll.u32 %s2732_s30, 3 }
  0x1a   : > { %s2409_s20 = scalar_select %p633_p6, %s2263_s29, 1 }
  0x1b   : > { %s2703_s4 = sld [smem:[#allocation13_spill]] }
  0x1c   : > { %s2028_s28 = sshll.u32 %s2409_s20, 5  ;;  %s2704_s8 = sld [smem:[#allocation14_spill]] }
  0x1d   : > { %s629_s27 = scalar_lea.vmem %s2701_s0, %s1990_s21  ;;  %s670_s25 = scalar_lea.vmem %s2676_s11, %s2409_s20 }
  0x1e   : > { %s2423_s16 = scalar_lea.vmem %s2702_s2, %s2028_s28  ;;  %s673_s30 = scalar_lea.vmem %s2677_s12, %s2409_s20 }
  0x1f   : > { %s2706_s2 = sld [smem:[#allocation16_spill]] }
  0x20   : > { %s2707_s29 = sld [smem:[#allocation17_spill]] }
  0x21   : > { %s2432_s22 = scalar_lea.vmem %s2703_s4, %s2028_s28  ;;  %s2031_s4 = sshll.u32 %s2409_s20, 6 }
  0x22   : > { %s2449_s17 = scalar_lea.vmem %s2704_s8, %s2028_s28  ;;  %s2463_s1 = scalar_lea.vmem %s2675_s10, %s2031_s4 }
  0x23   : > { %s2708_s24 = sld [smem:[#allocation3_spill]] }
  0x25   : > { %s676_s8 = scalar_lea.vmem %s2706_s2, %s2409_s20 }
  0x26   : > { %s2476_s9 = scalar_lea.vmem %s2707_s29, %s1990_s21 }
  0x29   : > { %p2000_p7 = scmp.ne.s32.totalorder %s2708_s24, 0 }
  0x2b   : > { %684 = sbr.rel (%p2000_p7) target bundleno = 50 (0x32), region = 80 }
  0x30   : > { %v685_v0 = vld [vmem:[%s629_s27] sm:$0xff]  ;;  %vm686_vm0 = vcmask 261120  }
  0x31   : > { %687 = vst.msk [vmem:[#allocation2] sm:$0xff] %vm686_vm0, %v685_v0 }
  0x32 PF: > { %v692_v1 = vld [vmem:[%s2423_s16 + $0x18] sm:$0xff]  ;;  %v2281_v2 = vmov 0.0   ;;  %v691_v3 = vld [vmem:[%s2423_s16 + $0x10] sm:$0xff]  ;;  %vm2282_vm1 = vmmov 0   ;;  %v690_v4 = vld [vmem:[%s2423_s16 + $0x8] sm:$0xff]  ;;  %vm700_vm2 = vcmask 261120   ;;  %s2709_s29 = scalar_lea.vmem %s2668_s3, %s2409_s20  ;;  %v856_v18 = vlaneseq  ;;  %s2715_s15 = scalar_lea.vmem %s2672_s7, %s2409_s20 }
  0x33   : > { %2072 = vmatprep.subr.mxu1 %v2281_v2  ;;  %2080 = vmatprep.mubr.msk.f32.mxu1 %vm2282_vm1, %v2281_v2  ;;  %v689_v5 = vld [vmem:[%s2423_s16] sm:$0xff]  ;;  %s2283_s16 = smov 120   ;;  %s2284_s21 = smov 96   ;;  %vm779_vm3 = vcmask 64512   ;;  %v2290_v22 = vmov 0   ;;  %vm1463_vm6 = vcmask 130048  }
  0x34   : > { %2073 = vmatpush3.msra.mxu1 %v692_v1  ;;  %2093 = vmatprep.subr.mxu0 %v2281_v2  ;;  %v2001_v7 = vld [vmem:[%s2709_s29] ss:$0 sm:$0xff]  ;;  %s2285_s27 = smov 80   ;;  %s2286_s23 = smov 88   ;;  %v857_v20 = vshrl.u32 %v856_v18, 7  ;;  %vm1465_vm7 = vcmask 195584  }
  0x35   : > { %2074 = vmatprep.subr.mxu1 %v2281_v2  ;;  %2095 = vmatprep.mubr.msk.f32.mxu0 %vm2282_vm1, %v2281_v2  ;;  %s2287_s0 = smov 72   ;;  %s2288_s26 = smov 112   ;;  %vm1682_vm8 = vcmask 523264  }
  0x36   : > { %2075 = vmatpush3.msra.mxu1 %v691_v3  ;;  %s2289_s18 = smov 104   ;;  %s2710_s19 = sld [smem:[#allocation9_spill]]  ;;  %v858_v21 = vsub.s32 0, %v857_v20 }
  0x37   : > { %2076 = vmatprep.subr.mxu1 %v2281_v2  ;;  %s2711_s13 = sld [smem:[#allocation11_spill]]  ;;  %s2291_s24 = smov 56  }
  0x38   : > { %2077 = vmatpush3.msra.mxu1 %v690_v4  ;;  %v2491_v6 = vld [vmem:[#allocation2] sm:$0xff]  ;;  %s2292_s2 = smov 64   ;;  %s2293_s4 = smov 48  }
  0x39   : > { %2078 = vmatprep.subr.mxu1 %v2281_v2  ;;  %s2294_s29 = smov 40  }
  0x3a   : > { %2079 = vmatpush3.msra.mxu1 %v689_v5 }
  0x3b   : > { %2081 = vmatmul.mubr.msk.f32.vlgmr.msra.gmra.mxu1 %vm700_vm2, %v2491_v6  ;;  %2083 = vmatprep.subr.mxu1 %v2281_v2 }
  0x3c   : > { %2085 = vmatprep.mubr.msk.f32.mxu1 %vm2282_vm1, %v2281_v2 }
  0x3d   : > { %s2712_s14 = scalar_lea.vmem %s2711_s13, %s2710_s19 }
  0x3e   : > { %v774_v19 = vld [vmem:[%s2712_s14] sm:$0x1] }
  0x3f   : > { %vm775_vm4 = vcmp.gt.f32.partialorder %v774_v19, 0.5  ;;  %v1470_v19 = vld [vmem:[%s2432_s22 + $0x18] sm:$0xff] }
  0x40   : > { %v855_v23 = vsel %vm775_vm4, 1, %v2290_v22 }
  0x41   : > { %v859_v24 = vrot.slane %v855_v23, %v858_v21 }
  0x43   : > { %vm860_vm5 = vcmp.eq.s32.totalorder %v859_v24, 1  ;;  %v1469_v24 = vld [vmem:[%s2432_s22 + $0x10] sm:$0xff] }
  0xfb   : > { %v770_v8 = vpop.f32.mrf.mxu1 }
  0xfc   : > { %v2504_v9 = vadd.f32 %v2001_v7, %v770_v8 }
  0xfd   : > { %v2082_v10 = vpop.f32.mrf.mxu1 }
  0xfe   : > { %949 = vrot.lane.b32.xlu1 %v2504_v9, %s2283_s16  ;;  %777 = vrot.lane.b32.xlu0 %v2504_v9, %s2284_s21  ;;  %s2295_s16 = smov 8   ;;  %s2296_s21 = smov 16  }
 0x102   : > { %1118 = vrot.lane.b32.xlu1 %v2504_v9, %s2285_s27  ;;  %951 = vrot.lane.b32.xlu0 %v2504_v9, %s2286_s23  ;;  %s2297_s27 = smov 24  }
 0x106   : > { %1285 = vrot.lane.b32.xlu1 %v2504_v9, %s2287_s0  ;;  %1116 = vrot.lane.b32.xlu0 %v2504_v9, %s2288_s26  ;;  %s2713_s0 = scalar_lea.vmem %s2670_s5, %s2409_s20 }
 0x10a   : > { %1283 = vrot.lane.b32.xlu0 %v2504_v9, %s2289_s18  ;;  %s2714_s18 = scalar_lea.vmem %s2671_s6, %s2409_s20 }
 0x170   : > { %v950_v11 = vpop.permute.xlu1 %949  ;;  %v778_v12 = vpop.permute.xlu0 %777 }
 0x171   : > { %2084 = vmatpush3.xpose.msk.msra.mxu1 %vm779_vm3, %v778_v12 }
 0x172   : > { %2088 = vmatprep.subr.mxu1 %v2281_v2 }
 0x174   : > { %2086 = vmatmul.mubr.msk.f32.vlgmr.msra.gmra.mxu1 %vm779_vm3, %v2504_v9  ;;  %v952_v13 = vpop.permute.xlu0 %951  ;;  %v1119_v14 = vpop.permute.xlu1 %1118 }
 0x175   : > { %2094 = vmatpush3.xpose.msk.msra.mxu0 %vm779_vm3, %v952_v13  ;;  %2090 = vmatprep.mubr.msk.f32.mxu1 %vm2282_vm1, %v2281_v2 }
 0x176   : > { %2103 = vmatprep.subr.mxu0 %v2281_v2 }
 0x178   : > { %2096 = vmatmul.mubr.msk.f32.vlgmr.msra.gmra.mxu0 %vm779_vm3, %v950_v11  ;;  %v1117_v15 = vpop.permute.xlu0 %1116  ;;  %v1286_v16 = vpop.permute.xlu1 %1285 }
 0x179   : > { %2104 = vmatpush3.xpose.msk.msra.mxu0 %vm779_vm3, %v1119_v14  ;;  %2105 = vmatprep.mubr.msk.f32.mxu0 %vm2282_vm1, %v2281_v2 }
 0x17a   : > { %2113 = vmatprep.subr.mxu0 %v2281_v2 }
 0x17c   : > { %2106 = vmatmul.mubr.msk.f32.vlgmr.msra.gmra.mxu0 %vm779_vm3, %v1117_v15  ;;  %v1284_v17 = vpop.permute.xlu0 %1283 }
 0x17d   : > { %2114 = vmatpush3.xpose.msk.msra.mxu0 %vm779_vm3, %v1286_v16  ;;  %2115 = vmatprep.mubr.msk.f32.mxu0 %vm2282_vm1, %v2281_v2 }
 0x17e   : > { %2123 = vmatprep.subr.mxu0 %v2281_v2 }
 0x180   : > { %2116 = vmatmul.mubr.msk.f32.vlgmr.msra.gmra.mxu0 %vm779_vm3, %v1284_v17 }
 0x181   : > { %2131 = vmatprep.mubr.msk.f32.mxu0 %vm2282_vm1, %v2281_v2  ;;  %2124 = vmatpush3.msra.mxu0 %v1470_v19 }
 0x182   : > { %2125 = vmatprep.subr.mxu0 %v2281_v2 }
 0x183   : > { %2126 = vmatpush3.msra.mxu0 %v1469_v24 }
 0x184   : > { %2127 = vmatprep.subr.mxu0 %v2281_v2 }
 0x234   : > { %v850_v25 = vpop.f32.mrf.mxu1 }
 0x235   : > { %v854_v26 = vmul.f32 0.35355338, %v850_v25  ;;  %v1468_v25 = vld [vmem:[%s2432_s22 + $0x8] sm:$0xff] }
 0x236   : > { %v2087_v27 = vpop.f32.mrf.mxu1  ;;  %2128 = vmatpush3.msra.mxu0 %v1468_v25  ;;  %v2023_v25 = vld [vmem:[%s673_s30] ss:$0 sm:$0xff] }
 0x237   : > { %v861_v28 = vsel %vm860_vm5, %v854_v26, -1e+09  ;;  %2129 = vmatprep.subr.mxu0 %v2281_v2  ;;  %v1467_v26 = vld [vmem:[%s2432_s22] sm:$0xff]  ;;  %s2719_s22 = sld [smem:[#allocation3_spill]] }
 0x238   : > { %v1023_v29 = vpop.f32.mrf.mxu0  ;;  %v862_v30 = vsel %vm779_vm3, %v861_v28, -inf  ;;  %2130 = vmatpush3.msra.mxu0 %v1467_v26 }
 0x239   : > { %v1027_v31 = vmul.f32 0.35355338, %v1023_v29  ;;  %863 = vmax.xlane.f32.xlu1 %v862_v30  ;;  %2145 = vmatprep.subr.mxu0 %v2281_v2 }
 0x23a   : > { %v2097_v32 = vpop.f32.mrf.mxu0 }
 0x23b   : > { %v1028_v33 = vsel %vm860_vm5, %v1027_v31, -1e+09 }
 0x23c   : > { %v1190_v34 = vpop.f32.mrf.mxu0  ;;  %v1029_v35 = vsel %vm779_vm3, %v1028_v33, -inf }
 0x23d   : > { %v1194_v36 = vmul.f32 0.35355338, %v1190_v34  ;;  %1030 = vmax.xlane.f32.xlu0 %v1029_v35  ;;  %p2025_p8 = scmp.ne.s32.totalorder %s2719_s22, 1 }
 0x23e   : > { %v2107_v37 = vpop.f32.mrf.mxu0 }
 0x23f   : > { %v1195_v38 = vsel %vm860_vm5, %v1194_v36, -1e+09  ;;  %v2015_v37 = vld [vmem:[%s2713_s0] ss:$0 sm:$0xff] }
 0x240   : > { %v1357_v39 = vpop.f32.mrf.mxu0  ;;  %v1196_v40 = vsel %vm779_vm3, %v1195_v38, -inf }
 0x241   : > { %v1361_v41 = vmul.f32 0.35355338, %v1357_v39  ;;  %1197 = vmax.xlane.f32.xlu0 %v1196_v40 }
 0x242   : > { %v2117_v42 = vpop.f32.mrf.mxu0 }
 0x243   : > { %v1362_v43 = vsel %vm860_vm5, %v1361_v41, -1e+09 }
 0x244   : > { %v1363_v44 = vsel %vm779_vm3, %v1362_v43, -inf }
 0x245   : > { %1364 = vmax.xlane.f32.xlu1 %v1363_v44 }
 0x256   : > { %1040 = vrot.lane.b32.xlu1 %v2504_v9, %s2291_s24  ;;  %s2716_s24 = sld [smem:[#allocation15_spill]] }
 0x2c2   : > { %v864_v45 = vpop.xlane.xlu1 %863 }
 0x2c3   : > { %v865_v46 = vsub.f32 %v861_v28, %v864_v45 }
 0x2c5   : > { %v866_v47 = vmul.f32 1.442695, %v865_v46 }
 0x2c6   : > { %v1031_v48 = vpop.xlane.xlu0 %1030 }
 0x2c7   : > { %2221 = vpow2.f32 %v866_v47  ;;  %v1032_v49 = vsub.f32 %v1028_v33, %v1031_v48  ;;  %v1585_v48 = vld [vmem:[%s2449_s17 + $0x18] sm:$0xff] }
 0x2c9   : > { %v1033_v50 = vmul.f32 1.442695, %v1032_v49  ;;  %v1584_v49 = vld [vmem:[%s2449_s17 + $0x10] sm:$0xff] }
 0x2ca   : > { %v1198_v60 = vpop.xlane.xlu0 %1197 }
 0x2cb   : > { %2223 = vpow2.f32 %v1033_v50  ;;  %v1199_v61 = vsub.f32 %v1195_v38, %v1198_v60  ;;  %v1582_v50 = vld [vmem:[%s2449_s17] sm:$0xff] }
 0x2cc   : > { %v2017_v60 = vld [vmem:[%s2714_s18] ss:$0 sm:$0xff] }
 0x2cd   : > { %v1200_v62 = vmul.f32 1.442695, %v1199_v61 }
 0x2ce   : > { %v1365_v51 = vpop.xlane.xlu1 %1364 }
 0x2cf   : > { %v1366_v52 = vsub.f32 %v1362_v43, %v1365_v51  ;;  %v1674_v51 = vld [vmem:[%s2463_s1 + $0x38] sm:$0xff] }
 0x2d1   : > { %v1367_v53 = vmul.f32 1.442695, %v1366_v52  ;;  %v1673_v52 = vld [vmem:[%s2463_s1 + $0x30] sm:$0xff] }
 0x2d2   : > { %v1041_v1 = vpop.permute.xlu1 %1040 }
 0x2d3   : > { %2225 = vpow2.f32 %v1367_v53  ;;  %v1672_v53 = vld [vmem:[%s2463_s1 + $0x28] sm:$0xff] }
 0x2d4   : > { %v2222_v54 = vpop.eup %2221  ;;  %2227 = vpow2.f32 %v1200_v62  ;;  %v2018_v62 = vld [vmem:[%s2715_s15] ss:$0 sm:$0xff] }
 0x2d5   : > { %v868_v55 = vsel %vm779_vm3, %v2222_v54, 0.0 }
 0x2d6   : > { %869 = vadd.xlane.f32.xlu0 %v868_v55  ;;  %v1670_v55 = vld [vmem:[%s2463_s1 + $0x18] sm:$0xff] }
 0x2d8   : > { %v2224_v56 = vpop.eup %2223 }
 0x2d9   : > { %v1035_v57 = vsel %vm779_vm3, %v2224_v56, 0.0 }
 0x2da   : > { %1036 = vadd.xlane.f32.xlu1 %v1035_v57 }
 0x2e0   : > { %v2226_v58 = vpop.eup %2225 }
 0x2e1   : > { %v1369_v59 = vsel %vm779_vm3, %v2226_v58, 0.0  ;;  %v2228_v63 = vpop.eup %2227 }
 0x2e2   : > { %1370 = vadd.xlane.f32.xlu1 %v1369_v59  ;;  %v1202_v0 = vsel %vm779_vm3, %v2228_v63, 0.0 }
 0x2ec   : > { %873 = vrot.lane.b32.xlu0 %v2504_v9, %s2292_s2  ;;  %s2717_s2 = scalar_lea.vmem %s2716_s24, %s2409_s20 }
 0x2f3   : > { %1207 = vrot.lane.b32.xlu1 %v2504_v9, %s2293_s4 }
 0x30b   : > { %1203 = vadd.xlane.f32.xlu0 %v1202_v0 }
 0x321   : > { %1374 = vrot.lane.b32.xlu0 %v2504_v9, %s2294_s29 }
 0x35f   : > { %v870_v3 = vpop.xlane.xlu0 %869 }
 0x360   : > { %2229 = vrcp.f32 %v870_v3  ;;  %v1668_v3 = vld [vmem:[%s2463_s1 + $0x8] sm:$0xff] }
 0x363   : > { %v874_v4 = vpop.permute.xlu0 %873  ;;  %v1037_v5 = vpop.xlane.xlu1 %1036 }
 0x364   : > { %2231 = vrcp.f32 %v1037_v5  ;;  %2089 = vmatpush3.msra.mxu1 %v874_v4  ;;  %v1667_v4 = vld [vmem:[%s2463_s1] sm:$0xff] }
 0x365   : > { %2098 = vmatprep.subr.mxu1 %v2281_v2  ;;  %v2019_v5 = vld [vmem:[%s2717_s2] ss:$0 sm:$0xff] }
 0x36b   : > { %v1371_v8 = vpop.xlane.xlu1 %1370 }
 0x36d   : > { %v2230_v7 = vpop.eup %2229 }
 0x36e   : > { %v872_v10 = vmul.f32 %v2230_v7, %v2222_v54  ;;  %v1671_v54 = vld [vmem:[%s2463_s1 + $0x20] sm:$0xff] }
 0x36f   : > { %v1208_v12 = vpop.permute.xlu1 %1207 }
 0x370   : > { %2091 = vmatmul.mubr.msk.f32.vlgmr.msra.gmra.mxu1 %vm779_vm3, %v872_v10 }
 0x371   : > { %v2232_v11 = vpop.eup %2231  ;;  %2099 = vmatpush3.msra.mxu1 %v1041_v1  ;;  %2100 = vmatprep.mubr.msk.f32.mxu1 %vm2282_vm1, %v2281_v2  ;;  %v1669_v1 = vld [vmem:[%s2463_s1 + $0x10] sm:$0xff] }
 0x372   : > { %2108 = vmatprep.subr.mxu1 %v2281_v2  ;;  %v1039_v9 = vmul.f32 %v2232_v11, %v2224_v56 }
 0x374   : > { %2101 = vmatmul.mubr.msk.f32.vlgmr.msra.gmra.mxu1 %vm779_vm3, %v1039_v9  ;;  %v2021_v9 = vld [vmem:[%s670_s25] ss:$0 sm:$0xff] }
 0x375   : > { %2109 = vmatpush3.msra.mxu1 %v1208_v12  ;;  %2110 = vmatprep.mubr.msk.f32.mxu1 %vm2282_vm1, %v2281_v2 }
 0x376   : > { %2118 = vmatprep.subr.mxu1 %v2281_v2 }
 0x394   : > { %v1204_v13 = vpop.xlane.xlu0 %1203 }
 0x395   : > { %2233 = vrcp.f32 %v1204_v13 }
 0x396   : > { %2235 = vrcp.f32 %v1371_v8 }
 0x398   : > { %v1375_v17 = vpop.permute.xlu0 %1374 }
 0x3a2   : > { %v2234_v14 = vpop.eup %2233 }
 0x3a3   : > { %v1206_v15 = vmul.f32 %v2234_v14, %v2228_v63  ;;  %v2236_v16 = vpop.eup %2235 }
 0x3a4   : > { %v1373_v18 = vmul.f32 %v2236_v16, %v2226_v58 }
 0x3a5   : > { %2111 = vmatmul.mubr.msk.f32.vlgmr.msra.gmra.mxu1 %vm779_vm3, %v1206_v15 }
 0x3a6   : > { %2119 = vmatpush3.msra.mxu1 %v1375_v17  ;;  %2120 = vmatprep.mubr.msk.f32.mxu1 %vm2282_vm1, %v2281_v2 }
 0x3a7   : > { %2134 = vmatprep.subr.mxu1 %v2281_v2 }
 0x3a9   : > { %2121 = vmatmul.mubr.msk.f32.vlgmr.msra.gmra.mxu1 %vm779_vm3, %v1373_v18 }
 0x3aa   : > { %2142 = vmatprep.mubr.msk.f32.mxu1 %vm2282_vm1, %v2281_v2  ;;  %2135 = vmatpush3.msra.mxu1 %v1585_v48 }
 0x3ab   : > { %2136 = vmatprep.subr.mxu1 %v2281_v2 }
 0x3ac   : > { %2137 = vmatpush3.msra.mxu1 %v1584_v49 }
 0x3ad   : > { %2138 = vmatprep.subr.mxu1 %v2281_v2 }
 0x430   : > { %v945_v20 = vpop.f32.mrf.mxu1 }
 0x432   : > { %v2092_v21 = vpop.f32.mrf.mxu1 }
 0x434   : > { %v1112_v22 = vpop.f32.mrf.mxu1 }
 0x435   : > { %1451 = vrot.lane.b32.xlu1 %v1112_v22, %s2295_s16 }
 0x436   : > { %v2102_v23 = vpop.f32.mrf.mxu1 }
 0x465   : > { %v1279_v27 = vpop.f32.mrf.mxu1 }
 0x466   : > { %1455 = vrot.lane.b32.xlu0 %v1279_v27, %s2296_s21  ;;  %v2024_v27 = vld [vmem:[%s676_s8] ss:$0 sm:$0xff] }
 0x467   : > { %v2112_v28 = vpop.f32.mrf.mxu1 }
 0x469   : > { %v1446_v29 = vpop.f32.mrf.mxu1 }
 0x46a   : > { %1459 = vrot.lane.b32.xlu1 %v1446_v29, %s2297_s27 }
 0x46b   : > { %v2122_v30 = vpop.f32.mrf.mxu1 }
 0x4a7   : > { %v1452_v31 = vpop.permute.xlu1 %1451 }
 0x4a8   : > { %v1462_v33 = vsel %vm779_vm3, %v945_v20, %v1452_v31 }
 0x4d8   : > { %v1456_v32 = vpop.permute.xlu0 %1455 }
 0x4d9   : > { %v1464_v34 = vsel %vm1463_vm6, %v1462_v33, %v1456_v32 }
 0x4dc   : > { %v1460_v35 = vpop.permute.xlu1 %1459 }
 0x4dd   : > { %v1466_v36 = vsel %vm1465_vm7, %v1464_v34, %v1460_v35 }
 0x4de   : > { %2132 = vmatmul.mubr.msk.f32.vlgmr.msra.gmra.mxu0 %vm700_vm2, %v1466_v36 }
 0x4df   : > { %2161 = vmatprep.mubr.msk.f32.mxu0 %vm2282_vm1, %v2281_v2  ;;  %2146 = vmatpush3.msra.mxu0 %v1674_v51 }
 0x4e0   : > { %2147 = vmatprep.subr.mxu0 %v2281_v2 }
 0x4e1   : > { %2148 = vmatpush3.msra.mxu0 %v1673_v52 }
 0x4e2   : > { %2149 = vmatprep.subr.mxu0 %v2281_v2 }
 0x4e3   : > { %2150 = vmatpush3.msra.mxu0 %v1672_v53 }
 0x4e4   : > { %2151 = vmatprep.subr.mxu0 %v2281_v2 }
 0x4e5   : > { %2152 = vmatpush3.msra.mxu0 %v1671_v54 }
 0x4e6   : > { %2153 = vmatprep.subr.mxu0 %v2281_v2 }
 0x4e7   : > { %2154 = vmatpush3.msra.mxu0 %v1670_v55 }
 0x4e8   : > { %2155 = vmatprep.subr.mxu0 %v2281_v2 }
 0x4e9   : > { %2156 = vmatpush3.msra.mxu0 %v1669_v1 }
 0x4ea   : > { %2157 = vmatprep.subr.mxu0 %v2281_v2 }
 0x4eb   : > { %2158 = vmatpush3.msra.mxu0 %v1668_v3 }
 0x4ec   : > { %2159 = vmatprep.subr.mxu0 %v2281_v2 }
 0x4ed   : > { %2160 = vmatpush3.msra.mxu0 %v1667_v4 }
 0x59e   : > { %v1547_v38 = vpop.f32.mrf.mxu0 }
 0x59f   : > { %v1548_v39 = vadd.f32 %v2015_v37, %v1547_v38 }
 0x5a0   : > { %v2133_v40 = vpop.f32.mrf.mxu0 }
 0x5a1   : > { %v1553_v41 = vadd.f32 %v1548_v39, %v2491_v6  ;;  %v1583_v6 = vld [vmem:[%s2449_s17 + $0x8] sm:$0xff] }
 0x5a2   : > { %2139 = vmatpush3.msra.mxu1 %v1583_v6 }
 0x5a3   : > { %v1554_v42 = vsel %vm700_vm2, %v1553_v41, 0.0  ;;  %2140 = vmatprep.subr.mxu1 %v2281_v2 }
 0x5a4   : > { %1555 = vadd.xlane.f32.xlu0 %v1554_v42  ;;  %2141 = vmatpush3.msra.mxu1 %v1582_v50 }
 0x62d   : > { %v1556_v43 = vpop.xlane.xlu0 %1555 }
 0x62e   : > { %v1558_v44 = vmul.f32 0.03125, %v1556_v43 }
 0x630   : > { %v1559_v45 = vsub.f32 %v1553_v41, %v1558_v44 }
 0x632   : > { %v1560_v46 = vmul.f32 %v1559_v45, %v1559_v45 }
 0x634   : > { %v1561_v47 = vsel %vm700_vm2, %v1560_v46, 0.0 }
 0x635   : > { %1562 = vadd.xlane.f32.xlu1 %v1561_v47 }
 0x6be   : > { %v1563_v56 = vpop.xlane.xlu1 %1562 }
 0x6bf   : > { %v1564_v57 = vmul.f32 0.03125, %v1563_v56 }
 0x6c1   : > { %v1565_v58 = vadd.f32 1e-05, %v1564_v57 }
 0x6c3   : > { %2237 = vrsqrt.f32 %v1565_v58 }
 0x6d0   : > { %v2238_v59 = vpop.eup %2237 }
 0x6d1   : > { %v1567_v61 = vmul.f32 %v2238_v59, %v1559_v45 }
 0x6d3   : > { %v1574_v63 = vmul.f32 %v2017_v60, %v1567_v61 }
 0x6d5   : > { %v1581_v0 = vadd.f32 %v2018_v62, %v1574_v63 }
 0x6d7   : > { %2143 = vmatmul.mubr.msk.f32.vlgmr.msra.gmra.mxu1 %vm700_vm2, %v1581_v0 }
 0x797   : > { %v1662_v7 = vpop.f32.mrf.mxu1 }
 0x798   : > { %v1663_v8 = vadd.f32 %v2019_v5, %v1662_v7 }
 0x799   : > { %v2144_v10 = vpop.f32.mrf.mxu1 }
 0x79a   : > { %v1666_v11 = vmax.f32 %v1663_v8, 0.0 }
 0x79c   : > { %2162 = vmatmul.mubr.msk.f32.vlgmr.msra.gmra.mxu0 %vm1682_vm8, %v1666_v11 }
 0x85c   : > { %v1752_v12 = vpop.f32.mrf.mxu0 }
 0x85d   : > { %v1753_v13 = vadd.f32 %v2021_v9, %v1752_v12 }
 0x85e   : > { %v2163_v2 = vpop.f32.mrf.mxu0 }
 0x85f   : > { %v1758_v14 = vadd.f32 %v1753_v13, %v1581_v0 }
 0x861   : > { %v1759_v15 = vsel %vm700_vm2, %v1758_v14, 0.0 }
 0x862   : > { %1760 = vadd.xlane.f32.xlu0 %v1759_v15 }
 0x8eb   : > { %v1761_v16 = vpop.xlane.xlu0 %1760 }
 0x8ec   : > { %v1762_v17 = vmul.f32 0.03125, %v1761_v16 }
 0x8ee   : > { %v1763_v18 = vsub.f32 %v1758_v14, %v1762_v17 }
 0x8f0   : > { %v1764_v19 = vmul.f32 %v1763_v18, %v1763_v18 }
 0x8f2   : > { %v1765_v20 = vsel %vm700_vm2, %v1764_v19, 0.0 }
 0x8f3   : > { %1766 = vadd.xlane.f32.xlu0 %v1765_v20 }
 0x97c   : > { %v1767_v21 = vpop.xlane.xlu0 %1766 }
 0x97d   : > { %v1768_v22 = vmul.f32 0.03125, %v1767_v21 }
 0x97f   : > { %v1769_v23 = vadd.f32 1e-05, %v1768_v22 }
 0x981   : > { %2239 = vrsqrt.f32 %v1769_v23 }
 0x98e   : > { %v2240_v24 = vpop.eup %2239 }
 0x98f   : > { %v1771_v26 = vmul.f32 %v2240_v24, %v1763_v18 }
 0x991   : > { %v1778_v28 = vmul.f32 %v2023_v25, %v1771_v26  ;;  %1790 = sbr.rel (%p2025_p8) target bundleno = 2455 (0x997), region = 84 }
 0x993   : > { %v1785_v29 = vadd.f32 %v2024_v27, %v1778_v28 }
 0x995   : > { %1786 = vst.msk [vmem:[#allocation2] sm:$0xff] %vm700_vm2, %v1785_v29 }
 0x996   : > { %1791 = vst.msk [vmem:[%s2476_s9] sm:$0xff] %vm700_vm2, %v1785_v29 }
 0x997 PF: > { %s2720_s23 = sld [smem:[#allocation6_spill]] }
 0x998   : > { %s2721_s29 = sld [smem:[#allocation4_spill]] }
 0x999   : > { %s2722_s30 = sld [smem:[#allocation5_spill]] }
 0x99a   : > { %s2723_s15 = sld [smem:[#allocation7_spill]] }
 0x99b   : > { %s2724_s16 = sld [smem:[#allocation8_spill]] }
 0x99d   : > { %s24_s17 = sadd.s32 1, %s2720_s23  }
 0x99e   : > { %p21_p9 = scmp.ge.s32.totalorder %s24_s17, 6  }
 0x9a0   :  { %23 = sbr.rel (!%p21_p9) target bundleno = 9 (0x9), region = 153 }

// kernel: transformer_forward.3
= control target key start
LH: loop header
LB: loop body
LE: loop exit
PB: predicated region body
PF: predicated region fallthrough
CT: control target
= control target key end

     0   :  { %s4965_s0 = inlined_call_operand.vmem [shape: f32[2,8,32], index: 0, kind: input, shape index: {}]   ;;  %s4966_s1 = inlined_call_operand.vmem [shape: f32[2,8,32], index: 1, kind: input, shape index: {}]   ;;  %s4967_s2 = inlined_call_operand.vmem [shape: f32[2,1,8], index: 2, kind: input, shape index: {}]   ;;  %s4968_s3 = inlined_call_operand.vmem [shape: f32[2,1,8], index: 3, kind: input, shape index: {}]   ;;  %s4969_s4 = inlined_call_operand.vmem [shape: f32[2,32,96], index: 4, kind: input, shape index: {}]   ;;  %s4970_s5 = inlined_call_operand.vmem [shape: f32[2,1,96], index: 5, kind: input, shape index: {}]   ;;  %s4971_s6 = inlined_call_operand.vmem [shape: f32[2,32,32], index: 6, kind: input, shape index: {}]   ;;  %s4972_s7 = inlined_call_operand.vmem [shape: f32[2,1,32], index: 7, kind: input, shape index: {}]   ;;  %s4973_s8 = inlined_call_operand.vmem [shape: f32[2,1,32], index: 8, kind: input, shape index: {}]   ;;  %s4974_s9 = inlined_call_operand.vmem [shape: f32[2,1,32], index: 9, kind: input, shape index: {}]   ;;  %s4975_s10 = inlined_call_operand.vmem [shape: f32[2,32,32], index: 10, kind: input, shape index: {}]   ;;  %s4976_s11 = inlined_call_operand.vmem [shape: f32[2,1,32], index: 11, kind: input, shape index: {}]   ;;  %s4977_s12 = inlined_call_operand.vmem [shape: f32[2,32,64], index: 12, kind: input, shape index: {}]   ;;  %s4978_s13 = inlined_call_operand.vmem [shape: f32[2,1,64], index: 13, kind: input, shape index: {}]   ;;  %s4979_s14 = inlined_call_operand.vmem [shape: f32[2,32,32], index: 14, kind: input, shape index: {}]   ;;  %s4980_s15 = inlined_call_operand.vmem [shape: f32[2,1,32], index: 15, kind: input, shape index: {}]   ;;  %s4981_s16 = inlined_call_operand.vmem [shape: f32[2,1,32], index: 16, kind: input, shape index: {}]   ;;  %s4982_s17 = inlined_call_operand.vmem [shape: f32[2,1,32], index: 17, kind: input, shape index: {}]   ;;  %s4983_s18 = inlined_call_operand.vmem [shape: f32[2,32,64], index: 18, kind: input, shape index: {}]   ;;  %s4984_s19 = inlined_call_operand.vmem [shape: f32[2,1,64], index: 19, kind: input, shape index: {}]   ;;  %s4985_s20 = inlined_call_operand.vmem [shape: f32[2,64,32], index: 20, kind: input, shape index: {}]   ;;  %s4986_s21 = inlined_call_operand.vmem [shape: f32[2,1,32], index: 21, kind: input, shape index: {}]   ;;  %s4987_s22 = inlined_call_operand.vmem [shape: f32[2,1,32], index: 22, kind: input, shape index: {}]   ;;  %s4988_s23 = inlined_call_operand.vmem [shape: f32[2,1,32], index: 23, kind: input, shape index: {}]   ;;  %s4989_s24 = inlined_call_operand.vmem [shape: f32[32,64], index: 24, kind: input, shape index: {}]   ;;  %s4990_s25 = inlined_call_operand.vmem [shape: f32[1,64], index: 25, kind: input, shape index: {}]   ;;  %s4991_s26 = inlined_call_operand.hbm [shape: f32[2,8,64], index: 26, kind: output, shape index: {}]  }
   0x1   :  { %5012 = sst [smem:[#allocation23_spill]] %s4965_s0 }
   0x2   :  { %5013 = sst [smem:[#allocation24_spill]] %s4966_s1 }
   0x3   :  { %5014 = sst [smem:[#allocation25_spill]] %s4967_s2 }
   0x4   :  { %5015 = sst [smem:[#allocation26_spill]] %s4968_s3 }
   0x5   :  { %5016 = sst [smem:[#allocation27_spill]] %s4969_s4 }
   0x6   :  { %5017 = sst [smem:[#allocation28_spill]] %s4970_s5 }
   0x7   :  { %5018 = sst [smem:[#allocation29_spill]] %s4971_s6 }
   0x8   :  { %5019 = sst [smem:[#allocation30_spill]] %s4972_s7 }
   0x9   :  { %5020 = sst [smem:[#allocation31_spill]] %s4973_s8 }
   0xa   :  { %5021 = sst [smem:[#allocation32_spill]] %s4974_s9 }
   0xb   :  { %5022 = sst [smem:[#allocation33_spill]] %s4975_s10 }
   0xc   :  { %5023 = sst [smem:[#allocation34_spill]] %s4977_s12 }
   0xd   :  { %5024 = sst [smem:[#allocation35_spill]] %s4979_s14 }
   0xe   :  { %5025 = sst [smem:[#allocation36_spill]] %s4981_s16 }
   0xf   :  { %5026 = sst [smem:[#allocation37_spill]] %s4982_s17 }
  0x10   :  { %5027 = sst [smem:[#allocation38_spill]] %s4983_s18 }
  0x11   :  { %5028 = sst [smem:[#allocation39_spill]] %s4985_s20 }
  0x12   :  { %5029 = sst [smem:[#allocation40_spill]] %s4986_s21 }
  0x13   :  { %5030 = sst [smem:[#allocation41_spill]] %s4987_s22 }
  0x14   :  { %5031 = sst [smem:[#allocation42_spill]] %s4988_s23 }
  0x15   :  { %5032 = sst [smem:[#allocation43_spill]] %s4989_s24 }
  0x16   :  { %5033 = sst [smem:[#allocation44_spill]] %s4990_s25 }
  0x17   :  { %5034 = sst [smem:[#allocation45_spill]] %s4991_s26 }
  0x18   :  { %31 = vsyncpa [#allocation4], 0 }
  0x19   :  { %33 = vsyncpa [#allocation4 + $0x1], 0  ;;  %s4364_s27 = smov 0   ;;  %s4366_s3 = smov 0  }
  0x1a   :  { %s4368_s7 = smov 0   ;;  %s4370_s28 = smov 0  }
  0x1b   :  { %s4372_s8 = smov 0   ;;  %s4374_s4 = smov 0  }
  0x1c   :  { %s4376_s29 = smov 0   ;;  %s4378_s0 = smov 0  }
  0x1d LB: > { %5035 = sst [smem:[#allocation6_spill]] %s4179_s27  ;;  %s3654_s9 = sadd.s32 4294967295, %s4207_s0   ;;  %s4207_s0 = sphi %s4378_s0, %s39_s0   ;;  %s4203_s29 = sphi %s4376_s29, %s5124_s29   ;;  %s4199_s4 = sphi %s4374_s4, %s5123_s4   ;;  %s4195_s8 = sphi %s4372_s8, %s5122_s8   ;;  %s4191_s28 = sphi %s4370_s28, %s5121_s28   ;;  %s4187_s7 = sphi %s4368_s7, %s5120_s7   ;;  %s4183_s3 = sphi %s4366_s3, %s5119_s3   ;;  %s4179_s27 = sphi %s4364_s27, %s5118_s27  }
  0x1e   : > { %5036 = sst [smem:[#allocation7_spill]] %s4183_s3  ;;  %s3655_s30 = sadd.s32 4294967294, %s4207_s0  }
  0x1f   : > { %5037 = sst [smem:[#allocation8_spill]] %s4187_s7  ;;  %s48_s2 = sadd.s32 1, %s4199_s4 }
  0x20   : > { %5038 = sst [smem:[#allocation9_spill]] %s4191_s28  ;;  %p49_p0 = scmp.ge.s32.totalorder %s48_s2, 2 }
  0x21   : > { %5039 = sst [smem:[#allocation10_spill]] %s4195_s8  ;;  %s51_s5 = sadd.s32 1, %s4203_s29 }
  0x22   : > { %5040 = sst [smem:[#allocation11_spill]] %s4199_s4  ;;  %p734_p1 = scmp.ne.s32.totalorder %s4187_s7, %s4183_s3 }
  0x23   : > { %5041 = sst [smem:[#allocation12_spill]] %s4203_s29  ;;  %p735_p2 = scmp.eq.s32.totalorder %s3654_s9, 3 }
  0x24   : > { %5042 = sst [smem:[#allocation13_spill]] %s4207_s0  ;;  %s5126_s2 = smov (%p49_p0, %s48_s2), 0 }
  0x25   : > { %5043 = sst [smem:[#allocation14_spill]] %s5126_s2  ;;  %s5128_s5 = smov (!%p49_p0, %s51_s5), %s4203_s29 }
  0x26   : > { %p4413_p3 = por %p735_p2, %p734_p1  ;;  %p740_p4 = scmp.ne.s32.totalorder %s4183_s3, %s4179_s27 }
  0x27   : > { %p53_p5 = scmp.ge.s32.totalorder %s5128_s5, 2  ;;  %p741_p6 = scmp.eq.s32.totalorder %s3655_s30, 3 }
  0x28   : > { %s5044_s10 = scalar_select %p4413_p3, 1, 0 }
  0x29   : > { %p3658_p7 = scmp.ge.s32.totalorder %s4207_s0, 1  ;;  %p925_p8 = scmp.lt.s32.totalorder %s4207_s0, 5 }
  0x2a   : > { %5045 = sst [smem:[#allocation15_spill]] %s5044_s10  ;;  %s5130_s5 = smov (%p53_p5, %s5128_s5), 0 }
  0x2b   : > { %5046 = sst [smem:[#allocation16_spill]] %s5130_s5  ;;  %p4423_p9 = por %p741_p6, %p740_p4 }
  0x2c   : > { %p926_p10 = pnand %p3658_p7, %p925_p8  ;;  %s721_s1 = ssub.s32 %s4203_s29, %s5130_s5 }
  0x2d   : > { %s5047_s6 = scalar_select %p4423_p9, 1, 0 }
  0x2e   : > { %s724_s9 = sadd.s32 1, %s4187_s7  ;;  %p722_p11 = scmp.eq.s32.totalorder %s721_s1, 0 }
  0x2f   : > { %5048 = sst [smem:[#allocation17_spill]] %s5047_s6  ;;  %929 = sbr.rel (%p926_p10) target bundleno = 4366 (0x110e), region = 124 }
  0x30   : > { %s4431_s2 = scalar_select %p722_p11, %s4187_s7, %s724_s9  }
  0x32   : > { %5049 = sst [smem:[#allocation18_spill]] %s4431_s2 }
  0x34   : > { %s4996_s30 = sand.u32 1, %s4183_s3   ;;  %p1078_p12 = scmp.lt.s32.totalorder %s4195_s8, 1 }
  0x35   : > { %s4437_s4 = sshll.u32 %s4996_s30, 3  ;;  %p1092_p13 = scmp.lt.s32.totalorder %s4191_s28, 1 }
  0x36   : > { %s4441_s6 = scalar_select %p1078_p12, %s4195_s8, 1 }
  0x37   : > { %s4444_s1 = scalar_select %p1092_p13, %s4191_s28, 1 }
  0x38   : > { %5050 = sst [smem:[#allocation19_spill]] %s4441_s6  ;;  %s3660_s9 = sshll.u32 %s4441_s6, 3 }
  0x39   : > { %s5052_s0 = sld [smem:[#allocation23_spill]]  ;;  %s3728_s20 = sshll.u32 %s4444_s1, 5 }
  0x3a   : > { %s5053_s8 = sld [smem:[#allocation24_spill]]  ;;  %s1151_s6 = scalar_lea.vmem %s4984_s19, %s4444_s1 }
  0x3b   : > { %s5056_s5 = sld [smem:[#allocation27_spill]] }
  0x3c   : > { %s5064_s10 = sld [smem:[#allocation33_spill]] }
  0x3d   : > { %s5065_s12 = sld [smem:[#allocation34_spill]] }
  0x3e   : > { %s5066_s14 = sld [smem:[#allocation35_spill]] }
  0x3f   : > { %s1081_s26 = scalar_lea.vmem %s5052_s0, %s3660_s9  ;;  %s5069_s18 = sld [smem:[#allocation38_spill]] }
  0x40   : > { %s4457_s25 = scalar_lea.vmem %s5053_s8, %s3660_s9  ;;  %s5059_s9 = sld [smem:[#allocation29_spill]] }
  0x41   : > { %5054 = sst [smem:[#allocation20_spill]] %s4457_s25  ;;  %s4467_s30 = scalar_lea.vmem %s5056_s5, %s3728_s20 }
  0x42   : > { %5057 = sst [smem:[#allocation21_spill]] %s4467_s30  ;;  %s4493_s8 = scalar_lea.vmem %s5064_s10, %s3728_s20 }
  0x43   : > { %s4502_s25 = scalar_lea.vmem %s5065_s12, %s3728_s20  ;;  %s3734_s12 = sshll.u32 %s4444_s1, 6 }
  0x44   : > { %s4511_s3 = scalar_lea.vmem %s5066_s14, %s3728_s20  ;;  %s5070_s7 = sld [smem:[#allocation40_spill]] }
  0x45   : > { %s4528_s29 = scalar_lea.vmem %s5069_s18, %s3728_s20  ;;  %s5071_s24 = sld [smem:[#allocation39_spill]] }
  0x46   : > { %s4476_s2 = scalar_lea.vmem %s5059_s9, %s3728_s20  ;;  %s5074_s27 = sld [smem:[#allocation9_spill]] }
  0x47   : > { %5060 = sst [smem:[#allocation22_spill]] %s4476_s2 }
  0x4a   : > { %s1159_s14 = scalar_lea.vmem %s5070_s7, %s4444_s1 }
  0x4b   : > { %s4542_s16 = scalar_lea.vmem %s5071_s24, %s3734_s12 }
  0x4c   : > { %p3676_p0 = scmp.ne.s32.totalorder %s5074_s27, 0 }
  0x4e   : > { %1169 = sbr.rel (%p3676_p0) target bundleno = 85 (0x55), region = 128 }
  0x53   : > { %v1170_v0 = vld [vmem:[%s1081_s26] sm:$0xff]  ;;  %vm1171_vm0 = vcmask 261120  }
  0x54   : > { %1172 = vst.msk [vmem:[#allocation2] sm:$0xff] %vm1171_vm0, %v1170_v0 }
  0x55 PF: > { %s5075_s7 = sld [smem:[#allocation21_spill]]  ;;  %v4209_v2 = vmov 0.0   ;;  %vm4210_vm1 = vmmov 0   ;;  %vm1186_vm2 = vcmask 261120   ;;  %s4211_s24 = smov 120   ;;  %vm1277_vm3 = vcmask 64512  }
  0x56   : > { %3811 = vmatprep.subr.mxu1 %v4209_v2  ;;  %3819 = vmatprep.mubr.msk.f32.mxu1 %vm4210_vm1, %v4209_v2  ;;  %s5076_s26 = sld [smem:[#allocation28_spill]]  ;;  %s4212_s0 = smov 96   ;;  %v1260_v18 = vlaneseq  ;;  %v4218_v22 = vmov 0   ;;  %vm1955_vm8 = vcmask 130048   ;;  %vm1957_vm9 = vcmask 195584  }
  0x57   : > { %3832 = vmatprep.subr.mxu0 %v4209_v2  ;;  %3834 = vmatprep.mubr.msk.f32.mxu0 %vm4210_vm1, %v4209_v2  ;;  %s4213_s10 = smov 80   ;;  %s4214_s2 = smov 88   ;;  %vm3145_vm12 = vcmask 523264  }
  0x58   : > { %s4215_s9 = smov 72   ;;  %s4216_s23 = smov 112   ;;  %v4621_v20 = vshrl.u32 %v1260_v18, 7  ;;  %v1263_v24 = vand.u32 127, %v1260_v18 }
  0x59   : > { %s4217_s28 = smov 104   ;;  %s5078_s20 = sld [smem:[#allocation19_spill]] }
  0x5a   : > { %v1270_v21 = vsub.s32 0, %v4621_v20  ;;  %vm1264_vm5 = vcmp.ge.s32.totalorder %v4621_v20, %v1263_v24  ;;  %s4219_s18 = smov 56   ;;  %s4222_s21 = smov 40  }
  0x5b   : > { %v1178_v1 = vld [vmem:[%s5075_s7 + $0x18] sm:$0xff]  ;;  %v1177_v3 = vld [vmem:[%s5075_s7 + $0x10] sm:$0xff]  ;;  %v1176_v4 = vld [vmem:[%s5075_s7 + $0x8] sm:$0xff]  ;;  %s5083_s27 = sld [smem:[#allocation22_spill]] }
  0x5c   : > { %3812 = vmatpush3.msra.mxu1 %v1178_v1  ;;  %v1175_v5 = vld [vmem:[%s5075_s7] sm:$0xff]  ;;  %s5077_s5 = scalar_lea.vmem %s5076_s26, %s4444_s1  ;;  %s5079_s7 = sld [smem:[#allocation26_spill]] }
  0x5d   : > { %3813 = vmatprep.subr.mxu1 %v4209_v2  ;;  %v4566_v6 = vld [vmem:[#allocation2] sm:$0xff]  ;;  %s4220_s26 = smov 64   ;;  %s5086_s30 = sld [smem:[#allocation20_spill]] }
  0x5e   : > { %3814 = vmatpush3.msra.mxu1 %v1177_v3  ;;  %v3677_v7 = vld [vmem:[%s5077_s5] ss:$0 sm:$0xff]  ;;  %s4221_s5 = smov 48  }
  0x5f   : > { %3815 = vmatprep.subr.mxu1 %v4209_v2 }
  0x60   : > { %3816 = vmatpush3.msra.mxu1 %v1176_v4 }
  0x61   : > { %3817 = vmatprep.subr.mxu1 %v4209_v2  ;;  %v1962_v24 = vld [vmem:[%s5083_s27 + $0x18] sm:$0xff] }
  0x62   : > { %3818 = vmatpush3.msra.mxu1 %v1175_v5  ;;  %s5080_s12 = scalar_lea.vmem %s5079_s7, %s5078_s20  ;;  %s4223_s7 = smov 8  }
  0x63   : > { %3820 = vmatmul.mubr.msk.f32.vlgmr.msra.gmra.mxu1 %vm1186_vm2, %v4566_v6  ;;  %3822 = vmatprep.subr.mxu1 %v4209_v2  ;;  %v1265_v19 = vld [vmem:[%s5080_s12] sm:$0x1]  ;;  %s4224_s12 = smov 16  }
  0x64   : > { %3824 = vmatprep.mubr.msk.f32.mxu1 %vm4210_vm1, %v4209_v2  ;;  %vm1266_vm4 = vcmp.gt.f32.partialorder %v1265_v19, 0.5 }
  0x65   : > { %v1267_v23 = vsel %vm1266_vm4, 1, %v4218_v22 }
  0x66   : > { %v1271_v25 = vrot.slane %v1267_v23, %v1270_v21 }
  0x68   : > { %vm1272_vm6 = vcmp.eq.s32.totalorder %v1271_v25, 1 }
  0x69   : > { %vm4628_vm7 = vmand %vm1264_vm5, %vm1272_vm6 }
 0x123   : > { %v1256_v8 = vpop.f32.mrf.mxu1 }
 0x124   : > { %v4579_v9 = vadd.f32 %v3677_v7, %v1256_v8 }
 0x125   : > { %v3821_v10 = vpop.f32.mrf.mxu1 }
 0x126   : > { %1441 = vrot.lane.b32.xlu1 %v4579_v9, %s4211_s24  ;;  %1275 = vrot.lane.b32.xlu0 %v4579_v9, %s4212_s0 }
 0x12a   : > { %1610 = vrot.lane.b32.xlu1 %v4579_v9, %s4213_s10  ;;  %1443 = vrot.lane.b32.xlu0 %v4579_v9, %s4214_s2 }
 0x12e   : > { %1777 = vrot.lane.b32.xlu1 %v4579_v9, %s4215_s9  ;;  %1608 = vrot.lane.b32.xlu0 %v4579_v9, %s4216_s23 }
 0x132   : > { %1775 = vrot.lane.b32.xlu0 %v4579_v9, %s4217_s28 }
 0x198   : > { %v1442_v11 = vpop.permute.xlu1 %1441  ;;  %v1276_v12 = vpop.permute.xlu0 %1275 }
 0x199   : > { %3823 = vmatpush3.xpose.msk.msra.mxu1 %vm1277_vm3, %v1276_v12 }
 0x19a   : > { %3827 = vmatprep.subr.mxu1 %v4209_v2 }
 0x19c   : > { %3825 = vmatmul.mubr.msk.f32.vlgmr.msra.gmra.mxu1 %vm1277_vm3, %v4579_v9  ;;  %v1444_v13 = vpop.permute.xlu0 %1443  ;;  %v1611_v14 = vpop.permute.xlu1 %1610 }
 0x19d   : > { %3833 = vmatpush3.xpose.msk.msra.mxu0 %vm1277_vm3, %v1444_v13  ;;  %3829 = vmatprep.mubr.msk.f32.mxu1 %vm4210_vm1, %v4209_v2 }
 0x19e   : > { %3842 = vmatprep.subr.mxu0 %v4209_v2 }
 0x1a0   : > { %3835 = vmatmul.mubr.msk.f32.vlgmr.msra.gmra.mxu0 %vm1277_vm3, %v1442_v11  ;;  %v1609_v15 = vpop.permute.xlu0 %1608  ;;  %v1778_v16 = vpop.permute.xlu1 %1777 }
 0x1a1   : > { %3843 = vmatpush3.xpose.msk.msra.mxu0 %vm1277_vm3, %v1611_v14  ;;  %3844 = vmatprep.mubr.msk.f32.mxu0 %vm4210_vm1, %v4209_v2 }
 0x1a2   : > { %3852 = vmatprep.subr.mxu0 %v4209_v2 }
 0x1a4   : > { %3845 = vmatmul.mubr.msk.f32.vlgmr.msra.gmra.mxu0 %vm1277_vm3, %v1609_v15  ;;  %v1776_v17 = vpop.permute.xlu0 %1775 }
 0x1a5   : > { %3853 = vmatpush3.xpose.msk.msra.mxu0 %vm1277_vm3, %v1778_v16  ;;  %3854 = vmatprep.mubr.msk.f32.mxu0 %vm4210_vm1, %v4209_v2 }
 0x1a6   : > { %3862 = vmatprep.subr.mxu0 %v4209_v2 }
 0x1a8   : > { %3855 = vmatmul.mubr.msk.f32.vlgmr.msra.gmra.mxu0 %vm1277_vm3, %v1776_v17 }
 0x1a9   : > { %3870 = vmatprep.mubr.msk.f32.mxu0 %vm4210_vm1, %v4209_v2  ;;  %3863 = vmatpush3.msra.mxu0 %v1962_v24 }
 0x1aa   : > { %3864 = vmatprep.subr.mxu0 %v4209_v2 }
 0x25c   : > { %v1348_v26 = vpop.f32.mrf.mxu1 }
 0x25d   : > { %v1352_v28 = vmul.f32 0.35355338, %v1348_v26 }
 0x25e   : > { %v3826_v29 = vpop.f32.mrf.mxu1 }
 0x25f   : > { %v1353_v30 = vsel %vm4628_vm7, %v1352_v28, -1e+09  ;;  %v1961_v29 = vld [vmem:[%s5083_s27 + $0x10] sm:$0xff] }
 0x260   : > { %v1515_v31 = vpop.f32.mrf.mxu0  ;;  %v1354_v32 = vsel %vm1277_vm3, %v1353_v30, -inf  ;;  %3865 = vmatpush3.msra.mxu0 %v1961_v29 }
 0x261   : > { %v1519_v33 = vmul.f32 0.35355338, %v1515_v31  ;;  %1355 = vmax.xlane.f32.xlu1 %v1354_v32  ;;  %3866 = vmatprep.subr.mxu0 %v4209_v2  ;;  %v1959_v31 = vld [vmem:[%s5083_s27] sm:$0xff] }
 0x262   : > { %v3836_v34 = vpop.f32.mrf.mxu0 }
 0x263   : > { %v1520_v35 = vsel %vm4628_vm7, %v1519_v33, -1e+09 }
 0x264   : > { %v1682_v36 = vpop.f32.mrf.mxu0  ;;  %v1521_v37 = vsel %vm1277_vm3, %v1520_v35, -inf }
 0x265   : > { %v1686_v38 = vmul.f32 0.35355338, %v1682_v36  ;;  %1522 = vmax.xlane.f32.xlu0 %v1521_v37 }
 0x266   : > { %v3846_v39 = vpop.f32.mrf.mxu0 }
 0x267   : > { %v1687_v40 = vsel %vm4628_vm7, %v1686_v38, -1e+09 }
 0x268   : > { %v1849_v41 = vpop.f32.mrf.mxu0  ;;  %v1688_v42 = vsel %vm1277_vm3, %v1687_v40, -inf }
 0x269   : > { %v1853_v43 = vmul.f32 0.35355338, %v1849_v41  ;;  %1689 = vmax.xlane.f32.xlu0 %v1688_v42 }
 0x26a   : > { %v3856_v44 = vpop.f32.mrf.mxu0 }
 0x26b   : > { %v1854_v45 = vsel %vm4628_vm7, %v1853_v43, -1e+09 }
 0x26c   : > { %v1855_v46 = vsel %vm1277_vm3, %v1854_v45, -inf }
 0x26d   : > { %1856 = vmax.xlane.f32.xlu1 %v1855_v46 }
 0x27e   : > { %1532 = vrot.lane.b32.xlu1 %v4579_v9, %s4219_s18  ;;  %s4225_s18 = smov 24  }
 0x2ea   : > { %v1356_v47 = vpop.xlane.xlu1 %1355 }
 0x2eb   : > { %v1357_v48 = vsub.f32 %v1353_v30, %v1356_v47  ;;  %v1960_v30 = vld [vmem:[%s5083_s27 + $0x8] sm:$0xff] }
 0x2ec   : > { %3867 = vmatpush3.msra.mxu0 %v1960_v30 }
 0x2ed   : > { %v1358_v49 = vmul.f32 1.442695, %v1357_v48  ;;  %3868 = vmatprep.subr.mxu0 %v4209_v2 }
 0x2ee   : > { %v1523_v50 = vpop.xlane.xlu0 %1522  ;;  %3869 = vmatpush3.msra.mxu0 %v1959_v31 }
 0x2ef   : > { %4077 = vpow2.f32 %v1358_v49  ;;  %v1524_v51 = vsub.f32 %v1520_v35, %v1523_v50  ;;  %3884 = vmatprep.subr.mxu0 %v4209_v2 }
 0x2f1   : > { %v1525_v52 = vmul.f32 1.442695, %v1524_v51 }
 0x2f2   : > { %v1690_v62 = vpop.xlane.xlu0 %1689 }
 0x2f3   : > { %4079 = vpow2.f32 %v1525_v52  ;;  %v1691_v63 = vsub.f32 %v1687_v40, %v1690_v62 }
 0x2f5   : > { %v1692_v0 = vmul.f32 1.442695, %v1691_v63 }
 0x2f6   : > { %v1857_v53 = vpop.xlane.xlu1 %1856 }
 0x2f7   : > { %v1858_v54 = vsub.f32 %v1854_v45, %v1857_v53  ;;  %v2161_v53 = vld [vmem:[%s4502_s25 + $0x18] sm:$0xff] }
 0x2f9   : > { %v1859_v55 = vmul.f32 1.442695, %v1858_v54  ;;  %v2160_v54 = vld [vmem:[%s4502_s25 + $0x10] sm:$0xff] }
 0x2fa   : > { %v1533_v4 = vpop.permute.xlu1 %1532 }
 0x2fb   : > { %4081 = vpow2.f32 %v1859_v55  ;;  %v2158_v55 = vld [vmem:[%s4502_s25] sm:$0xff] }
 0x2fc   : > { %v4078_v56 = vpop.eup %4077  ;;  %4083 = vpow2.f32 %v1692_v0 }
 0x2fd   : > { %v1360_v57 = vsel %vm1277_vm3, %v4078_v56, 0.0 }
 0x2fe   : > { %1361 = vadd.xlane.f32.xlu0 %v1360_v57  ;;  %v2077_v57 = vld [vmem:[%s4493_s8 + $0x18] sm:$0xff] }
 0x300   : > { %v4080_v58 = vpop.eup %4079 }
 0x301   : > { %v1527_v59 = vsel %vm1277_vm3, %v4080_v58, 0.0 }
 0x302   : > { %1528 = vadd.xlane.f32.xlu1 %v1527_v59  ;;  %v2075_v59 = vld [vmem:[%s4493_s8 + $0x8] sm:$0xff] }
 0x308   : > { %v4082_v60 = vpop.eup %4081 }
 0x309   : > { %v1861_v61 = vsel %vm1277_vm3, %v4082_v60, 0.0  ;;  %v4084_v1 = vpop.eup %4083 }
 0x30a   : > { %1862 = vadd.xlane.f32.xlu1 %v1861_v61  ;;  %v1694_v3 = vsel %vm1277_vm3, %v4084_v1, 0.0 }
 0x314   : > { %1365 = vrot.lane.b32.xlu0 %v4579_v9, %s4220_s26  ;;  %s5087_s26 = sld [smem:[#allocation31_spill]] }
 0x31b   : > { %1699 = vrot.lane.b32.xlu1 %v4579_v9, %s4221_s5  ;;  %s5088_s5 = scalar_lea.vmem %s5087_s26, %s4444_s1  ;;  %s5092_s26 = scalar_lea.vmem %s4976_s11, %s4444_s1 }
 0x333   : > { %1695 = vadd.xlane.f32.xlu0 %v1694_v3 }
 0x349   : > { %1866 = vrot.lane.b32.xlu0 %v4579_v9, %s4222_s21  ;;  %s5084_s21 = sld [smem:[#allocation30_spill]] }
 0x34f   : > { %s5085_s27 = scalar_lea.vmem %s5084_s21, %s4444_s1 }
 0x350   : > { %v3691_v42 = vld [vmem:[%s5085_s27] ss:$0 sm:$0xff]  ;;  %s5089_s27 = sld [smem:[#allocation32_spill]] }
 0x356   : > { %s5090_s17 = scalar_lea.vmem %s5089_s27, %s4444_s1 }
 0x387   : > { %v1362_v5 = vpop.xlane.xlu0 %1361 }
 0x388   : > { %4085 = vrcp.f32 %v1362_v5 }
 0x38b   : > { %v1366_v7 = vpop.permute.xlu0 %1365  ;;  %v1529_v8 = vpop.xlane.xlu1 %1528 }
 0x38c   : > { %4087 = vrcp.f32 %v1529_v8  ;;  %3828 = vmatpush3.msra.mxu1 %v1366_v7 }
 0x38d   : > { %3837 = vmatprep.subr.mxu1 %v4209_v2 }
 0x393   : > { %v1863_v11 = vpop.xlane.xlu1 %1862 }
 0x395   : > { %v4086_v10 = vpop.eup %4085 }
 0x396   : > { %v1364_v12 = vmul.f32 %v4086_v10, %v4078_v56  ;;  %v1174_v56 = vld [vmem:[%s5086_s30] sm:$0xff]  ;;  %s5091_s30 = scalar_lea.vmem %s4978_s13, %s4444_s1 }
 0x397   : > { %v1700_v14 = vpop.permute.xlu1 %1699  ;;  %v3697_v8 = vld [vmem:[%s5091_s30] ss:$0 sm:$0xff] }
 0x398   : > { %3830 = vmatmul.mubr.msk.f32.vlgmr.msra.gmra.mxu1 %vm1277_vm3, %v1364_v12 }
 0x399   : > { %v4088_v13 = vpop.eup %4087  ;;  %3838 = vmatpush3.msra.mxu1 %v1533_v4  ;;  %3839 = vmatprep.mubr.msk.f32.mxu1 %vm4210_vm1, %v4209_v2  ;;  %v3694_v4 = vld [vmem:[%s5090_s17] ss:$0 sm:$0xff] }
 0x39a   : > { %3847 = vmatprep.subr.mxu1 %v4209_v2  ;;  %v1531_v9 = vmul.f32 %v4088_v13, %v4080_v58  ;;  %v2076_v58 = vld [vmem:[%s4493_s8 + $0x10] sm:$0xff] }
 0x39c   : > { %3840 = vmatmul.mubr.msk.f32.vlgmr.msra.gmra.mxu1 %vm1277_vm3, %v1531_v9  ;;  %v3695_v9 = vld [vmem:[%s5092_s26] ss:$0 sm:$0xff] }
 0x39d   : > { %3848 = vmatpush3.msra.mxu1 %v1700_v14  ;;  %3849 = vmatprep.mubr.msk.f32.mxu1 %vm4210_vm1, %v4209_v2 }
 0x39e   : > { %3857 = vmatprep.subr.mxu1 %v4209_v2 }
 0x3bc   : > { %v1696_v15 = vpop.xlane.xlu0 %1695 }
 0x3bd   : > { %4089 = vrcp.f32 %v1696_v15 }
 0x3be   : > { %4091 = vrcp.f32 %v1863_v11 }
 0x3c0   : > { %v1867_v19 = vpop.permute.xlu0 %1866 }
 0x3ca   : > { %v4090_v16 = vpop.eup %4089 }
 0x3cb   : > { %v1698_v17 = vmul.f32 %v4090_v16, %v4084_v1  ;;  %v4092_v18 = vpop.eup %4091  ;;  %v3693_v1 = vld [vmem:[%s5088_s5] ss:$0 sm:$0xff] }
 0x3cc   : > { %v1865_v23 = vmul.f32 %v4092_v18, %v4082_v60  ;;  %v2074_v60 = vld [vmem:[%s4493_s8] sm:$0xff] }
 0x3cd   : > { %3850 = vmatmul.mubr.msk.f32.vlgmr.msra.gmra.mxu1 %vm1277_vm3, %v1698_v17 }
 0x3ce   : > { %3858 = vmatpush3.msra.mxu1 %v1867_v19  ;;  %3859 = vmatprep.mubr.msk.f32.mxu1 %vm4210_vm1, %v4209_v2 }
 0x3cf   : > { %3873 = vmatprep.subr.mxu1 %v4209_v2 }
 0x3d1   : > { %3860 = vmatmul.mubr.msk.f32.vlgmr.msra.gmra.mxu1 %vm1277_vm3, %v1865_v23 }
 0x3d2   : > { %3881 = vmatprep.mubr.msk.f32.mxu1 %vm4210_vm1, %v4209_v2  ;;  %3874 = vmatpush3.msra.mxu1 %v2077_v57 }
 0x3d3   : > { %3875 = vmatprep.subr.mxu1 %v4209_v2 }
 0x3d4   : > { %3876 = vmatpush3.msra.mxu1 %v2076_v58 }
 0x3d5   : > { %3877 = vmatprep.subr.mxu1 %v4209_v2 }
 0x3d6   : > { %3878 = vmatpush3.msra.mxu1 %v2075_v59 }
 0x3d7   : > { %3879 = vmatprep.subr.mxu1 %v4209_v2 }
 0x3d8   : > { %3880 = vmatpush3.msra.mxu1 %v2074_v60 }
 0x3d9   : > { %3895 = vmatprep.subr.mxu1 %v4209_v2 }
 0x458   : > { %v1437_v25 = vpop.f32.mrf.mxu1 }
 0x45a   : > { %v3831_v26 = vpop.f32.mrf.mxu1 }
 0x45c   : > { %v1604_v27 = vpop.f32.mrf.mxu1 }
 0x45d   : > { %1943 = vrot.lane.b32.xlu1 %v1604_v27, %s4223_s7 }
 0x45e   : > { %v3841_v28 = vpop.f32.mrf.mxu1 }
 0x48d   : > { %v1771_v32 = vpop.f32.mrf.mxu1 }
 0x48e   : > { %1947 = vrot.lane.b32.xlu0 %v1771_v32, %s4224_s12 }
 0x48f   : > { %v3851_v33 = vpop.f32.mrf.mxu1 }
 0x491   : > { %v1938_v34 = vpop.f32.mrf.mxu1 }
 0x492   : > { %1951 = vrot.lane.b32.xlu1 %v1938_v34, %s4225_s18 }
 0x493   : > { %v3861_v35 = vpop.f32.mrf.mxu1 }
 0x4cf   : > { %v1944_v36 = vpop.permute.xlu1 %1943 }
 0x4d0   : > { %v1954_v38 = vsel %vm1277_vm3, %v1437_v25, %v1944_v36 }
 0x500   : > { %v1948_v37 = vpop.permute.xlu0 %1947 }
 0x501   : > { %v1956_v39 = vsel %vm1955_vm8, %v1954_v38, %v1948_v37 }
 0x504   : > { %v1952_v40 = vpop.permute.xlu1 %1951 }
 0x505   : > { %v1958_v41 = vsel %vm1957_vm9, %v1956_v39, %v1952_v40 }
 0x506   : > { %3871 = vmatmul.mubr.msk.f32.vlgmr.msra.gmra.mxu0 %vm1186_vm2, %v1958_v41 }
 0x507   : > { %3892 = vmatprep.mubr.msk.f32.mxu0 %vm4210_vm1, %v4209_v2  ;;  %3885 = vmatpush3.msra.mxu0 %v2161_v53 }
 0x508   : > { %3886 = vmatprep.subr.mxu0 %v4209_v2 }
 0x509   : > { %3887 = vmatpush3.msra.mxu0 %v2160_v54 }
 0x50a   : > { %3888 = vmatprep.subr.mxu0 %v4209_v2 }
 0x5c6   : > { %v2039_v43 = vpop.f32.mrf.mxu0 }
 0x5c7   : > { %v2040_v44 = vadd.f32 %v3691_v42, %v2039_v43 }
 0x5c8   : > { %v3872_v45 = vpop.f32.mrf.mxu0 }
 0x5c9   : > { %v2045_v46 = vadd.f32 %v2040_v44, %v4566_v6  ;;  %v2159_v6 = vld [vmem:[%s4502_s25 + $0x8] sm:$0xff] }
 0x5ca   : > { %3889 = vmatpush3.msra.mxu0 %v2159_v6 }
 0x5cb   : > { %v2046_v47 = vsel %vm1186_vm2, %v2045_v46, 0.0  ;;  %3890 = vmatprep.subr.mxu0 %v4209_v2 }
 0x5cc   : > { %2047 = vadd.xlane.f32.xlu0 %v2046_v47  ;;  %3891 = vmatpush3.msra.mxu0 %v2158_v55 }
 0x5cd   : > { %3893 = vmatmul.mubr.msk.f32.vlgmr.msra.gmra.mxu0 %vm1186_vm2, %v1174_v56  ;;  %3905 = vmatprep.subr.mxu0 %v4209_v2 }
 0x5ce   : > { %3907 = vmatprep.mubr.msk.f32.mxu0 %vm4210_vm1, %v4209_v2 }
 0x655   : > { %v2048_v48 = vpop.xlane.xlu0 %2047 }
 0x656   : > { %v2050_v49 = vmul.f32 0.03125, %v2048_v48 }
 0x658   : > { %v2051_v50 = vsub.f32 %v2045_v46, %v2050_v49 }
 0x65a   : > { %v2052_v51 = vmul.f32 %v2051_v50, %v2051_v50 }
 0x65c   : > { %v2053_v52 = vsel %vm1186_vm2, %v2052_v51, 0.0 }
 0x65d   : > { %2054 = vadd.xlane.f32.xlu1 %v2053_v52 }
 0x68d   : > { %v2238_v10 = vpop.f32.mrf.mxu0 }
 0x68e   : > { %v4734_v11 = vadd.f32 %v3697_v8, %v2238_v10 }
 0x68f   : > { %v3894_v12 = vpop.f32.mrf.mxu0 }
 0x690   : > { %2417 = vrot.lane.b32.xlu0 %v4734_v11, %s4211_s24 }
 0x694   : > { %2584 = vrot.lane.b32.xlu0 %v4734_v11, %s4216_s23 }
 0x698   : > { %2751 = vrot.lane.b32.xlu0 %v4734_v11, %s4217_s28 }
 0x6e6   : > { %v2055_v61 = vpop.xlane.xlu1 %2054 }
 0x6e7   : > { %v2056_v62 = vmul.f32 0.03125, %v2055_v61 }
 0x6e9   : > { %v2057_v63 = vadd.f32 1e-05, %v2056_v62 }
 0x6eb   : > { %4093 = vrsqrt.f32 %v2057_v63 }
 0x6f8   : > { %v4094_v0 = vpop.eup %4093 }
 0x6f9   : > { %v2059_v3 = vmul.f32 %v4094_v0, %v2051_v50 }
 0x6fb   : > { %v2066_v5 = vmul.f32 %v3693_v1, %v2059_v3 }
 0x6fd   : > { %v4723_v7 = vadd.f32 %v3694_v4, %v2066_v5 }
 0x6ff   : > { %3882 = vmatmul.mubr.msk.f32.vlgmr.msra.gmra.mxu1 %vm1186_vm2, %v4723_v7 }
 0x700   : > { %3897 = vmatprep.mubr.msk.f32.mxu1 %vm4210_vm1, %v4209_v2  ;;  %3896 = vmatpush3.xpose.msk.msra.mxu1 %vm1277_vm3, %v4734_v11 }
 0x701   : > { %3900 = vmatprep.subr.mxu1 %v4209_v2 }
 0x702   : > { %v2418_v13 = vpop.permute.xlu0 %2417 }
 0x703   : > { %3906 = vmatpush3.xpose.msk.msra.mxu0 %vm1277_vm3, %v2418_v13 }
 0x704   : > { %3915 = vmatprep.subr.mxu0 %v4209_v2 }
 0x706   : > { %v2585_v17 = vpop.permute.xlu0 %2584 }
 0x70a   : > { %v2752_v23 = vpop.permute.xlu0 %2751 }
 0x7bf   : > { %v2154_v14 = vpop.f32.mrf.mxu1 }
 0x7c0   : > { %v2155_v15 = vadd.f32 %v3695_v9, %v2154_v14 }
 0x7c1   : > { %v3883_v16 = vpop.f32.mrf.mxu1 }
 0x7c2   : > { %2415 = vrot.lane.b32.xlu1 %v2155_v15, %s4211_s24  ;;  %3898 = vmatmul.mubr.msk.f32.vlgmr.msra.gmra.mxu1 %vm1277_vm3, %v2155_v15 }
 0x7c3   : > { %3902 = vmatprep.mubr.msk.f32.mxu1 %vm4210_vm1, %v4209_v2 }
 0x7c6   : > { %2582 = vrot.lane.b32.xlu1 %v2155_v15, %s4216_s23  ;;  %s5103_s23 = sld [smem:[#allocation42_spill]] }
 0x7ca   : > { %2749 = vrot.lane.b32.xlu1 %v2155_v15, %s4217_s28  ;;  %s5093_s28 = sld [smem:[#allocation25_spill]] }
 0x7d0   : > { %s5094_s5 = scalar_lea.vmem %s5093_s28, %s5078_s20  ;;  %s5104_s28 = scalar_lea.vmem %s5103_s23, %s4444_s1 }
 0x7d1   : > { %v2242_v25 = vld [vmem:[%s5094_s5] sm:$0x1]  ;;  %s5105_s5 = sld [smem:[#allocation9_spill]] }
 0x7d2   : > { %vm2243_vm10 = vcmp.gt.f32.partialorder %v2242_v25, 0.5  ;;  %v2933_v25 = vld [vmem:[%s4511_s3 + $0x10] sm:$0xff] }
 0x7d3   : > { %v2321_v26 = vsel %vm2243_vm10, 1, %v4218_v22 }
 0x7d4   : > { %v2325_v27 = vrot.slane %v2321_v26, %v1270_v21  ;;  %v2932_v26 = vld [vmem:[%s4511_s3 + $0x8] sm:$0xff] }
 0x7d6   : > { %vm2326_vm11 = vcmp.eq.s32.totalorder %v2325_v27, 1  ;;  %v2931_v27 = vld [vmem:[%s4511_s3] sm:$0xff] }
 0x7d7   : > { %p3721_p1 = scmp.ne.s32.totalorder %s5105_s5, 1 }
 0x7d8   : > { %s5108_s8 = scalar_lea.vmem (!%p3721_p1), [#allocation3], %s4437_s4 }
 0x834   : > { %v2416_v18 = vpop.permute.xlu1 %2415 }
 0x835   : > { %3908 = vmatmul.mubr.msk.f32.vlgmr.msra.gmra.mxu0 %vm1277_vm3, %v2416_v18 }
 0x836   : > { %3916 = vmatpush3.xpose.msk.msra.mxu0 %vm1277_vm3, %v2585_v17  ;;  %3917 = vmatprep.mubr.msk.f32.mxu0 %vm4210_vm1, %v4209_v2 }
 0x837   : > { %3925 = vmatprep.subr.mxu0 %v4209_v2 }
 0x838   : > { %v2583_v19 = vpop.permute.xlu1 %2582 }
 0x839   : > { %3918 = vmatmul.mubr.msk.f32.vlgmr.msra.gmra.mxu0 %vm1277_vm3, %v2583_v19 }
 0x83a   : > { %3926 = vmatpush3.xpose.msk.msra.mxu0 %vm1277_vm3, %v2752_v23  ;;  %3927 = vmatprep.mubr.msk.f32.mxu0 %vm4210_vm1, %v4209_v2 }
 0x83b   : > { %3935 = vmatprep.subr.mxu0 %v4209_v2 }
 0x83c   : > { %v2750_v24 = vpop.permute.xlu1 %2749 }
 0x83d   : > { %3928 = vmatmul.mubr.msk.f32.vlgmr.msra.gmra.mxu0 %vm1277_vm3, %v2750_v24  ;;  %v2934_v24 = vld [vmem:[%s4511_s3 + $0x18] sm:$0xff] }
 0x83e   : > { %3943 = vmatprep.mubr.msk.f32.mxu0 %vm4210_vm1, %v4209_v2  ;;  %3936 = vmatpush3.msra.mxu0 %v2934_v24 }
 0x83f   : > { %3937 = vmatprep.subr.mxu0 %v4209_v2 }
 0x840   : > { %3938 = vmatpush3.msra.mxu0 %v2933_v25 }
 0x841   : > { %3939 = vmatprep.subr.mxu0 %v4209_v2 }
 0x842   : > { %3940 = vmatpush3.msra.mxu0 %v2932_v26 }
 0x843   : > { %3941 = vmatprep.subr.mxu0 %v4209_v2 }
 0x844   : > { %3942 = vmatpush3.msra.mxu0 %v2931_v27 }
 0x845   : > { %3957 = vmatprep.subr.mxu0 %v4209_v2 }
 0x882   : > { %v2316_v28 = vpop.f32.mrf.mxu1 }
 0x883   : > { %v2320_v29 = vmul.f32 0.35355338, %v2316_v28 }
 0x884   : > { %v3899_v30 = vpop.f32.mrf.mxu1 }
 0x885   : > { %v2327_v31 = vsel %vm2326_vm11, %v2320_v29, -1e+09 }
 0x886   : > { %v2328_v32 = vsel %vm1277_vm3, %v2327_v31, -inf }
 0x887   : > { %2329 = vmax.xlane.f32.xlu0 %v2328_v32 }
 0x8f5   : > { %v2489_v33 = vpop.f32.mrf.mxu0 }
 0x8f6   : > { %v2493_v34 = vmul.f32 0.35355338, %v2489_v33 }
 0x8f7   : > { %v3909_v35 = vpop.f32.mrf.mxu0 }
 0x8f8   : > { %v2494_v36 = vsel %vm2326_vm11, %v2493_v34, -1e+09 }
 0x8f9   : > { %v2656_v37 = vpop.f32.mrf.mxu0  ;;  %v2495_v22 = vsel %vm1277_vm3, %v2494_v36, -inf }
 0x8fa   : > { %v2660_v38 = vmul.f32 0.35355338, %v2656_v37  ;;  %2496 = vmax.xlane.f32.xlu1 %v2495_v22 }
 0x8fb   : > { %v3919_v20 = vpop.f32.mrf.mxu0 }
 0x8fc   : > { %v2661_v21 = vsel %vm2326_vm11, %v2660_v38, -1e+09 }
 0x8fd   : > { %v2823_v39 = vpop.f32.mrf.mxu0  ;;  %v2662_v40 = vsel %vm1277_vm3, %v2661_v21, -inf }
 0x8fe   : > { %v2827_v41 = vmul.f32 0.35355338, %v2823_v39  ;;  %2663 = vmax.xlane.f32.xlu0 %v2662_v40 }
 0x8ff   : > { %v3929_v42 = vpop.f32.mrf.mxu0 }
 0x900   : > { %v2828_v43 = vsel %vm2326_vm11, %v2827_v41, -1e+09 }
 0x901   : > { %v2829_v44 = vsel %vm1277_vm3, %v2828_v43, -inf }
 0x902   : > { %2830 = vmax.xlane.f32.xlu0 %v2829_v44 }
 0x90b   : > { %2339 = vrot.lane.b32.xlu1 %v4734_v11, %s4212_s0 }
 0x910   : > { %v2330_v45 = vpop.xlane.xlu0 %2329 }
 0x911   : > { %v2331_v46 = vsub.f32 %v2327_v31, %v2330_v45 }
 0x913   : > { %v2332_v47 = vmul.f32 1.442695, %v2331_v46 }
 0x915   : > { %4095 = vpow2.f32 %v2332_v47 }
 0x922   : > { %v4096_v48 = vpop.eup %4095 }
 0x923   : > { %v2334_v49 = vsel %vm1277_vm3, %v4096_v48, 0.0 }
 0x92f   : > { %2335 = vadd.xlane.f32.xlu1 %v2334_v49  ;;  %v3047_v49 = vld [vmem:[%s4528_s29 + $0x10] sm:$0xff] }
 0x983   : > { %v2497_v50 = vpop.xlane.xlu1 %2496 }
 0x984   : > { %v2498_v51 = vsub.f32 %v2494_v36, %v2497_v50  ;;  %v3045_v50 = vld [vmem:[%s4528_s29] sm:$0xff] }
 0x986   : > { %v2499_v52 = vmul.f32 1.442695, %v2498_v51  ;;  %v3137_v51 = vld [vmem:[%s4542_s16 + $0x38] sm:$0xff] }
 0x987   : > { %v2340_v53 = vpop.permute.xlu1 %2339  ;;  %v2664_v54 = vpop.xlane.xlu0 %2663 }
 0x988   : > { %4097 = vpow2.f32 %v2499_v52  ;;  %v2665_v6 = vsub.f32 %v2661_v21, %v2664_v54  ;;  %3901 = vmatpush3.msra.mxu1 %v2340_v53  ;;  %v3136_v52 = vld [vmem:[%s4542_s16 + $0x30] sm:$0xff]  ;;  %v3135_v53 = vld [vmem:[%s4542_s16 + $0x28] sm:$0xff]  ;;  %v3134_v54 = vld [vmem:[%s4542_s16 + $0x20] sm:$0xff] }
 0x989   : > { %3910 = vmatprep.subr.mxu1 %v4209_v2 }
 0x98a   : > { %v2666_v55 = vmul.f32 1.442695, %v2665_v6  ;;  %v3133_v6 = vld [vmem:[%s4542_s16 + $0x18] sm:$0xff] }
 0x98b   : > { %v2831_v56 = vpop.xlane.xlu0 %2830 }
 0x98c   : > { %4099 = vpow2.f32 %v2666_v55  ;;  %v2832_v57 = vsub.f32 %v2828_v43, %v2831_v56 }
 0x98e   : > { %v2833_v58 = vmul.f32 1.442695, %v2832_v57 }
 0x990   : > { %4101 = vpow2.f32 %v2833_v58 }
 0x995   : > { %v4098_v59 = vpop.eup %4097 }
 0x996   : > { %v2501_v60 = vsel %vm1277_vm3, %v4098_v59, 0.0 }
 0x997   : > { %2502 = vadd.xlane.f32.xlu0 %v2501_v60 }
 0x999   : > { %v4100_v61 = vpop.eup %4099 }
 0x99a   : > { %v2668_v62 = vsel %vm1277_vm3, %v4100_v61, 0.0 }
 0x99b   : > { %2669 = vadd.xlane.f32.xlu1 %v2668_v62 }
 0x99d   : > { %v4102_v63 = vpop.eup %4101 }
 0x99e   : > { %v2835_v0 = vsel %vm1277_vm3, %v4102_v63, 0.0 }
 0x99f   : > { %2836 = vadd.xlane.f32.xlu0 %v2835_v0  ;;  %v3132_v0 = vld [vmem:[%s4542_s16 + $0x10] sm:$0xff] }
 0x9ac   : > { %2673 = vrot.lane.b32.xlu1 %v4734_v11, %s4213_s10  ;;  %s5095_s10 = scalar_lea.vmem %s4980_s15, %s4444_s1 }
 0x9ad   : > { %v3711_v20 = vld [vmem:[%s5095_s10] ss:$0 sm:$0xff]  ;;  %s5106_s10 = sld [smem:[#allocation43_spill]] (!%p3721_p1) }
 0x9b0   : > { %2840 = vrot.lane.b32.xlu1 %v4734_v11, %s4215_s9  ;;  %s5096_s9 = sld [smem:[#allocation36_spill]] }
 0x9b5   : > { %2506 = vrot.lane.b32.xlu0 %v4734_v11, %s4214_s2 }
 0x9b6   : > { %s5097_s20 = scalar_lea.vmem %s5096_s9, %s4444_s1 }
 0x9b8   : > { %v2336_v1 = vpop.xlane.xlu1 %2335 }
 0x9b9   : > { %4103 = vrcp.f32 %v2336_v1  ;;  %v3131_v1 = vld [vmem:[%s4542_s16 + $0x8] sm:$0xff] }
 0x9c6   : > { %v4104_v3 = vpop.eup %4103 }
 0x9c7   : > { %v2338_v4 = vmul.f32 %v4104_v3, %v4096_v48  ;;  %v3048_v48 = vld [vmem:[%s4528_s29 + $0x18] sm:$0xff]  ;;  %v3130_v3 = vld [vmem:[%s4542_s16] sm:$0xff] }
 0x9c9   : > { %3903 = vmatmul.mubr.msk.f32.vlgmr.msra.gmra.mxu1 %vm1277_vm3, %v2338_v4  ;;  %v3715_v4 = vld [vmem:[%s1151_s6] ss:$0 sm:$0xff]  ;;  %s5101_s6 = sld [smem:[#allocation41_spill]] }
 0x9ca   : > { %3912 = vmatprep.mubr.msk.f32.mxu1 %vm4210_vm1, %v4209_v2 }
 0x9cf   : > { %s5102_s22 = scalar_lea.vmem %s5101_s6, %s4444_s1 }
 0xa20   : > { %v2503_v5 = vpop.xlane.xlu0 %2502 }
 0xa21   : > { %4105 = vrcp.f32 %v2503_v5 }
 0xa24   : > { %v2670_v8 = vpop.xlane.xlu1 %2669 }
 0xa25   : > { %4107 = vrcp.f32 %v2670_v8 }
 0xa28   : > { %v2837_v10 = vpop.xlane.xlu0 %2836  ;;  %v2674_v11 = vpop.permute.xlu1 %2673 }
 0xa29   : > { %4109 = vrcp.f32 %v2837_v10 }
 0xa2c   : > { %v2507_v12 = vpop.permute.xlu0 %2506  ;;  %v2841_v16 = vpop.permute.xlu1 %2840 }
 0xa2d   : > { %3911 = vmatpush3.msra.mxu1 %v2507_v12 }
 0xa2e   : > { %v4106_v13 = vpop.eup %4105  ;;  %3920 = vmatprep.subr.mxu1 %v4209_v2 }
 0xa2f   : > { %v2505_v9 = vmul.f32 %v4106_v13, %v4098_v59  ;;  %v3713_v59 = vld [vmem:[%s5097_s20] ss:$0 sm:$0xff] }
 0xa30   : > { %v3717_v13 = vld [vmem:[%s1159_s14] ss:$0 sm:$0xff] }
 0xa31   : > { %3913 = vmatmul.mubr.msk.f32.vlgmr.msra.gmra.mxu1 %vm1277_vm3, %v2505_v9 }
 0xa32   : > { %v4108_v14 = vpop.eup %4107  ;;  %3921 = vmatpush3.msra.mxu1 %v2674_v11  ;;  %3922 = vmatprep.mubr.msk.f32.mxu1 %vm4210_vm1, %v4209_v2 }
 0xa33   : > { %3930 = vmatprep.subr.mxu1 %v4209_v2  ;;  %v2672_v15 = vmul.f32 %v4108_v14, %v4100_v61 }
 0xa35   : > { %3923 = vmatmul.mubr.msk.f32.vlgmr.msra.gmra.mxu1 %vm1277_vm3, %v2672_v15 }
 0xa36   : > { %v4110_v17 = vpop.eup %4109  ;;  %3931 = vmatpush3.msra.mxu1 %v2841_v16  ;;  %3932 = vmatprep.mubr.msk.f32.mxu1 %vm4210_vm1, %v4209_v2 }
 0xa37   : > { %v2839_v18 = vmul.f32 %v4110_v17, %v4102_v63  ;;  %3946 = vmatprep.subr.mxu1 %v4209_v2 }
 0xa39   : > { %3933 = vmatmul.mubr.msk.f32.vlgmr.msra.gmra.mxu1 %vm1277_vm3, %v2839_v18 }
 0xa3a   : > { %3954 = vmatprep.mubr.msk.f32.mxu1 %vm4210_vm1, %v4209_v2  ;;  %3947 = vmatpush3.msra.mxu1 %v3048_v48 }
 0xa3b   : > { %3948 = vmatprep.subr.mxu1 %v4209_v2 }
 0xa3c   : > { %3949 = vmatpush3.msra.mxu1 %v3047_v49 }
 0xa3d   : > { %3950 = vmatprep.subr.mxu1 %v4209_v2 }
 0xa89   : > { %v2411_v19 = vpop.f32.mrf.mxu1 }
 0xa8b   : > { %v3904_v23 = vpop.f32.mrf.mxu1 }
 0xaf1   : > { %v2578_v28 = vpop.f32.mrf.mxu1 }
 0xaf2   : > { %2917 = vrot.lane.b32.xlu0 %v2578_v28, %s4223_s7  ;;  %v3719_v28 = vld [vmem:[%s5102_s22] ss:$0 sm:$0xff] }
 0xaf3   : > { %v3914_v29 = vpop.f32.mrf.mxu1 }
 0xaf5   : > { %v2745_v30 = vpop.f32.mrf.mxu1 }
 0xaf6   : > { %2921 = vrot.lane.b32.xlu1 %v2745_v30, %s4224_s12  ;;  %v3720_v30 = vld [vmem:[%s5104_s28] ss:$0 sm:$0xff] }
 0xaf7   : > { %v3924_v31 = vpop.f32.mrf.mxu1 }
 0xaf9   : > { %v2912_v32 = vpop.f32.mrf.mxu1 }
 0xafa   : > { %2925 = vrot.lane.b32.xlu0 %v2912_v32, %s4225_s18  ;;  %s5098_s18 = sld [smem:[#allocation37_spill]] }
 0xafb   : > { %v3934_v33 = vpop.f32.mrf.mxu1 }
 0xb00   : > { %s5099_s21 = scalar_lea.vmem %s5098_s18, %s4444_s1 }
 0xb01   : > { %v3714_v61 = vld [vmem:[%s5099_s21] ss:$0 sm:$0xff]  ;;  %s5107_s21 = sld [smem:[#allocation44_spill]] (!%p3721_p1) }
 0xb64   : > { %v2918_v34 = vpop.permute.xlu0 %2917 }
 0xb65   : > { %v2928_v36 = vsel %vm1277_vm3, %v2411_v19, %v2918_v34 }
 0xb68   : > { %v2922_v35 = vpop.permute.xlu1 %2921 }
 0xb69   : > { %v2929_v37 = vsel %vm1955_vm8, %v2928_v36, %v2922_v35 }
 0xb6c   : > { %v2926_v22 = vpop.permute.xlu0 %2925 }
 0xb6d   : > { %v2930_v38 = vsel %vm1957_vm9, %v2929_v37, %v2926_v22 }
 0xb6e   : > { %3944 = vmatmul.mubr.msk.f32.vlgmr.msra.gmra.mxu0 %vm1186_vm2, %v2930_v38 }
 0xb6f   : > { %3973 = vmatprep.mubr.msk.f32.mxu0 %vm4210_vm1, %v4209_v2  ;;  %3958 = vmatpush3.msra.mxu0 %v3137_v51 }
 0xb70   : > { %3959 = vmatprep.subr.mxu0 %v4209_v2 }
 0xb71   : > { %3960 = vmatpush3.msra.mxu0 %v3136_v52 }
 0xb72   : > { %3961 = vmatprep.subr.mxu0 %v4209_v2 }
 0xb73   : > { %3962 = vmatpush3.msra.mxu0 %v3135_v53 }
 0xb74   : > { %3963 = vmatprep.subr.mxu0 %v4209_v2 }
 0xb75   : > { %3964 = vmatpush3.msra.mxu0 %v3134_v54 }
 0xb76   : > { %3965 = vmatprep.subr.mxu0 %v4209_v2 }
 0xb77   : > { %3966 = vmatpush3.msra.mxu0 %v3133_v6 }
 0xb78   : > { %3967 = vmatprep.subr.mxu0 %v4209_v2 }
 0xb79   : > { %3968 = vmatpush3.msra.mxu0 %v3132_v0 }
 0xb7a   : > { %3969 = vmatprep.subr.mxu0 %v4209_v2 }
 0xb7b   : > { %3970 = vmatpush3.msra.mxu0 %v3131_v1 }
 0xb7c   : > { %3971 = vmatprep.subr.mxu0 %v4209_v2 }
 0xb7d   : > { %3972 = vmatpush3.msra.mxu0 %v3130_v3 }
 0xc2e   : > { %v3011_v21 = vpop.f32.mrf.mxu0 }
 0xc2f   : > { %v3012_v39 = vadd.f32 %v3711_v20, %v3011_v21 }
 0xc30   : > { %v3945_v40 = vpop.f32.mrf.mxu0 }
 0xc31   : > { %v3017_v41 = vadd.f32 %v3012_v39, %v4723_v7  ;;  %v3046_v7 = vld [vmem:[%s4528_s29 + $0x8] sm:$0xff] }
 0xc32   : > { %3951 = vmatpush3.msra.mxu1 %v3046_v7 }
 0xc33   : > { %v3018_v42 = vsel %vm1186_vm2, %v3017_v41, 0.0  ;;  %3952 = vmatprep.subr.mxu1 %v4209_v2 }
 0xc34   : > { %3019 = vadd.xlane.f32.xlu1 %v3018_v42  ;;  %3953 = vmatpush3.msra.mxu1 %v3045_v50 }
 0xcbd   : > { %v3020_v43 = vpop.xlane.xlu1 %3019 }
 0xcbe   : > { %v3021_v44 = vmul.f32 0.03125, %v3020_v43 }
 0xcc0   : > { %v3022_v45 = vsub.f32 %v3017_v41, %v3021_v44 }
 0xcc2   : > { %v3023_v46 = vmul.f32 %v3022_v45, %v3022_v45 }
 0xcc4   : > { %v3024_v47 = vsel %vm1186_vm2, %v3023_v46, 0.0 }
 0xcc5   : > { %3025 = vadd.xlane.f32.xlu0 %v3024_v47 }
 0xd4e   : > { %v3026_v55 = vpop.xlane.xlu0 %3025 }
 0xd4f   : > { %v3027_v56 = vmul.f32 0.03125, %v3026_v55 }
 0xd51   : > { %v3028_v57 = vadd.f32 1e-05, %v3027_v56 }
 0xd53   : > { %4111 = vrsqrt.f32 %v3028_v57 }
 0xd60   : > { %v4112_v58 = vpop.eup %4111 }
 0xd61   : > { %v3030_v60 = vmul.f32 %v4112_v58, %v3022_v45 }
 0xd63   : > { %v3037_v62 = vmul.f32 %v3713_v59, %v3030_v60 }
 0xd65   : > { %v3044_v63 = vadd.f32 %v3714_v61, %v3037_v62 }
 0xd67   : > { %3955 = vmatmul.mubr.msk.f32.vlgmr.msra.gmra.mxu1 %vm1186_vm2, %v3044_v63 }
 0xe27   : > { %v3125_v5 = vpop.f32.mrf.mxu1 }
 0xe28   : > { %v3126_v8 = vadd.f32 %v3715_v4, %v3125_v5 }
 0xe29   : > { %v3956_v10 = vpop.f32.mrf.mxu1 }
 0xe2a   : > { %v3129_v12 = vmax.f32 %v3126_v8, 0.0 }
 0xe2c   : > { %3974 = vmatmul.mubr.msk.f32.vlgmr.msra.gmra.mxu0 %vm3145_vm12, %v3129_v12 }
 0xeec   : > { %v3215_v11 = vpop.f32.mrf.mxu0 }
 0xeed   : > { %v3216_v2 = vadd.f32 %v3717_v13, %v3215_v11 }
 0xeee   : > { %v3975_v9 = vpop.f32.mrf.mxu0 }
 0xeef   : > { %v3221_v14 = vadd.f32 %v3216_v2, %v3044_v63 }
 0xef1   : > { %v3222_v15 = vsel %vm1186_vm2, %v3221_v14, 0.0 }
 0xef2   : > { %3223 = vadd.xlane.f32.xlu0 %v3222_v15 }
 0xf7b   : > { %v3224_v16 = vpop.xlane.xlu0 %3223 }
 0xf7c   : > { %v3225_v17 = vmul.f32 0.03125, %v3224_v16 }
 0xf7e   : > { %v3226_v18 = vsub.f32 %v3221_v14, %v3225_v17 }
 0xf80   : > { %v3227_v19 = vmul.f32 %v3226_v18, %v3226_v18 }
 0xf82   : > { %v3228_v23 = vsel %vm1186_vm2, %v3227_v19, 0.0 }
 0xf83   : > { %3229 = vadd.xlane.f32.xlu1 %v3228_v23 }
0x100c   : > { %v3230_v24 = vpop.xlane.xlu1 %3229 }
0x100d   : > { %v3231_v25 = vmul.f32 0.03125, %v3230_v24 }
0x100f   : > { %v3232_v26 = vadd.f32 1e-05, %v3231_v25 }
0x1011   : > { %4113 = vrsqrt.f32 %v3232_v26 }
0x101e   : > { %v4114_v27 = vpop.eup %4113 }
0x101f   : > { %v3234_v29 = vmul.f32 %v4114_v27, %v3226_v18 }
0x1021   : > { %v3241_v31 = vmul.f32 %v3719_v28, %v3234_v29  ;;  %3253 = sbr.rel (%p3721_p1) target bundleno = 4339 (0x10f3), region = 132 }
0x1023   : > { %v3248_v32 = vadd.f32 %v3720_v30, %v3241_v31 }
0x1025   : > { %3249 = vst.msk [vmem:[#allocation2] sm:$0xff] %vm1186_vm2, %v3248_v32 }
0x1026   : > { %v3257_v33 = vld [vmem:[%s5106_s10 + $0x18] sm:$0xff]  ;;  %v4226_v34 = vmov 0.0   ;;  %v3256_v35 = vld [vmem:[%s5106_s10 + $0x10] sm:$0xff]  ;;  %vm4227_vm13 = vmmov 0   ;;  %v3255_v36 = vld [vmem:[%s5106_s10 + $0x8] sm:$0xff] }
0x1027   : > { %3976 = vmatprep.subr.mxu0 %v4226_v34  ;;  %3984 = vmatprep.mubr.msk.f32.mxu0 %vm4227_vm13, %v4226_v34  ;;  %v3254_v37 = vld [vmem:[%s5106_s10] sm:$0xff] }
0x1028   : > { %3977 = vmatpush3.msra.mxu0 %v3257_v33  ;;  %v3722_v22 = vld [vmem:[%s5107_s21] ss:$0 sm:$0xff] }
0x1029   : > { %3978 = vmatprep.subr.mxu0 %v4226_v34 }
0x102a   : > { %3979 = vmatpush3.msra.mxu0 %v3256_v35 }
0x102b   : > { %3980 = vmatprep.subr.mxu0 %v4226_v34 }
0x102c   : > { %3981 = vmatpush3.msra.mxu0 %v3255_v36 }
0x102d   : > { %3982 = vmatprep.subr.mxu0 %v4226_v34 }
0x102e   : > { %3983 = vmatpush3.msra.mxu0 %v3254_v37 }
0x102f   : > { %3985 = vmatmul.mubr.msk.f32.vlgmr.msra.gmra.mxu0 %vm1186_vm2, %v3248_v32 }
0x10ef   : > { %v3334_v38 = vpop.f32.mrf.mxu0 }
0x10f0   : > { %v3335_v20 = vadd.f32 %v3722_v22, %v3334_v38 }
0x10f1   : > { %v3986_v21 = vpop.f32.mrf.mxu0 }
0x10f2   : > { %3338 = vst.msk [vmem:[%s5108_s8] sm:$0xff] %vm3145_vm12, %v3335_v20 }
0x10f3 PF: > { %s5109_s27 = sld [smem:[#allocation10_spill]]  ;;  %s5113_s26 = scalar_lea.vmem [#allocation3], %s4437_s4 }
0x10f4   : > { %s5110_s25 = sld [smem:[#allocation7_spill]]  ;;  %s3353_s24 = sshll.u32 %s5113_s26, 4  ;;  %s3354_s24 = int_to_ptr.vmem [resolvable:$true] %s3353_s24 }
0x10f5   : > { %s5112_s6 = sld [smem:[#allocation45_spill]]  ;;  %s4115_s5 = scalar_lea.vmem %s3354_s24, 128 }
0x10f6   : > { %p4116_p2 = scmp.ne.s32.totalorder %s3354_s24, %s4115_s5  ;;  %s4228_s3 = smov [#allocation3]  }
0x10f7   : > { %s4119_s0 = sshll.u32 %s4228_s3, 4  ;;  %s4120_s0 = int_to_ptr.vmem [resolvable:$false] %s4119_s0 }
0x10f8   : > { %p4117_p4 = pnand %p4116_p2, %p4413_p3  ;;  %s4121_s29 = scalar_lea.vmem %s4120_s0, 256 }
0x10f9   : > { %s3725_s17 = sshll.u32 %s5109_s27, 7  ;;  %p4122_p6 = scmp.lt.s32.totalorder %s3354_s24, %s4120_s0 }
0x10fa   : > { %s5114_s23 = sand.u32 1, %s5110_s25   ;;  %p4118_p5 = pneg %p4117_p4 }
0x10fb   : > { %s3351_s22 = scalar_lea.hbm %s5112_s6, %s3725_s17  ;;  %s3340_s28 = scalar_lea.sflag [#allocation4], %s5114_s23 }
0x10fc   : > { %p4123_p7 = scmp.lt.s32.totalorder %s4121_s29, %s4115_s5 }
0x10fe   : > { %p4124_p8 = por %p4123_p7, %p4122_p6 }
0x1100   : > { %p4125_p10 = pnand %p4124_p8, %p4118_p5 }
0x1102   : > { %4128 = shalt.err (!%p4125_p10)
}
0x1103   : > { %s4129_s2 = scalar_lea.hbm %s3351_s22, 128  ;;  %s4133_s9 = scalar_lea.hbm %s5112_s6, 256 }
0x1104   : > { %p4130_p11 = scmp.ne.s32.totalorder %s3351_s22, %s4129_s2  ;;  %p4134_p0 = scmp.lt.s32.totalorder %s3351_s22, %s5112_s6 }
0x1105   : > { %p4135_p1 = scmp.lt.s32.totalorder %s4133_s9, %s4129_s2 }
0x1106   : > { %p4131_p12 = pnand %p4130_p11, %p4413_p3 }
0x1107   : > { %p4136_p2 = por %p4135_p1, %p4134_p0 }
0x1108   : > { %p4132_p13 = pneg %p4131_p12 }
0x110a   : > { %p4137_p4 = pnand %p4136_p2, %p4132_p13 }
0x110c   : > { %4140 = shalt.err (!%p4137_p4)
}
0x110d   : > { %3987 = dma.vmem_to_hbm [thread:$0]  (%p4413_p3), %s3354_s24, 128, %s3351_s22, %s3340_s28  }
0x110e PF: > { %s5115_s12 = sld [smem:[#allocation13_spill]] }
0x110f   : > { %s5116_s18 = sld [smem:[#allocation6_spill]] }
0x1114   : > { %p3993_p5 = scmp.ge.s32.totalorder %s5115_s12, 2 }
0x1115   : > { %s3365_s8 = sand.u32 1, %s5116_s18  }
0x1116   : > { %p3990_p6 = pnand %p3993_p5, %p4423_p9  ;;  %s3366_s27 = scalar_lea.sflag [#allocation4], %s3365_s8 }
0x1118   : > { %p3991_p7 = pneg %p3990_p6 }
0x111a   : > { %4174 = dma.done.wait (%p3991_p7), %s3366_s27, 128  }
0x111b   : > { %4176 = vsyncadd (%p3991_p7), %s3366_s27, 4294967168  ;;  %s39_s0 = sadd.s32 1, %s5115_s12   ;;  %s5118_s27 = sld [smem:[#allocation7_spill]] }
0x111c   : > { %p36_p8 = scmp.ge.s32.totalorder %s39_s0, 6   ;;  %s5119_s3 = sld [smem:[#allocation8_spill]] }
0x111d   : > { %s5120_s7 = sld [smem:[#allocation18_spill]] }
0x111e   : > { %s5121_s28 = sld [smem:[#allocation11_spill]]  ;;  %38 = sbr.rel (!%p36_p8) target bundleno = 29 (0x1d), region = 236 }
0x111f   : > { %s5122_s8 = sld [smem:[#allocation12_spill]] }
0x1120   : > { %s5123_s4 = sld [smem:[#allocation14_spill]] }
0x1121   : > { %s5124_s29 = sld [smem:[#allocation16_spill]] }
0x1123   :  { %3371 = vsyncpa [#allocation4], 1 }
0x1124   :  { %3373 = vsyncpa [#allocation4 + $0x1], 1 }

</bundles_post_ra>
